<compile_context>
chip_gen: v6e
topology: v6e:2x2x1
jax: 0.10.0
libtpu: 0.0.40
codegen_flags: <defaults>
</compile_context>

<pallas_src>
import functools

import jax
import jax.numpy as jnp
from jax.experimental import pallas as pl
from jax.experimental.pallas import tpu as pltpu


_LANE = 128                       # TPU vreg lane width
_COL_CAP = 16384                  # widest lane-dense tile we try for
_MIN_PALLAS_BYTES = 256 * 1024    # below this, pure-JAX fast path


def _act_quant_kernel(x_ref, o_ref, *, a_bit: int):
    # a_bit == 32 never reaches the kernel (identity handled in the wrapper).
    # Compute in f32 so bf16/f16 inputs quantize to the same levels as a
    # float32 PyTorch reference; cast back on store.
    x = x_ref[...].astype(jnp.float32)
    xc = jnp.clip(x, 0.0, 1.0)
    if a_bit == 1:
        # torch.sign on clamp(x,0,1) -> 0 or +1; jnp.sign matches torch.sign.
        q = jnp.sign(xc)
    else:
        n = float(2 ** a_bit - 1)
        inv_n = 1.0 / n
        # jnp.round and torch.round both round half-to-even.
        q = jnp.round(xc * n) * inv_n
    o_ref[...] = q.astype(o_ref.dtype)


def _sublane_multiple(itemsize: int) -> int:
    # Sub-32-bit dtypes pack along sublanes: f32 -> 8, bf16/f16 -> 16, i8/fp8 -> 32.
    return {4: 8, 2: 16, 1: 32}.get(itemsize, 8)


def _chip_defaults() -> tuple[int, int, bool]:
    """Returns (target_block_bytes, vmem_limit_bytes, two_tensorcores_per_chip)."""
    kind = ""
    try:
        kind = jax.devices()[0].device_kind.lower()
    except Exception:
        pass
    if "v7" in kind:
        return 8 << 20, 48 << 20, True
    if "v6" in kind:
        return 6 << 20, 40 << 20, False
    if "v5" in kind:
        return 3 << 20, 24 << 20, False
    return 4 << 20, 32 << 20, False


def _lane_dense_2d(total: int) -> tuple[int, int]:
    """Factor `total` (a multiple of 128) into (rows, cols) with cols % 128 == 0."""
    cols = _LANE
    c = _LANE
    while c <= min(total, _COL_CAP):
        if total % c == 0:
            cols = c
        c += _LANE
    return total // cols, cols


def _choose_tile_rows(rows: int, cols: int, itemsize: int,
                      target_block_bytes: int, two_tc: bool) -> int:
    """Byte-sized row tiling, aligned to sublane packing."""
    sub = _sublane_multiple(itemsize)
    if rows <= sub:
        return rows                                   # full-extent block (always legal)
    t = target_block_bytes // max(1, cols * itemsize)
    t = max(sub, (t // sub) * sub)
    t = min(t, rows)
    if two_tc and rows >= 2 * sub:
        # Prefer an even number of >= 2 grid steps so both TensorCores stay fed.
        steps = pl.cdiv(rows, t)
        if steps < 2 or steps % 2 != 0:
            steps = max(2, steps + (steps % 2))
            t = pl.cdiv(rows, steps)
            t = max(sub, ((t + sub - 1) // sub) * sub)
            t = min(t, rows)
    if t != rows and t % sub != 0:                    # safety: keep block spec legal
        t = rows
    return t


def activation_quantize(x: jax.Array, a_bit: int, *, donate_input: bool = False) -> jax.Array:
    """Applies ActivationQuantizeFn.forward to x (any shape, float dtype)."""
    assert a_bit <= 16 or a_bit == 32

    if a_bit == 32:
        return x                                      # identity: skip the kernel entirely

    orig_shape = x.shape
    total = x.size
    if total == 0:
        return x

    itemsize = jnp.dtype(x.dtype).itemsize

    # Tiny activations: pallas_call setup + one DMA step costs more than XLA's
    # fused elementwise op.  Keep identical math (f32 compute, cast back).
    if total * itemsize < _MIN_PALLAS_BYTES:
        xc = jnp.clip(x.astype(jnp.float32), 0.0, 1.0)
        if a_bit == 1:
            q = jnp.sign(xc)
        else:
            n = float(2 ** a_bit - 1)
            q = jnp.round(xc * n) * (1.0 / n)
        return q.astype(x.dtype)

    target_block_bytes, vmem_limit_bytes, two_tc = _chip_defaults()
    sub = _sublane_multiple(itemsize)

    # Lane-dense 2-D view: purely elementwise op, so any factoring is valid.
    # When the element count isn't a multiple of 128, zero-pad up to a multiple
    # of (sublane * 128) so stores stay unmasked, then slice the result back.
    x_flat = x.reshape(-1)
    padded = False
    if total % _LANE != 0:
        pad_unit = _LANE * sub
        work_total = ((total + pad_unit - 1) // pad_unit) * pad_unit
        x_flat = jnp.pad(x_flat, (0, work_total - total))
        padded = True
    else:
        work_total = total

    rows, cols = _lane_dense_2d(work_total)
    x2 = x_flat.reshape(rows, cols)

    tile_rows = _choose_tile_rows(rows, cols, itemsize, target_block_bytes, two_tc)
    grid = (pl.cdiv(rows, tile_rows),)

    io_alias = {0: 0} if (donate_input and not padded) else {}

    out2 = pl.pallas_call(
        functools.partial(_act_quant_kernel, a_bit=a_bit),
        out_shape=jax.ShapeDtypeStruct((rows, cols), x2.dtype),
        grid_spec=pltpu.PrefetchScalarGridSpec(
            num_scalar_prefetch=0,
            grid=grid,
            in_specs=[pl.BlockSpec((tile_rows, cols), lambda i: (i, 0))],
            out_specs=pl.BlockSpec((tile_rows, cols), lambda i: (i, 0)),
        ),
        compiler_params=pltpu.CompilerParams(
            dimension_semantics=("parallel",),
            vmem_limit_bytes=vmem_limit_bytes,
        ),
        input_output_aliases=io_alias,
    )(x2)

    out_flat = out2.reshape(-1)
    if padded:
        out_flat = out_flat[:total]
    return out_flat.reshape(orig_shape)


def _torch_reference(x: jnp.ndarray, a_bit: int) -> jnp.ndarray:
    """Pure-JAX reference mirroring the PyTorch module (f32 math)."""
    if a_bit == 32:
        return x
    xc = jnp.clip(x.astype(jnp.float32), 0.0, 1.0)
    if a_bit == 1:
        return jnp.sign(xc).astype(x.dtype)
    n = float(2 ** a_bit - 1)
    return (jnp.round(xc * n) / n).astype(x.dtype)


if __name__ == "__main__":
    key = jax.random.PRNGKey(0)
    k1, k2, k3 = jax.random.split(key, 3)

    # Small NCHW activation (spec shape) -- exercises the pure-JAX fast path.
    x_small = jax.random.normal(k1, (2, 4, 16, 16), dtype=jnp.float32) * 1.5
    # Lane-dense mid-size activation -- exercises the Pallas streaming kernel.
    x_big = jax.random.normal(k2, (8, 32, 32, 32), dtype=jnp.float32) * 1.5
    # Awkward shape (total not a multiple of 128) -- exercises the pad path.
    x_odd = jax.random.normal(k3, (4, 3, 129, 65), dtype=jnp.float32) * 1.5

    ok = True
    for name, x in (("small", x_small), ("big", x_big), ("odd", x_odd)):
        for a_bit in (4, 8, 1, 32):
            out = jax.block_until_ready(activation_quantize(x, a_bit))
            ref = _torch_reference(x, a_bit)
            # atol covers the possible 1-ulp difference of round(x*n)*(1/n) vs /n.
            if out.shape != x.shape or not jnp.allclose(out, ref, atol=1e-6, rtol=1e-6):
                ok = False
                print(f"MISMATCH for {name} a_bit={a_bit}")

    if ok:
        print("KERNEL_OK")
</pallas_src>

<mosaic_0001>
module attributes {stable_mosaic.version = 11 : i64} {
  func.func @_act_quant_kernel(%arg0: i32, %arg1: memref<16x16384xf32, #tpu.memory_space<vmem>>, %arg2: memref<16x16384xf32, #tpu.memory_space<vmem>>) attributes {dimension_semantics = [#tpu.dimension_semantics<parallel>], iteration_bounds = array<i64: 1>, scalar_prefetch = 0 : i64, scratch_operands = 0 : i64, tpu.core_type = #tpu.core_type<tc>, window_params = [{transform_indices = @transform_0, window_bounds = array<i64: 16, 16384>}, {transform_indices = @transform_1, window_bounds = array<i64: 16, 16384>}]} {
    %c0 = arith.constant 0 : index
    %c0_0 = arith.constant 0 : index
    %0 = vector.load %arg1[%c0, %c0_0] : memref<16x16384xf32, #tpu.memory_space<vmem>>, vector<16x16384xf32>
    %cst = arith.constant 0.000000e+00 : f32
    %cst_1 = arith.constant 1.000000e+00 : f32
    %1 = vector.broadcast %cst : f32 to vector<16x16384xf32>
    %2 = arith.maximumf %1, %0 : vector<16x16384xf32>
    %3 = vector.broadcast %cst_1 : f32 to vector<16x16384xf32>
    %4 = arith.minimumf %3, %2 : vector<16x16384xf32>
    %cst_2 = arith.constant 1.500000e+01 : f32
    %5 = vector.broadcast %cst_2 : f32 to vector<16x16384xf32>
    %6 = arith.mulf %4, %5 : vector<16x16384xf32>
    %7 = math.roundeven %6 : vector<16x16384xf32>
    %cst_3 = arith.constant 0.0666666701 : f32
    %8 = vector.broadcast %cst_3 : f32 to vector<16x16384xf32>
    %9 = arith.mulf %7, %8 : vector<16x16384xf32>
    %c0_4 = arith.constant 0 : index
    %c0_5 = arith.constant 0 : index
    %10 = vector.load %arg2[%c0_4, %c0_5] : memref<16x16384xf32, #tpu.memory_space<vmem>>, vector<16x16384xf32>
    tpu.vector_store %arg2[%c0_4, %c0_5], %9 {strides = array<i32>} : memref<16x16384xf32, #tpu.memory_space<vmem>>, vector<16x16384xf32>,
    return
  }
  func.func @transform_0(%arg0: i32) -> (i32, i32) {
    %c0_i32 = arith.constant 0 : i32
    %c0_i32_0 = arith.constant 0 : i32
    return %arg0, %c0_i32 : i32, i32
  }
  func.func @transform_1(%arg0: i32) -> (i32, i32) {
    %c0_i32 = arith.constant 0 : i32
    %c0_i32_0 = arith.constant 0 : i32
    return %arg0, %c0_i32 : i32, i32
  }
}

</mosaic_0001>

<bundles_post_ra>
// kernel: tpu_custom_call.1
= control target key start
LH: loop header
LB: loop body
LE: loop exit
PB: predicated region body
PF: predicated region fallthrough
CT: control target
= control target key end

     0   :  { %6 = vsyncpa [#allocation3], 0  ;;  %s5484_s0 = inlined_call_operand.hbm [shape: f32[16,16384], index: 0, kind: input, shape index: {}]   ;;  %s5485_s1 = inlined_call_operand.hbm [shape: f32[16,16384], index: 1, kind: output, shape index: {}]  }
   0x1   :  { %7 = vsyncpa [#allocation4], 0  ;;  %s3928_s6 = smov [#allocation2]  }
   0x2   :  { %s13_s7 = sshll.u32 %s3928_s6, 4  ;;  %s14_s7 = int_to_ptr.vmem [resolvable:$true] %s13_s7 }
   0x3   :  { %s3892_s8 = scalar_lea.vmem %s14_s7, 32768  ;;  %p3897_p1 = scmp.lt.s32.totalorder %s14_s7, %s14_s7 }
   0x4   :  { %p3893_p0 = scmp.ne.s32.totalorder %s14_s7, %s3892_s8  ;;  %p3898_p2 = scmp.lt.s32.totalorder %s3892_s8, %s3892_s8 }
   0x6   :  { %p3899_p3 = por %p3898_p2, %p3897_p1 }
   0x8   :  { %p3900_p4 = pnand %p3899_p3, %p3893_p0 }
   0xa   :  { %3903 = shalt.err (!%p3900_p4)
}
   0xb   :  { %s3929_s9 = smov 16384   ;;  %s3930_s10 = smov 1024  }
   0xc   :  { %19 = dma.hbm_to_vmem [thread:$0]  %s5484_s0, 32768, %s14_s7, [#allocation3], %s3929_s9, %s3929_s9, %s3930_s10  }
   0xd   :  { %3924 = dma.done.wait [#allocation3], 32768  }
   0xe   :  { %3925 = vsyncadd [#allocation3], 4294934528  ;;  %v23_v0 = vld [vmem:[#allocation2] sm:$0xff]  ;;  %v24_v1 = vld [vmem:[#allocation2 + $0x8] sm:$0xff]  ;;  %s3931_s0 = smov [#allocation5]  }
   0xf   :  { %v25_v2 = vld [vmem:[#allocation2 + $0x10] sm:$0xff]  ;;  %v279_v3 = vmax.f32 %v23_v0, 0.0  ;;  %v280_v4 = vmax.f32 %v24_v1, 0.0  ;;  %v26_v6 = vld [vmem:[#allocation2 + $0x18] sm:$0xff]  ;;  %v27_v7 = vld [vmem:[#allocation2 + $0x20] sm:$0xff]  ;;  %s1820_s13 = sshll.u32 %s3931_s0, 4  ;;  %s1821_s13 = int_to_ptr.vmem [resolvable:$true] %s1820_s13 }
  0x10   :  { %v281_v5 = vmax.f32 %v25_v2, 0.0  ;;  %v28_v8 = vld [vmem:[#allocation2 + $0x28] sm:$0xff]  ;;  %v282_v9 = vmax.f32 %v26_v6, 0.0  ;;  %v283_v10 = vmax.f32 %v27_v7, 0.0  ;;  %v29_v12 = vld [vmem:[#allocation2 + $0x30] sm:$0xff]  ;;  %v30_v13 = vld [vmem:[#allocation2 + $0x38] sm:$0xff]  ;;  %p3909_p6 = scmp.lt.s32.totalorder %s1821_s13, %s1821_s13 }
  0x11   :  { %v284_v11 = vmax.f32 %v28_v8, 0.0  ;;  %v535_v14 = vmin.f32 %v279_v3, 1.0  ;;  %v536_v15 = vmin.f32 %v280_v4, 1.0  ;;  %v285_v17 = vmax.f32 %v29_v12, 0.0  ;;  %v31_v1 = vld [vmem:[#allocation2 + $0x40] sm:$0xff]  ;;  %v32_v6 = vld [vmem:[#allocation2 + $0x48] sm:$0xff] }
  0x12   :  { %v537_v16 = vmin.f32 %v281_v5, 1.0  ;;  %v538_v18 = vmin.f32 %v282_v9, 1.0  ;;  %v539_v19 = vmin.f32 %v283_v10, 1.0  ;;  %v286_v21 = vmax.f32 %v30_v13, 0.0  ;;  %v33_v7 = vld [vmem:[#allocation2 + $0x50] sm:$0xff]  ;;  %s3904_s14 = scalar_lea.vmem %s1821_s13, 32768 }
  0x13   :  { %v540_v20 = vmin.f32 %v284_v11, 1.0  ;;  %v791_v22 = vmul.f32 15.0, %v535_v14  ;;  %v792_v23 = vmul.f32 15.0, %v536_v15  ;;  %v541_v28 = vmin.f32 %v285_v17, 1.0  ;;  %p3905_p5 = scmp.ne.s32.totalorder %s1821_s13, %s3904_s14  ;;  %p3910_p7 = scmp.lt.s32.totalorder %s3904_s14, %s3904_s14 }
  0x14   :  { %v793_v24 = vmul.f32 15.0, %v537_v16  ;;  %v794_v25 = vmul.f32 15.0, %v538_v18  ;;  %v3948_v26 = vmul.f32 15.0, %v539_v19  ;;  %v542_v32 = vmin.f32 %v286_v21, 1.0 }
  0x15   :  { %v3950_v27 = vmul.f32 15.0, %v540_v20  ;;  %v1832_v29 = vand.u32 2147483647, %v791_v22  ;;  %v1834_v30 = vcvt.f32.s32 %v791_v22  ;;  %v1840_v31 = vand.u32 2147483647, %v792_v23  ;;  %p3911_p8 = por %p3910_p7, %p3909_p6 }
  0x16   :  { %v1837_v33 = vand.u32 2147483648, %v791_v22  ;;  %v1842_v34 = vcvt.f32.s32 %v792_v23  ;;  %v1848_v35 = vand.u32 2147483647, %v793_v24  ;;  %v1850_v36 = vcvt.f32.s32 %v793_v24 }
  0x17   :  { %vm3952_vm0 = vcmp.lt.f32.partialorder %v1832_v29, 8388608.0  ;;  %v1835_v38 = vcvt.s32.f32 %v1834_v30  ;;  %vm3956_vm1 = vcmp.lt.f32.partialorder %v1840_v31, 8388608.0  ;;  %v1845_v40 = vand.u32 2147483648, %v792_v23  ;;  %v34_v31 = vld [vmem:[#allocation2 + $0x58] sm:$0xff]  ;;  %p3912_p9 = pnand %p3911_p8, %p3905_p5 }
  0x18   :  { %v1843_v41 = vcvt.s32.f32 %v1842_v34  ;;  %v1851_v42 = vcvt.s32.f32 %v1850_v36  ;;  %v1853_v43 = vand.u32 2147483648, %v793_v24  ;;  %v1856_v44 = vand.u32 2147483647, %v794_v25 }
  0x19   :  { %v1836_v45 = vand.u32 2147483647, %v1835_v38  ;;  %vm3960_vm2 = vcmp.lt.f32.partialorder %v1848_v35, 8388608.0  ;;  %v1858_v47 = vcvt.f32.s32 %v794_v25  ;;  %v1864_v48 = vand.u32 2147483647, %v3948_v26 }
  0x1a   :  { %v1844_v49 = vand.u32 2147483647, %v1843_v41  ;;  %v1852_v50 = vand.u32 2147483647, %v1851_v42  ;;  %v1861_v51 = vand.u32 2147483648, %v794_v25  ;;  %v1866_v52 = vcvt.f32.s32 %v3948_v26  ;;  %v35_v42 = vld [vmem:[#allocation2 + $0x60] sm:$0xff] }
  0x1b   :  { %v1838_v53 = vor.u32 %v1837_v33, %v1836_v45  ;;  %vm3966_vm3 = vcmp.lt.f32.partialorder %v1856_v44, 8388608.0  ;;  %v1859_v55 = vcvt.s32.f32 %v1858_v47  ;;  %vm3970_vm4 = vcmp.lt.f32.partialorder %v1864_v48, 8388608.0 }
  0x1c   :  { %v1846_v57 = vor.u32 %v1845_v40, %v1844_v49  ;;  %v1854_v58 = vor.u32 %v1853_v43, %v1852_v50  ;;  %v1867_v59 = vcvt.s32.f32 %v1866_v52  ;;  %v1869_v60 = vand.u32 2147483648, %v3948_v26 }
  0x1d   :  { %v1839_v61 = vsel %vm3952_vm0, %v1838_v53, %v791_v22  ;;  %v1860_v62 = vand.u32 2147483647, %v1859_v55  ;;  %v1872_v63 = vand.u32 2147483647, %v3950_v27  ;;  %v1874_v0 = vcvt.f32.s32 %v3950_v27 }
  0x1e   :  { %v1303_v2 = vmul.f32 0.06666667, %v1839_v61  ;;  %v1847_v3 = vsel %vm3956_vm1, %v1846_v57, %v792_v23  ;;  %v1855_v4 = vsel %vm3960_vm2, %v1854_v58, %v793_v24  ;;  %v1868_v5 = vand.u32 2147483647, %v1867_v59 }
  0x1f   :  { %v1304_v8 = vmul.f32 0.06666667, %v1847_v3  ;;  %v1305_v9 = vmul.f32 0.06666667, %v1855_v4  ;;  %v1862_v10 = vor.u32 %v1861_v51, %v1860_v62  ;;  %v1877_v11 = vand.u32 2147483648, %v3950_v27 }
  0x20   :  { %1559 = vst [vmem:[#allocation5] sm:$0xff] %v1303_v2  ;;  %v1870_v12 = vor.u32 %v1869_v60, %v1868_v5  ;;  %v1875_v13 = vcvt.s32.f32 %v1874_v0  ;;  %v797_v14 = vmul.f32 15.0, %v541_v28  ;;  %v798_v15 = vmul.f32 15.0, %v542_v32  ;;  %v36_v2 = vld [vmem:[#allocation2 + $0x68] sm:$0xff] }
  0x21   :  { %1560 = vst [vmem:[#allocation5 + $0x8] sm:$0xff] %v1304_v8  ;;  %1561 = vst [vmem:[#allocation5 + $0x10] sm:$0xff] %v1305_v9  ;;  %v1863_v16 = vsel %vm3966_vm3, %v1862_v10, %v794_v25  ;;  %v287_v17 = vmax.f32 %v31_v1, 0.0  ;;  %v288_v18 = vmax.f32 %v32_v6, 0.0  ;;  %v289_v19 = vmax.f32 %v33_v7, 0.0  ;;  %v37_v7 = vld [vmem:[#allocation2 + $0x70] sm:$0xff] }
  0x22   :  { %v1306_v20 = vmul.f32 0.06666667, %v1863_v16  ;;  %v1871_v21 = vsel %vm3970_vm4, %v1870_v12, %v3948_v26  ;;  %v1876_v22 = vand.u32 2147483647, %v1875_v13  ;;  %v1880_v23 = vand.u32 2147483647, %v797_v14 }
  0x23   :  { %v1307_v24 = vmul.f32 0.06666667, %v1871_v21  ;;  %vm3989_vm5 = vcmp.lt.f32.partialorder %v1872_v63, 8388608.0  ;;  %v1882_v28 = vcvt.f32.s32 %v797_v14  ;;  %v1885_v30 = vand.u32 2147483648, %v797_v14 }
  0x24   :  { %1562 = vst [vmem:[#allocation5 + $0x18] sm:$0xff] %v1306_v20  ;;  %v1878_v25 = vor.u32 %v1877_v11, %v1876_v22  ;;  %vm3993_vm6 = vcmp.lt.f32.partialorder %v1880_v23, 8388608.0  ;;  %v1888_v33 = vand.u32 2147483647, %v798_v15  ;;  %v1890_v34 = vcvt.f32.s32 %v798_v15 }
  0x25   :  { %1563 = vst [vmem:[#allocation5 + $0x20] sm:$0xff] %v1307_v24  ;;  %v1883_v26 = vcvt.s32.f32 %v1882_v28  ;;  %v1893_v35 = vand.u32 2147483648, %v798_v15  ;;  %v543_v36 = vmin.f32 %v287_v17, 1.0  ;;  %v544_v37 = vmin.f32 %v288_v18, 1.0 }
  0x26   :  { %v1879_v38 = vsel %vm3989_vm5, %v1878_v25, %v3950_v27  ;;  %v1891_v39 = vcvt.s32.f32 %v1890_v34  ;;  %v545_v40 = vmin.f32 %v289_v19, 1.0  ;;  %v290_v41 = vmax.f32 %v34_v31, 0.0  ;;  %v38_v31 = vld [vmem:[#allocation2 + $0x78] sm:$0xff] }
  0x27   :  { %v1308_v43 = vmul.f32 0.06666667, %v1879_v38  ;;  %v1884_v44 = vand.u32 2147483647, %v1883_v26  ;;  %v799_v45 = vmul.f32 15.0, %v543_v36  ;;  %v800_v46 = vmul.f32 15.0, %v544_v37 }
  0x28   :  { %vm4000_vm7 = vcmp.lt.f32.partialorder %v1888_v33, 8388608.0  ;;  %v1892_v48 = vand.u32 2147483647, %v1891_v39  ;;  %v4004_v49 = vmul.f32 15.0, %v545_v40  ;;  %v546_v50 = vmin.f32 %v290_v41, 1.0 }
  0x29   :  { %1564 = vst [vmem:[#allocation5 + $0x28] sm:$0xff] %v1308_v43  ;;  %v1886_v51 = vor.u32 %v1885_v30, %v1884_v44  ;;  %v1896_v52 = vand.u32 2147483647, %v799_v45  ;;  %v1898_v27 = vcvt.f32.s32 %v799_v45  ;;  %v291_v53 = vmax.f32 %v35_v42, 0.0  ;;  %v39_v42 = vld [vmem:[#allocation2 + $0x80] sm:$0xff] }
  0x2a   :  { %v1894_v54 = vor.u32 %v1893_v35, %v1892_v48  ;;  %v1901_v55 = vand.u32 2147483648, %v799_v45  ;;  %v1904_v56 = vand.u32 2147483647, %v800_v46  ;;  %v1906_v57 = vcvt.f32.s32 %v800_v46 }
  0x2b   :  { %v1887_v58 = vsel %vm3993_vm6, %v1886_v51, %v797_v14  ;;  %v1899_v59 = vcvt.s32.f32 %v1898_v27  ;;  %v1909_v60 = vand.u32 2147483648, %v800_v46  ;;  %v1912_v61 = vand.u32 2147483647, %v4004_v49 }
  0x2c   :  { %v1309_v62 = vmul.f32 0.06666667, %v1887_v58  ;;  %v1895_v63 = vsel %vm4000_vm7, %v1894_v54, %v798_v15  ;;  %vm4011_vm8 = vcmp.lt.f32.partialorder %v1896_v52, 8388608.0  ;;  %v1907_v1 = vcvt.s32.f32 %v1906_v57  ;;  %v40_v54 = vld [vmem:[#allocation2 + $0x88] sm:$0xff] }
  0x2d   :  { %v1310_v3 = vmul.f32 0.06666667, %v1895_v63  ;;  %v1900_v4 = vand.u32 2147483647, %v1899_v59  ;;  %vm4015_vm9 = vcmp.lt.f32.partialorder %v1904_v56, 8388608.0  ;;  %v1914_v6 = vcvt.f32.s32 %v4004_v49 }
  0x2e   :  { %1565 = vst [vmem:[#allocation5 + $0x30] sm:$0xff] %v1309_v62  ;;  %v1908_v8 = vand.u32 2147483647, %v1907_v1  ;;  %vm4020_vm10 = vcmp.lt.f32.partialorder %v1912_v61, 8388608.0  ;;  %v802_v10 = vmul.f32 15.0, %v546_v50  ;;  %v547_v11 = vmin.f32 %v291_v53, 1.0 }
  0x2f   :  { %1566 = vst [vmem:[#allocation5 + $0x38] sm:$0xff] %v1310_v3  ;;  %v1902_v12 = vor.u32 %v1901_v55, %v1900_v4  ;;  %v1915_v13 = vcvt.s32.f32 %v1914_v6  ;;  %v1917_v14 = vand.u32 2147483648, %v4004_v49  ;;  %v292_v15 = vmax.f32 %v36_v2, 0.0  ;;  %v41_v3 = vld [vmem:[#allocation2 + $0x90] sm:$0xff] }
  0x30   :  { %v1910_v16 = vor.u32 %v1909_v60, %v1908_v8  ;;  %v1920_v17 = vand.u32 2147483647, %v802_v10  ;;  %v1922_v18 = vcvt.f32.s32 %v802_v10  ;;  %v293_v19 = vmax.f32 %v37_v7, 0.0 }
  0x31   :  { %v1903_v20 = vsel %vm4011_vm8, %v1902_v12, %v799_v45  ;;  %v1916_v21 = vand.u32 2147483647, %v1915_v13  ;;  %v803_v22 = vmul.f32 15.0, %v547_v11  ;;  %v548_v23 = vmin.f32 %v292_v15, 1.0 }
  0x32   :  { %v1311_v24 = vmul.f32 0.06666667, %v1903_v20  ;;  %v1911_v29 = vsel %vm4015_vm9, %v1910_v16, %v800_v46  ;;  %v1923_v28 = vcvt.s32.f32 %v1922_v18  ;;  %v1925_v30 = vand.u32 2147483648, %v802_v10  ;;  %v42_v16 = vld [vmem:[#allocation2 + $0x98] sm:$0xff] }
  0x33   :  { %v1312_v25 = vmul.f32 0.06666667, %v1911_v29  ;;  %v1918_v32 = vor.u32 %v1917_v14, %v1916_v21  ;;  %v1928_v33 = vand.u32 2147483647, %v803_v22  ;;  %v1930_v34 = vcvt.f32.s32 %v803_v22 }
  0x34   :  { %1567 = vst [vmem:[#allocation5 + $0x40] sm:$0xff] %v1311_v24  ;;  %vm4029_vm11 = vcmp.lt.f32.partialorder %v1920_v17, 8388608.0  ;;  %v1924_v35 = vand.u32 2147483647, %v1923_v28  ;;  %v804_v36 = vmul.f32 15.0, %v548_v23  ;;  %v549_v37 = vmin.f32 %v293_v19, 1.0 }
  0x35   :  { %1568 = vst [vmem:[#allocation5 + $0x48] sm:$0xff] %v1312_v25  ;;  %v1919_v38 = vsel %vm4020_vm10, %v1918_v32, %v4004_v49  ;;  %v1931_v39 = vcvt.s32.f32 %v1930_v34  ;;  %v1933_v40 = vand.u32 2147483648, %v803_v22  ;;  %v294_v41 = vmax.f32 %v38_v31, 0.0  ;;  %v43_v25 = vld [vmem:[#allocation2 + $0xa0] sm:$0xff] }
  0x36   :  { %v1313_v43 = vmul.f32 0.06666667, %v1919_v38  ;;  %v1926_v44 = vor.u32 %v1925_v30, %v1924_v35  ;;  %v1936_v45 = vand.u32 2147483647, %v804_v36  ;;  %v1938_v46 = vcvt.f32.s32 %v804_v36 }
  0x37   :  { %vm4036_vm12 = vcmp.lt.f32.partialorder %v1928_v33, 8388608.0  ;;  %v1932_v48 = vand.u32 2147483647, %v1931_v39  ;;  %v805_v50 = vmul.f32 15.0, %v549_v37  ;;  %v550_v51 = vmin.f32 %v294_v41, 1.0 }
  0x38   :  { %1569 = vst [vmem:[#allocation5 + $0x50] sm:$0xff] %v1313_v43  ;;  %v1927_v52 = vsel %vm4029_vm11, %v1926_v44, %v802_v10  ;;  %v1939_v49 = vcvt.s32.f32 %v1938_v46  ;;  %v1941_v27 = vand.u32 2147483648, %v804_v36  ;;  %v295_v53 = vmax.f32 %v39_v42, 0.0  ;;  %v44_v43 = vld [vmem:[#allocation2 + $0xa8] sm:$0xff] }
  0x39   :  { %v1314_v55 = vmul.f32 0.06666667, %v1927_v52  ;;  %v1934_v56 = vor.u32 %v1933_v40, %v1932_v48  ;;  %v1944_v57 = vand.u32 2147483647, %v805_v50  ;;  %v1946_v58 = vcvt.f32.s32 %v805_v50 }
  0x3a   :  { %vm4042_vm13 = vcmp.lt.f32.partialorder %v1936_v45, 8388608.0  ;;  %v1940_v60 = vand.u32 2147483647, %v1939_v49  ;;  %v806_v61 = vmul.f32 15.0, %v550_v51  ;;  %v551_v62 = vmin.f32 %v295_v53, 1.0 }
  0x3b   :  { %1570 = vst [vmem:[#allocation5 + $0x58] sm:$0xff] %v1314_v55  ;;  %v1935_v63 = vsel %vm4036_vm12, %v1934_v56, %v803_v22  ;;  %v1947_v0 = vcvt.s32.f32 %v1946_v58  ;;  %v1949_v1 = vand.u32 2147483648, %v805_v50  ;;  %v296_v2 = vmax.f32 %v40_v54, 0.0  ;;  %v45_v55 = vld [vmem:[#allocation2 + $0xb0] sm:$0xff] }
  0x3c   :  { %v1315_v4 = vmul.f32 0.06666667, %v1935_v63  ;;  %v1942_v5 = vor.u32 %v1941_v27, %v1940_v60  ;;  %v1952_v6 = vand.u32 2147483647, %v806_v61  ;;  %v1954_v7 = vcvt.f32.s32 %v806_v61 }
  0x3d   :  { %vm4048_vm14 = vcmp.lt.f32.partialorder %v1944_v57, 8388608.0  ;;  %v1948_v9 = vand.u32 2147483647, %v1947_v0  ;;  %v807_v10 = vmul.f32 15.0, %v551_v62  ;;  %v552_v11 = vmin.f32 %v296_v2, 1.0 }
  0x3e   :  { %1571 = vst [vmem:[#allocation5 + $0x60] sm:$0xff] %v1315_v4  ;;  %v1943_v12 = vsel %vm4042_vm13, %v1942_v5, %v804_v36  ;;  %v1955_v13 = vcvt.s32.f32 %v1954_v7  ;;  %v1957_v14 = vand.u32 2147483648, %v806_v61  ;;  %v297_v15 = vmax.f32 %v41_v3, 0.0  ;;  %v46_v4 = vld [vmem:[#allocation2 + $0xb8] sm:$0xff] }
  0x3f   :  { %v1316_v17 = vmul.f32 0.06666667, %v1943_v12  ;;  %v1950_v18 = vor.u32 %v1949_v1, %v1948_v9  ;;  %v1960_v19 = vand.u32 2147483647, %v807_v10  ;;  %v1962_v20 = vcvt.f32.s32 %v807_v10 }
  0x40   :  { %vm4054_vm15 = vcmp.lt.f32.partialorder %v1952_v6, 8388608.0  ;;  %v1956_v22 = vand.u32 2147483647, %v1955_v13  ;;  %v808_v23 = vmul.f32 15.0, %v552_v11  ;;  %v553_v24 = vmin.f32 %v297_v15, 1.0 }
  0x41   :  { %1572 = vst [vmem:[#allocation5 + $0x68] sm:$0xff] %v1316_v17  ;;  %v1951_v29 = vsel %vm4048_vm14, %v1950_v18, %v805_v50  ;;  %v1963_v28 = vcvt.s32.f32 %v1962_v20  ;;  %v1965_v30 = vand.u32 2147483648, %v807_v10  ;;  %v298_v31 = vmax.f32 %v42_v16, 0.0  ;;  %v47_v17 = vld [vmem:[#allocation2 + $0xc0] sm:$0xff] }
  0x42   :  { %v1317_v32 = vmul.f32 0.06666667, %v1951_v29  ;;  %v1958_v33 = vor.u32 %v1957_v14, %v1956_v22  ;;  %v1968_v34 = vand.u32 2147483647, %v808_v23  ;;  %v1970_v26 = vcvt.f32.s32 %v808_v23 }
  0x43   :  { %vm4060_vm0 = vcmp.lt.f32.partialorder %v1960_v19, 8388608.0  ;;  %v1964_v36 = vand.u32 2147483647, %v1963_v28  ;;  %v809_v37 = vmul.f32 15.0, %v553_v24  ;;  %v554_v38 = vmin.f32 %v298_v31, 1.0 }
  0x44   :  { %1573 = vst [vmem:[#allocation5 + $0x70] sm:$0xff] %v1317_v32  ;;  %v1959_v39 = vsel %vm4054_vm15, %v1958_v33, %v806_v61  ;;  %v1971_v40 = vcvt.s32.f32 %v1970_v26  ;;  %v1973_v41 = vand.u32 2147483648, %v808_v23  ;;  %v299_v42 = vmax.f32 %v43_v25, 0.0  ;;  %v48_v32 = vld [vmem:[#allocation2 + $0xc8] sm:$0xff] }
  0x45   :  { %v1318_v44 = vmul.f32 0.06666667, %v1959_v39  ;;  %v1966_v45 = vor.u32 %v1965_v30, %v1964_v36  ;;  %v1976_v46 = vand.u32 2147483647, %v809_v37  ;;  %v1978_v47 = vcvt.f32.s32 %v809_v37 }
  0x46   :  { %vm4066_vm1 = vcmp.lt.f32.partialorder %v1968_v34, 8388608.0  ;;  %v1972_v50 = vand.u32 2147483647, %v1971_v40  ;;  %v810_v51 = vmul.f32 15.0, %v554_v38  ;;  %v555_v52 = vmin.f32 %v299_v42, 1.0 }
  0x47   :  { %1574 = vst [vmem:[#allocation5 + $0x78] sm:$0xff] %v1318_v44  ;;  %v1967_v49 = vsel %vm4060_vm0, %v1966_v45, %v807_v10  ;;  %v1979_v27 = vcvt.s32.f32 %v1978_v47  ;;  %v1981_v53 = vand.u32 2147483648, %v809_v37  ;;  %v300_v54 = vmax.f32 %v44_v43, 0.0  ;;  %v49_v44 = vld [vmem:[#allocation2 + $0xd0] sm:$0xff] }
  0x48   :  { %v1319_v56 = vmul.f32 0.06666667, %v1967_v49  ;;  %v1974_v57 = vor.u32 %v1973_v41, %v1972_v50  ;;  %v1984_v58 = vand.u32 2147483647, %v810_v51  ;;  %v1986_v59 = vcvt.f32.s32 %v810_v51 }
  0x49   :  { %vm4072_vm2 = vcmp.lt.f32.partialorder %v1976_v46, 8388608.0  ;;  %v1980_v61 = vand.u32 2147483647, %v1979_v27  ;;  %v811_v62 = vmul.f32 15.0, %v555_v52  ;;  %v556_v63 = vmin.f32 %v300_v54, 1.0 }
  0x4a   :  { %1575 = vst [vmem:[#allocation5 + $0x80] sm:$0xff] %v1319_v56  ;;  %v1975_v0 = vsel %vm4066_vm1, %v1974_v57, %v808_v23  ;;  %v1987_v1 = vcvt.s32.f32 %v1986_v59  ;;  %v1989_v2 = vand.u32 2147483648, %v810_v51  ;;  %v301_v3 = vmax.f32 %v45_v55, 0.0  ;;  %v50_v56 = vld [vmem:[#allocation2 + $0xd8] sm:$0xff] }
  0x4b   :  { %v1320_v5 = vmul.f32 0.06666667, %v1975_v0  ;;  %v1982_v6 = vor.u32 %v1981_v53, %v1980_v61  ;;  %v1992_v7 = vand.u32 2147483647, %v811_v62  ;;  %v1994_v8 = vcvt.f32.s32 %v811_v62 }
  0x4c   :  { %vm4078_vm3 = vcmp.lt.f32.partialorder %v1984_v58, 8388608.0  ;;  %v1988_v10 = vand.u32 2147483647, %v1987_v1  ;;  %v812_v11 = vmul.f32 15.0, %v556_v63  ;;  %v557_v12 = vmin.f32 %v301_v3, 1.0 }
  0x4d   :  { %1576 = vst [vmem:[#allocation5 + $0x88] sm:$0xff] %v1320_v5  ;;  %v1983_v13 = vsel %vm4072_vm2, %v1982_v6, %v809_v37  ;;  %v1995_v14 = vcvt.s32.f32 %v1994_v8  ;;  %v1997_v15 = vand.u32 2147483648, %v811_v62  ;;  %v302_v16 = vmax.f32 %v46_v4, 0.0  ;;  %v51_v5 = vld [vmem:[#allocation2 + $0xe0] sm:$0xff] }
  0x4e   :  { %v1321_v18 = vmul.f32 0.06666667, %v1983_v13  ;;  %v1990_v19 = vor.u32 %v1989_v2, %v1988_v10  ;;  %v2000_v20 = vand.u32 2147483647, %v812_v11  ;;  %v2002_v21 = vcvt.f32.s32 %v812_v11 }
  0x4f   :  { %vm4084_vm4 = vcmp.lt.f32.partialorder %v1992_v7, 8388608.0  ;;  %v1996_v23 = vand.u32 2147483647, %v1995_v14  ;;  %v813_v24 = vmul.f32 15.0, %v557_v12  ;;  %v558_v29 = vmin.f32 %v302_v16, 1.0 }
  0x50   :  { %1577 = vst [vmem:[#allocation5 + $0x90] sm:$0xff] %v1321_v18  ;;  %v1991_v28 = vsel %vm4078_vm3, %v1990_v19, %v810_v51  ;;  %v2003_v30 = vcvt.s32.f32 %v2002_v21  ;;  %v2005_v31 = vand.u32 2147483648, %v812_v11  ;;  %v303_v25 = vmax.f32 %v47_v17, 0.0  ;;  %v52_v18 = vld [vmem:[#allocation2 + $0xe8] sm:$0xff] }
  0x51   :  { %v1322_v33 = vmul.f32 0.06666667, %v1991_v28  ;;  %v1998_v34 = vor.u32 %v1997_v15, %v1996_v23  ;;  %v2008_v26 = vand.u32 2147483647, %v813_v24  ;;  %v2010_v35 = vcvt.f32.s32 %v813_v24 }
  0x52   :  { %vm4090_vm5 = vcmp.lt.f32.partialorder %v2000_v20, 8388608.0  ;;  %v2004_v37 = vand.u32 2147483647, %v2003_v30  ;;  %v814_v38 = vmul.f32 15.0, %v558_v29  ;;  %v559_v39 = vmin.f32 %v303_v25, 1.0 }
  0x53   :  { %1578 = vst [vmem:[#allocation5 + $0x98] sm:$0xff] %v1322_v33  ;;  %v1999_v40 = vsel %vm4084_vm4, %v1998_v34, %v811_v62  ;;  %v2011_v41 = vcvt.s32.f32 %v2010_v35  ;;  %v2013_v42 = vand.u32 2147483648, %v813_v24  ;;  %v304_v43 = vmax.f32 %v48_v32, 0.0  ;;  %v53_v33 = vld [vmem:[#allocation2 + $0xf0] sm:$0xff] }
  0x54   :  { %v1323_v45 = vmul.f32 0.06666667, %v1999_v40  ;;  %v2006_v46 = vor.u32 %v2005_v31, %v2004_v37  ;;  %v2016_v47 = vand.u32 2147483647, %v814_v38  ;;  %v2018_v48 = vcvt.f32.s32 %v814_v38 }
  0x55   :  { %vm4096_vm6 = vcmp.lt.f32.partialorder %v2008_v26, 8388608.0  ;;  %v2012_v51 = vand.u32 2147483647, %v2011_v41  ;;  %v815_v52 = vmul.f32 15.0, %v559_v39  ;;  %v560_v49 = vmin.f32 %v304_v43, 1.0 }
  0x56   :  { %1579 = vst [vmem:[#allocation5 + $0xa0] sm:$0xff] %v1323_v45  ;;  %v2007_v27 = vsel %vm4090_vm5, %v2006_v46, %v812_v11  ;;  %v2019_v53 = vcvt.s32.f32 %v2018_v48  ;;  %v2021_v54 = vand.u32 2147483648, %v814_v38  ;;  %v305_v55 = vmax.f32 %v49_v44, 0.0  ;;  %v54_v45 = vld [vmem:[#allocation2 + $0xf8] sm:$0xff] }
  0x57   :  { %v1324_v57 = vmul.f32 0.06666667, %v2007_v27  ;;  %v2014_v58 = vor.u32 %v2013_v42, %v2012_v51  ;;  %v2024_v59 = vand.u32 2147483647, %v815_v52  ;;  %v2026_v60 = vcvt.f32.s32 %v815_v52 }
  0x58   :  { %vm4102_vm7 = vcmp.lt.f32.partialorder %v2016_v47, 8388608.0  ;;  %v2020_v62 = vand.u32 2147483647, %v2019_v53  ;;  %v816_v63 = vmul.f32 15.0, %v560_v49  ;;  %v561_v0 = vmin.f32 %v305_v55, 1.0 }
  0x59   :  { %1580 = vst [vmem:[#allocation5 + $0xa8] sm:$0xff] %v1324_v57  ;;  %v2015_v1 = vsel %vm4096_vm6, %v2014_v58, %v813_v24  ;;  %v2027_v2 = vcvt.s32.f32 %v2026_v60  ;;  %v2029_v3 = vand.u32 2147483648, %v815_v52  ;;  %v306_v4 = vmax.f32 %v50_v56, 0.0  ;;  %v55_v57 = vld [vmem:[#allocation2 + $0x100] sm:$0xff] }
  0x5a   :  { %v1325_v6 = vmul.f32 0.06666667, %v2015_v1  ;;  %v2022_v7 = vor.u32 %v2021_v54, %v2020_v62  ;;  %v2032_v8 = vand.u32 2147483647, %v816_v63  ;;  %v2034_v9 = vcvt.f32.s32 %v816_v63 }
  0x5b   :  { %vm4108_vm8 = vcmp.lt.f32.partialorder %v2024_v59, 8388608.0  ;;  %v2028_v11 = vand.u32 2147483647, %v2027_v2  ;;  %v817_v12 = vmul.f32 15.0, %v561_v0  ;;  %v562_v13 = vmin.f32 %v306_v4, 1.0 }
  0x5c   :  { %1581 = vst [vmem:[#allocation5 + $0xb0] sm:$0xff] %v1325_v6  ;;  %v2023_v14 = vsel %vm4102_vm7, %v2022_v7, %v814_v38  ;;  %v2035_v15 = vcvt.s32.f32 %v2034_v9  ;;  %v2037_v16 = vand.u32 2147483648, %v816_v63  ;;  %v307_v17 = vmax.f32 %v51_v5, 0.0  ;;  %v56_v6 = vld [vmem:[#allocation2 + $0x108] sm:$0xff] }
  0x5d   :  { %v1326_v19 = vmul.f32 0.06666667, %v2023_v14  ;;  %v2030_v20 = vor.u32 %v2029_v3, %v2028_v11  ;;  %v2040_v21 = vand.u32 2147483647, %v817_v12  ;;  %v2042_v22 = vcvt.f32.s32 %v817_v12 }
  0x5e   :  { %vm4114_vm9 = vcmp.lt.f32.partialorder %v2032_v8, 8388608.0  ;;  %v2036_v24 = vand.u32 2147483647, %v2035_v15  ;;  %v818_v29 = vmul.f32 15.0, %v562_v13  ;;  %v563_v28 = vmin.f32 %v307_v17, 1.0 }
  0x5f   :  { %1582 = vst [vmem:[#allocation5 + $0xb8] sm:$0xff] %v1326_v19  ;;  %v2031_v30 = vsel %vm4108_vm8, %v2030_v20, %v815_v52  ;;  %v2043_v31 = vcvt.s32.f32 %v2042_v22  ;;  %v2045_v25 = vand.u32 2147483648, %v817_v12  ;;  %v308_v32 = vmax.f32 %v52_v18, 0.0  ;;  %v57_v19 = vld [vmem:[#allocation2 + $0x110] sm:$0xff] }
  0x60   :  { %v1327_v34 = vmul.f32 0.06666667, %v2031_v30  ;;  %v2038_v26 = vor.u32 %v2037_v16, %v2036_v24  ;;  %v2048_v35 = vand.u32 2147483647, %v818_v29  ;;  %v2050_v36 = vcvt.f32.s32 %v818_v29 }
  0x61   :  { %vm4120_vm10 = vcmp.lt.f32.partialorder %v2040_v21, 8388608.0  ;;  %v2044_v38 = vand.u32 2147483647, %v2043_v31  ;;  %v819_v39 = vmul.f32 15.0, %v563_v28  ;;  %v564_v40 = vmin.f32 %v308_v32, 1.0 }
  0x62   :  { %1583 = vst [vmem:[#allocation5 + $0xc0] sm:$0xff] %v1327_v34  ;;  %v2039_v41 = vsel %vm4114_vm9, %v2038_v26, %v816_v63  ;;  %v2051_v42 = vcvt.s32.f32 %v2050_v36  ;;  %v2053_v43 = vand.u32 2147483648, %v818_v29  ;;  %v309_v44 = vmax.f32 %v53_v33, 0.0  ;;  %v58_v34 = vld [vmem:[#allocation2 + $0x118] sm:$0xff] }
  0x63   :  { %v1328_v46 = vmul.f32 0.06666667, %v2039_v41  ;;  %v2046_v47 = vor.u32 %v2045_v25, %v2044_v38  ;;  %v2056_v48 = vand.u32 2147483647, %v819_v39  ;;  %v2058_v50 = vcvt.f32.s32 %v819_v39 }
  0x64   :  { %vm4126_vm11 = vcmp.lt.f32.partialorder %v2048_v35, 8388608.0  ;;  %v2052_v52 = vand.u32 2147483647, %v2051_v42  ;;  %v820_v49 = vmul.f32 15.0, %v564_v40  ;;  %v565_v27 = vmin.f32 %v309_v44, 1.0 }
  0x65   :  { %1584 = vst [vmem:[#allocation5 + $0xc8] sm:$0xff] %v1328_v46  ;;  %v2047_v53 = vsel %vm4120_vm10, %v2046_v47, %v817_v12  ;;  %v2059_v54 = vcvt.s32.f32 %v2058_v50  ;;  %v2061_v55 = vand.u32 2147483648, %v819_v39  ;;  %v310_v56 = vmax.f32 %v54_v45, 0.0  ;;  %v59_v46 = vld [vmem:[#allocation2 + $0x120] sm:$0xff] }
  0x66   :  { %v1329_v58 = vmul.f32 0.06666667, %v2047_v53  ;;  %v2054_v59 = vor.u32 %v2053_v43, %v2052_v52  ;;  %v2064_v60 = vand.u32 2147483647, %v820_v49  ;;  %v2066_v61 = vcvt.f32.s32 %v820_v49 }
  0x67   :  { %vm4132_vm12 = vcmp.lt.f32.partialorder %v2056_v48, 8388608.0  ;;  %v2060_v63 = vand.u32 2147483647, %v2059_v54  ;;  %v821_v0 = vmul.f32 15.0, %v565_v27  ;;  %v566_v1 = vmin.f32 %v310_v56, 1.0 }
  0x68   :  { %1585 = vst [vmem:[#allocation5 + $0xd0] sm:$0xff] %v1329_v58  ;;  %v2055_v2 = vsel %vm4126_vm11, %v2054_v59, %v818_v29  ;;  %v2067_v3 = vcvt.s32.f32 %v2066_v61  ;;  %v2069_v4 = vand.u32 2147483648, %v820_v49  ;;  %v311_v5 = vmax.f32 %v55_v57, 0.0  ;;  %v60_v58 = vld [vmem:[#allocation2 + $0x128] sm:$0xff] }
  0x69   :  { %v1330_v7 = vmul.f32 0.06666667, %v2055_v2  ;;  %v2062_v8 = vor.u32 %v2061_v55, %v2060_v63  ;;  %v2072_v9 = vand.u32 2147483647, %v821_v0  ;;  %v2074_v10 = vcvt.f32.s32 %v821_v0 }
  0x6a   :  { %vm4138_vm13 = vcmp.lt.f32.partialorder %v2064_v60, 8388608.0  ;;  %v2068_v12 = vand.u32 2147483647, %v2067_v3  ;;  %v822_v13 = vmul.f32 15.0, %v566_v1  ;;  %v567_v14 = vmin.f32 %v311_v5, 1.0 }
  0x6b   :  { %1586 = vst [vmem:[#allocation5 + $0xd8] sm:$0xff] %v1330_v7  ;;  %v2063_v15 = vsel %vm4132_vm12, %v2062_v8, %v819_v39  ;;  %v2075_v16 = vcvt.s32.f32 %v2074_v10  ;;  %v2077_v17 = vand.u32 2147483648, %v821_v0  ;;  %v312_v18 = vmax.f32 %v56_v6, 0.0  ;;  %v61_v7 = vld [vmem:[#allocation2 + $0x130] sm:$0xff] }
  0x6c   :  { %v1331_v20 = vmul.f32 0.06666667, %v2063_v15  ;;  %v2070_v21 = vor.u32 %v2069_v4, %v2068_v12  ;;  %v2080_v22 = vand.u32 2147483647, %v822_v13  ;;  %v2082_v23 = vcvt.f32.s32 %v822_v13 }
  0x6d   :  { %vm4144_vm14 = vcmp.lt.f32.partialorder %v2072_v9, 8388608.0  ;;  %v2076_v29 = vand.u32 2147483647, %v2075_v16  ;;  %v823_v28 = vmul.f32 15.0, %v567_v14  ;;  %v568_v30 = vmin.f32 %v312_v18, 1.0 }
  0x6e   :  { %1587 = vst [vmem:[#allocation5 + $0xe0] sm:$0xff] %v1331_v20  ;;  %v2071_v31 = vsel %vm4138_vm13, %v2070_v21, %v820_v49  ;;  %v2083_v25 = vcvt.s32.f32 %v2082_v23  ;;  %v2085_v32 = vand.u32 2147483648, %v822_v13  ;;  %v313_v33 = vmax.f32 %v57_v19, 0.0  ;;  %v62_v20 = vld [vmem:[#allocation2 + $0x138] sm:$0xff] }
  0x6f   :  { %v1332_v26 = vmul.f32 0.06666667, %v2071_v31  ;;  %v2078_v35 = vor.u32 %v2077_v17, %v2076_v29  ;;  %v2088_v36 = vand.u32 2147483647, %v823_v28  ;;  %v2090_v37 = vcvt.f32.s32 %v823_v28 }
  0x70   :  { %vm4150_vm15 = vcmp.lt.f32.partialorder %v2080_v22, 8388608.0  ;;  %v2084_v39 = vand.u32 2147483647, %v2083_v25  ;;  %v824_v40 = vmul.f32 15.0, %v568_v30  ;;  %v569_v41 = vmin.f32 %v313_v33, 1.0 }
  0x71   :  { %1588 = vst [vmem:[#allocation5 + $0xe8] sm:$0xff] %v1332_v26  ;;  %v2079_v42 = vsel %vm4144_vm14, %v2078_v35, %v821_v0  ;;  %v2091_v43 = vcvt.s32.f32 %v2090_v37  ;;  %v2093_v44 = vand.u32 2147483648, %v823_v28  ;;  %v314_v45 = vmax.f32 %v58_v34, 0.0  ;;  %v63_v26 = vld [vmem:[#allocation2 + $0x140] sm:$0xff] }
  0x72   :  { %v1333_v47 = vmul.f32 0.06666667, %v2079_v42  ;;  %v2086_v48 = vor.u32 %v2085_v32, %v2084_v39  ;;  %v2096_v50 = vand.u32 2147483647, %v824_v40  ;;  %v2098_v51 = vcvt.f32.s32 %v824_v40 }
  0x73   :  { %vm4156_vm0 = vcmp.lt.f32.partialorder %v2088_v36, 8388608.0  ;;  %v2092_v49 = vand.u32 2147483647, %v2091_v43  ;;  %v825_v27 = vmul.f32 15.0, %v569_v41  ;;  %v570_v53 = vmin.f32 %v314_v45, 1.0 }
  0x74   :  { %1589 = vst [vmem:[#allocation5 + $0xf0] sm:$0xff] %v1333_v47  ;;  %v2087_v54 = vsel %vm4150_vm15, %v2086_v48, %v822_v13  ;;  %v2099_v55 = vcvt.s32.f32 %v2098_v51  ;;  %v2101_v56 = vand.u32 2147483648, %v824_v40  ;;  %v315_v57 = vmax.f32 %v59_v46, 0.0  ;;  %v64_v47 = vld [vmem:[#allocation2 + $0x148] sm:$0xff] }
  0x75   :  { %v1334_v59 = vmul.f32 0.06666667, %v2087_v54  ;;  %v2094_v60 = vor.u32 %v2093_v44, %v2092_v49  ;;  %v2104_v61 = vand.u32 2147483647, %v825_v27  ;;  %v2106_v62 = vcvt.f32.s32 %v825_v27 }
  0x76   :  { %vm4162_vm1 = vcmp.lt.f32.partialorder %v2096_v50, 8388608.0  ;;  %v2100_v0 = vand.u32 2147483647, %v2099_v55  ;;  %v826_v1 = vmul.f32 15.0, %v570_v53  ;;  %v571_v2 = vmin.f32 %v315_v57, 1.0 }
  0x77   :  { %1590 = vst [vmem:[#allocation5 + $0xf8] sm:$0xff] %v1334_v59  ;;  %v2095_v3 = vsel %vm4156_vm0, %v2094_v60, %v823_v28  ;;  %v2107_v4 = vcvt.s32.f32 %v2106_v62  ;;  %v2109_v5 = vand.u32 2147483648, %v825_v27  ;;  %v316_v6 = vmax.f32 %v60_v58, 0.0  ;;  %v65_v59 = vld [vmem:[#allocation2 + $0x150] sm:$0xff] }
  0x78   :  { %v1335_v8 = vmul.f32 0.06666667, %v2095_v3  ;;  %v2102_v9 = vor.u32 %v2101_v56, %v2100_v0  ;;  %v2112_v10 = vand.u32 2147483647, %v826_v1  ;;  %v2114_v11 = vcvt.f32.s32 %v826_v1 }
  0x79   :  { %vm4168_vm2 = vcmp.lt.f32.partialorder %v2104_v61, 8388608.0  ;;  %v2108_v13 = vand.u32 2147483647, %v2107_v4  ;;  %v827_v14 = vmul.f32 15.0, %v571_v2  ;;  %v572_v15 = vmin.f32 %v316_v6, 1.0 }
  0x7a   :  { %1591 = vst [vmem:[#allocation5 + $0x100] sm:$0xff] %v1335_v8  ;;  %v2103_v16 = vsel %vm4162_vm1, %v2102_v9, %v824_v40  ;;  %v2115_v17 = vcvt.s32.f32 %v2114_v11  ;;  %v2117_v18 = vand.u32 2147483648, %v826_v1  ;;  %v317_v19 = vmax.f32 %v61_v7, 0.0  ;;  %v66_v8 = vld [vmem:[#allocation2 + $0x158] sm:$0xff] }
  0x7b   :  { %v1336_v21 = vmul.f32 0.06666667, %v2103_v16  ;;  %v2110_v22 = vor.u32 %v2109_v5, %v2108_v13  ;;  %v2120_v23 = vand.u32 2147483647, %v827_v14  ;;  %v2122_v24 = vcvt.f32.s32 %v827_v14 }
  0x7c   :  { %vm4174_vm3 = vcmp.lt.f32.partialorder %v2112_v10, 8388608.0  ;;  %v2116_v28 = vand.u32 2147483647, %v2115_v17  ;;  %v828_v30 = vmul.f32 15.0, %v572_v15  ;;  %v573_v31 = vmin.f32 %v317_v19, 1.0 }
  0x7d   :  { %1592 = vst [vmem:[#allocation5 + $0x108] sm:$0xff] %v1336_v21  ;;  %v2111_v25 = vsel %vm4168_vm2, %v2110_v22, %v825_v27  ;;  %v2123_v32 = vcvt.s32.f32 %v2122_v24  ;;  %v2125_v33 = vand.u32 2147483648, %v827_v14  ;;  %v318_v34 = vmax.f32 %v62_v20, 0.0  ;;  %v67_v21 = vld [vmem:[#allocation2 + $0x160] sm:$0xff] }
  0x7e   :  { %v1337_v35 = vmul.f32 0.06666667, %v2111_v25  ;;  %v2118_v36 = vor.u32 %v2117_v18, %v2116_v28  ;;  %v2128_v37 = vand.u32 2147483647, %v828_v30  ;;  %v2130_v38 = vcvt.f32.s32 %v828_v30 }
  0x7f   :  { %vm4180_vm4 = vcmp.lt.f32.partialorder %v2120_v23, 8388608.0  ;;  %v2124_v40 = vand.u32 2147483647, %v2123_v32  ;;  %v829_v41 = vmul.f32 15.0, %v573_v31  ;;  %v574_v42 = vmin.f32 %v318_v34, 1.0 }
  0x80   :  { %1593 = vst [vmem:[#allocation5 + $0x110] sm:$0xff] %v1337_v35  ;;  %v2119_v43 = vsel %vm4174_vm3, %v2118_v36, %v826_v1  ;;  %v2131_v44 = vcvt.s32.f32 %v2130_v38  ;;  %v2133_v45 = vand.u32 2147483648, %v828_v30  ;;  %v319_v46 = vmax.f32 %v63_v26, 0.0  ;;  %v68_v35 = vld [vmem:[#allocation2 + $0x168] sm:$0xff] }
  0x81   :  { %v1338_v48 = vmul.f32 0.06666667, %v2119_v43  ;;  %v2126_v50 = vor.u32 %v2125_v33, %v2124_v40  ;;  %v2136_v51 = vand.u32 2147483647, %v829_v41  ;;  %v2138_v52 = vcvt.f32.s32 %v829_v41 }
  0x82   :  { %vm4186_vm5 = vcmp.lt.f32.partialorder %v2128_v37, 8388608.0  ;;  %v2132_v27 = vand.u32 2147483647, %v2131_v44  ;;  %v830_v53 = vmul.f32 15.0, %v574_v42  ;;  %v575_v54 = vmin.f32 %v319_v46, 1.0 }
  0x83   :  { %1594 = vst [vmem:[#allocation5 + $0x118] sm:$0xff] %v1338_v48  ;;  %v2127_v55 = vsel %vm4180_vm4, %v2126_v50, %v827_v14  ;;  %v2139_v56 = vcvt.s32.f32 %v2138_v52  ;;  %v2141_v57 = vand.u32 2147483648, %v829_v41  ;;  %v320_v58 = vmax.f32 %v64_v47, 0.0  ;;  %v69_v48 = vld [vmem:[#allocation2 + $0x170] sm:$0xff] }
  0x84   :  { %v1339_v60 = vmul.f32 0.06666667, %v2127_v55  ;;  %v2134_v61 = vor.u32 %v2133_v45, %v2132_v27  ;;  %v2144_v62 = vand.u32 2147483647, %v830_v53  ;;  %v2146_v63 = vcvt.f32.s32 %v830_v53 }
  0x85   :  { %vm4192_vm6 = vcmp.lt.f32.partialorder %v2136_v51, 8388608.0  ;;  %v2140_v1 = vand.u32 2147483647, %v2139_v56  ;;  %v831_v2 = vmul.f32 15.0, %v575_v54  ;;  %v576_v3 = vmin.f32 %v320_v58, 1.0 }
  0x86   :  { %1595 = vst [vmem:[#allocation5 + $0x120] sm:$0xff] %v1339_v60  ;;  %v2135_v4 = vsel %vm4186_vm5, %v2134_v61, %v828_v30  ;;  %v2147_v5 = vcvt.s32.f32 %v2146_v63  ;;  %v2149_v6 = vand.u32 2147483648, %v830_v53  ;;  %v321_v7 = vmax.f32 %v65_v59, 0.0  ;;  %v70_v60 = vld [vmem:[#allocation2 + $0x178] sm:$0xff] }
  0x87   :  { %v1340_v9 = vmul.f32 0.06666667, %v2135_v4  ;;  %v2142_v10 = vor.u32 %v2141_v57, %v2140_v1  ;;  %v2152_v11 = vand.u32 2147483647, %v831_v2  ;;  %v2154_v12 = vcvt.f32.s32 %v831_v2 }
  0x88   :  { %vm4198_vm7 = vcmp.lt.f32.partialorder %v2144_v62, 8388608.0  ;;  %v2148_v14 = vand.u32 2147483647, %v2147_v5  ;;  %v832_v15 = vmul.f32 15.0, %v576_v3  ;;  %v577_v16 = vmin.f32 %v321_v7, 1.0 }
  0x89   :  { %1596 = vst [vmem:[#allocation5 + $0x128] sm:$0xff] %v1340_v9  ;;  %v2143_v17 = vsel %vm4192_vm6, %v2142_v10, %v829_v41  ;;  %v2155_v18 = vcvt.s32.f32 %v2154_v12  ;;  %v2157_v19 = vand.u32 2147483648, %v831_v2  ;;  %v322_v20 = vmax.f32 %v66_v8, 0.0  ;;  %v71_v9 = vld [vmem:[#allocation2 + $0x180] sm:$0xff] }
  0x8a   :  { %v1341_v22 = vmul.f32 0.06666667, %v2143_v17  ;;  %v2150_v23 = vor.u32 %v2149_v6, %v2148_v14  ;;  %v2160_v24 = vand.u32 2147483647, %v832_v15  ;;  %v2162_v29 = vcvt.f32.s32 %v832_v15 }
  0x8b   :  { %vm4204_vm8 = vcmp.lt.f32.partialorder %v2152_v11, 8388608.0  ;;  %v2156_v30 = vand.u32 2147483647, %v2155_v18  ;;  %v833_v31 = vmul.f32 15.0, %v577_v16  ;;  %v578_v25 = vmin.f32 %v322_v20, 1.0 }
  0x8c   :  { %1597 = vst [vmem:[#allocation5 + $0x130] sm:$0xff] %v1341_v22  ;;  %v2151_v32 = vsel %vm4198_vm7, %v2150_v23, %v830_v53  ;;  %v2163_v33 = vcvt.s32.f32 %v2162_v29  ;;  %v2165_v34 = vand.u32 2147483648, %v832_v15  ;;  %v323_v26 = vmax.f32 %v67_v21, 0.0  ;;  %v72_v22 = vld [vmem:[#allocation2 + $0x188] sm:$0xff] }
  0x8d   :  { %v1342_v36 = vmul.f32 0.06666667, %v2151_v32  ;;  %v2158_v37 = vor.u32 %v2157_v19, %v2156_v30  ;;  %v2168_v38 = vand.u32 2147483647, %v833_v31  ;;  %v2170_v39 = vcvt.f32.s32 %v833_v31 }
  0x8e   :  { %vm4210_vm9 = vcmp.lt.f32.partialorder %v2160_v24, 8388608.0  ;;  %v2164_v41 = vand.u32 2147483647, %v2163_v33  ;;  %v834_v42 = vmul.f32 15.0, %v578_v25  ;;  %v579_v43 = vmin.f32 %v323_v26, 1.0 }
  0x8f   :  { %1598 = vst [vmem:[#allocation5 + $0x138] sm:$0xff] %v1342_v36  ;;  %v2159_v44 = vsel %vm4204_vm8, %v2158_v37, %v831_v2  ;;  %v2171_v45 = vcvt.s32.f32 %v2170_v39  ;;  %v2173_v46 = vand.u32 2147483648, %v833_v31  ;;  %v324_v47 = vmax.f32 %v68_v35, 0.0  ;;  %v73_v36 = vld [vmem:[#allocation2 + $0x190] sm:$0xff] }
  0x90   :  { %v1343_v50 = vmul.f32 0.06666667, %v2159_v44  ;;  %v2166_v51 = vor.u32 %v2165_v34, %v2164_v41  ;;  %v2176_v52 = vand.u32 2147483647, %v834_v42  ;;  %v2178_v49 = vcvt.f32.s32 %v834_v42 }
  0x91   :  { %vm4216_vm10 = vcmp.lt.f32.partialorder %v2168_v38, 8388608.0  ;;  %v2172_v53 = vand.u32 2147483647, %v2171_v45  ;;  %v835_v54 = vmul.f32 15.0, %v579_v43  ;;  %v580_v55 = vmin.f32 %v324_v47, 1.0 }
  0x92   :  { %1599 = vst [vmem:[#allocation5 + $0x140] sm:$0xff] %v1343_v50  ;;  %v2167_v56 = vsel %vm4210_vm9, %v2166_v51, %v832_v15  ;;  %v2179_v57 = vcvt.s32.f32 %v2178_v49  ;;  %v2181_v58 = vand.u32 2147483648, %v834_v42  ;;  %v325_v59 = vmax.f32 %v69_v48, 0.0  ;;  %v74_v50 = vld [vmem:[#allocation2 + $0x198] sm:$0xff] }
  0x93   :  { %v1344_v61 = vmul.f32 0.06666667, %v2167_v56  ;;  %v2174_v62 = vor.u32 %v2173_v46, %v2172_v53  ;;  %v2184_v63 = vand.u32 2147483647, %v835_v54  ;;  %v2186_v0 = vcvt.f32.s32 %v835_v54 }
  0x94   :  { %vm4222_vm11 = vcmp.lt.f32.partialorder %v2176_v52, 8388608.0  ;;  %v2180_v2 = vand.u32 2147483647, %v2179_v57  ;;  %v836_v3 = vmul.f32 15.0, %v580_v55  ;;  %v581_v4 = vmin.f32 %v325_v59, 1.0 }
  0x95   :  { %1600 = vst [vmem:[#allocation5 + $0x148] sm:$0xff] %v1344_v61  ;;  %v2175_v5 = vsel %vm4216_vm10, %v2174_v62, %v833_v31  ;;  %v2187_v6 = vcvt.s32.f32 %v2186_v0  ;;  %v2189_v7 = vand.u32 2147483648, %v835_v54  ;;  %v326_v8 = vmax.f32 %v70_v60, 0.0  ;;  %v75_v61 = vld [vmem:[#allocation2 + $0x1a0] sm:$0xff] }
  0x96   :  { %v1345_v10 = vmul.f32 0.06666667, %v2175_v5  ;;  %v2182_v11 = vor.u32 %v2181_v58, %v2180_v2  ;;  %v2192_v12 = vand.u32 2147483647, %v836_v3  ;;  %v2194_v13 = vcvt.f32.s32 %v836_v3 }
  0x97   :  { %vm4228_vm12 = vcmp.lt.f32.partialorder %v2184_v63, 8388608.0  ;;  %v2188_v15 = vand.u32 2147483647, %v2187_v6  ;;  %v837_v16 = vmul.f32 15.0, %v581_v4  ;;  %v582_v17 = vmin.f32 %v326_v8, 1.0 }
  0x98   :  { %1601 = vst [vmem:[#allocation5 + $0x150] sm:$0xff] %v1345_v10  ;;  %v2183_v18 = vsel %vm4222_vm11, %v2182_v11, %v834_v42  ;;  %v2195_v19 = vcvt.s32.f32 %v2194_v13  ;;  %v2197_v20 = vand.u32 2147483648, %v836_v3  ;;  %v327_v21 = vmax.f32 %v71_v9, 0.0  ;;  %v76_v10 = vld [vmem:[#allocation2 + $0x1a8] sm:$0xff] }
  0x99   :  { %v1346_v23 = vmul.f32 0.06666667, %v2183_v18  ;;  %v2190_v24 = vor.u32 %v2189_v7, %v2188_v15  ;;  %v2200_v29 = vand.u32 2147483647, %v837_v16  ;;  %v2202_v28 = vcvt.f32.s32 %v837_v16 }
  0x9a   :  { %vm4234_vm13 = vcmp.lt.f32.partialorder %v2192_v12, 8388608.0  ;;  %v2196_v31 = vand.u32 2147483647, %v2195_v19  ;;  %v838_v25 = vmul.f32 15.0, %v582_v17  ;;  %v583_v32 = vmin.f32 %v327_v21, 1.0 }
  0x9b   :  { %1602 = vst [vmem:[#allocation5 + $0x158] sm:$0xff] %v1346_v23  ;;  %v2191_v33 = vsel %vm4228_vm12, %v2190_v24, %v835_v54  ;;  %v2203_v34 = vcvt.s32.f32 %v2202_v28  ;;  %v2205_v26 = vand.u32 2147483648, %v837_v16  ;;  %v328_v35 = vmax.f32 %v72_v22, 0.0  ;;  %v77_v23 = vld [vmem:[#allocation2 + $0x1b0] sm:$0xff] }
  0x9c   :  { %v1347_v37 = vmul.f32 0.06666667, %v2191_v33  ;;  %v2198_v38 = vor.u32 %v2197_v20, %v2196_v31  ;;  %v2208_v39 = vand.u32 2147483647, %v838_v25  ;;  %v2210_v40 = vcvt.f32.s32 %v838_v25 }
  0x9d   :  { %vm4240_vm14 = vcmp.lt.f32.partialorder %v2200_v29, 8388608.0  ;;  %v2204_v42 = vand.u32 2147483647, %v2203_v34  ;;  %v839_v43 = vmul.f32 15.0, %v583_v32  ;;  %v584_v44 = vmin.f32 %v328_v35, 1.0 }
  0x9e   :  { %1603 = vst [vmem:[#allocation5 + $0x160] sm:$0xff] %v1347_v37  ;;  %v2199_v45 = vsel %vm4234_vm13, %v2198_v38, %v836_v3  ;;  %v2211_v46 = vcvt.s32.f32 %v2210_v40  ;;  %v2213_v47 = vand.u32 2147483648, %v838_v25  ;;  %v329_v48 = vmax.f32 %v73_v36, 0.0  ;;  %v78_v37 = vld [vmem:[#allocation2 + $0x1b8] sm:$0xff] }
  0x9f   :  { %v1348_v51 = vmul.f32 0.06666667, %v2199_v45  ;;  %v2206_v52 = vor.u32 %v2205_v26, %v2204_v42  ;;  %v2216_v49 = vand.u32 2147483647, %v839_v43  ;;  %v2218_v27 = vcvt.f32.s32 %v839_v43 }
  0xa0   :  { %vm4246_vm15 = vcmp.lt.f32.partialorder %v2208_v39, 8388608.0  ;;  %v2212_v54 = vand.u32 2147483647, %v2211_v46  ;;  %v840_v55 = vmul.f32 15.0, %v584_v44  ;;  %v585_v56 = vmin.f32 %v329_v48, 1.0 }
  0xa1   :  { %1604 = vst [vmem:[#allocation5 + $0x168] sm:$0xff] %v1348_v51  ;;  %v2207_v57 = vsel %vm4240_vm14, %v2206_v52, %v837_v16  ;;  %v2219_v58 = vcvt.s32.f32 %v2218_v27  ;;  %v2221_v59 = vand.u32 2147483648, %v839_v43  ;;  %v330_v60 = vmax.f32 %v74_v50, 0.0  ;;  %v79_v51 = vld [vmem:[#allocation2 + $0x1c0] sm:$0xff] }
  0xa2   :  { %v1349_v62 = vmul.f32 0.06666667, %v2207_v57  ;;  %v2214_v63 = vor.u32 %v2213_v47, %v2212_v54  ;;  %v2224_v0 = vand.u32 2147483647, %v840_v55  ;;  %v2226_v1 = vcvt.f32.s32 %v840_v55 }
  0xa3   :  { %vm4252_vm0 = vcmp.lt.f32.partialorder %v2216_v49, 8388608.0  ;;  %v2220_v3 = vand.u32 2147483647, %v2219_v58  ;;  %v841_v4 = vmul.f32 15.0, %v585_v56  ;;  %v586_v5 = vmin.f32 %v330_v60, 1.0 }
  0xa4   :  { %1605 = vst [vmem:[#allocation5 + $0x170] sm:$0xff] %v1349_v62  ;;  %v2215_v6 = vsel %vm4246_vm15, %v2214_v63, %v838_v25  ;;  %v2227_v7 = vcvt.s32.f32 %v2226_v1  ;;  %v2229_v8 = vand.u32 2147483648, %v840_v55  ;;  %v331_v9 = vmax.f32 %v75_v61, 0.0  ;;  %v80_v62 = vld [vmem:[#allocation2 + $0x1c8] sm:$0xff] }
  0xa5   :  { %v1350_v11 = vmul.f32 0.06666667, %v2215_v6  ;;  %v2222_v12 = vor.u32 %v2221_v59, %v2220_v3  ;;  %v2232_v13 = vand.u32 2147483647, %v841_v4  ;;  %v2234_v14 = vcvt.f32.s32 %v841_v4 }
  0xa6   :  { %vm4258_vm1 = vcmp.lt.f32.partialorder %v2224_v0, 8388608.0  ;;  %v2228_v16 = vand.u32 2147483647, %v2227_v7  ;;  %v842_v17 = vmul.f32 15.0, %v586_v5  ;;  %v587_v18 = vmin.f32 %v331_v9, 1.0 }
  0xa7   :  { %1606 = vst [vmem:[#allocation5 + $0x178] sm:$0xff] %v1350_v11  ;;  %v2223_v19 = vsel %vm4252_vm0, %v2222_v12, %v839_v43  ;;  %v2235_v20 = vcvt.s32.f32 %v2234_v14  ;;  %v2237_v21 = vand.u32 2147483648, %v841_v4  ;;  %v332_v22 = vmax.f32 %v76_v10, 0.0  ;;  %v81_v11 = vld [vmem:[#allocation2 + $0x1d0] sm:$0xff] }
  0xa8   :  { %v1351_v24 = vmul.f32 0.06666667, %v2223_v19  ;;  %v2230_v29 = vor.u32 %v2229_v8, %v2228_v16  ;;  %v2240_v28 = vand.u32 2147483647, %v842_v17  ;;  %v2242_v30 = vcvt.f32.s32 %v842_v17 }
  0xa9   :  { %vm4264_vm2 = vcmp.lt.f32.partialorder %v2232_v13, 8388608.0  ;;  %v2236_v25 = vand.u32 2147483647, %v2235_v20  ;;  %v843_v32 = vmul.f32 15.0, %v587_v18  ;;  %v588_v33 = vmin.f32 %v332_v22, 1.0 }
  0xaa   :  { %1607 = vst [vmem:[#allocation5 + $0x180] sm:$0xff] %v1351_v24  ;;  %v2231_v34 = vsel %vm4258_vm1, %v2230_v29, %v840_v55  ;;  %v2243_v26 = vcvt.s32.f32 %v2242_v30  ;;  %v2245_v35 = vand.u32 2147483648, %v842_v17  ;;  %v333_v36 = vmax.f32 %v77_v23, 0.0  ;;  %v82_v24 = vld [vmem:[#allocation2 + $0x1d8] sm:$0xff] }
  0xab   :  { %v1352_v38 = vmul.f32 0.06666667, %v2231_v34  ;;  %v2238_v39 = vor.u32 %v2237_v21, %v2236_v25  ;;  %v2248_v40 = vand.u32 2147483647, %v843_v32  ;;  %v2250_v41 = vcvt.f32.s32 %v843_v32 }
  0xac   :  { %vm4270_vm3 = vcmp.lt.f32.partialorder %v2240_v28, 8388608.0  ;;  %v2244_v43 = vand.u32 2147483647, %v2243_v26  ;;  %v844_v44 = vmul.f32 15.0, %v588_v33  ;;  %v589_v45 = vmin.f32 %v333_v36, 1.0 }
  0xad   :  { %1608 = vst [vmem:[#allocation5 + $0x188] sm:$0xff] %v1352_v38  ;;  %v2239_v46 = vsel %vm4264_vm2, %v2238_v39, %v841_v4  ;;  %v2251_v47 = vcvt.s32.f32 %v2250_v41  ;;  %v2253_v48 = vand.u32 2147483648, %v843_v32  ;;  %v334_v50 = vmax.f32 %v78_v37, 0.0  ;;  %v83_v38 = vld [vmem:[#allocation2 + $0x1e0] sm:$0xff] }
  0xae   :  { %v1353_v52 = vmul.f32 0.06666667, %v2239_v46  ;;  %v2246_v49 = vor.u32 %v2245_v35, %v2244_v43  ;;  %v2256_v27 = vand.u32 2147483647, %v844_v44  ;;  %v2258_v53 = vcvt.f32.s32 %v844_v44 }
  0xaf   :  { %vm4276_vm4 = vcmp.lt.f32.partialorder %v2248_v40, 8388608.0  ;;  %v2252_v55 = vand.u32 2147483647, %v2251_v47  ;;  %v845_v56 = vmul.f32 15.0, %v589_v45  ;;  %v590_v57 = vmin.f32 %v334_v50, 1.0 }
  0xb0   :  { %1609 = vst [vmem:[#allocation5 + $0x190] sm:$0xff] %v1353_v52  ;;  %v2247_v58 = vsel %vm4270_vm3, %v2246_v49, %v842_v17  ;;  %v2259_v59 = vcvt.s32.f32 %v2258_v53  ;;  %v2261_v60 = vand.u32 2147483648, %v844_v44  ;;  %v335_v61 = vmax.f32 %v79_v51, 0.0  ;;  %v84_v52 = vld [vmem:[#allocation2 + $0x1e8] sm:$0xff] }
  0xb1   :  { %v1354_v63 = vmul.f32 0.06666667, %v2247_v58  ;;  %v2254_v0 = vor.u32 %v2253_v48, %v2252_v55  ;;  %v2264_v1 = vand.u32 2147483647, %v845_v56  ;;  %v2266_v2 = vcvt.f32.s32 %v845_v56 }
  0xb2   :  { %vm4282_vm5 = vcmp.lt.f32.partialorder %v2256_v27, 8388608.0  ;;  %v2260_v4 = vand.u32 2147483647, %v2259_v59  ;;  %v846_v5 = vmul.f32 15.0, %v590_v57  ;;  %v591_v6 = vmin.f32 %v335_v61, 1.0 }
  0xb3   :  { %1610 = vst [vmem:[#allocation5 + $0x198] sm:$0xff] %v1354_v63  ;;  %v2255_v7 = vsel %vm4276_vm4, %v2254_v0, %v843_v32  ;;  %v2267_v8 = vcvt.s32.f32 %v2266_v2  ;;  %v2269_v9 = vand.u32 2147483648, %v845_v56  ;;  %v336_v10 = vmax.f32 %v80_v62, 0.0  ;;  %v85_v63 = vld [vmem:[#allocation2 + $0x1f0] sm:$0xff] }
  0xb4   :  { %v1355_v12 = vmul.f32 0.06666667, %v2255_v7  ;;  %v2262_v13 = vor.u32 %v2261_v60, %v2260_v4  ;;  %v2272_v14 = vand.u32 2147483647, %v846_v5  ;;  %v2274_v15 = vcvt.f32.s32 %v846_v5 }
  0xb5   :  { %vm4288_vm6 = vcmp.lt.f32.partialorder %v2264_v1, 8388608.0  ;;  %v2268_v17 = vand.u32 2147483647, %v2267_v8  ;;  %v847_v18 = vmul.f32 15.0, %v591_v6  ;;  %v592_v19 = vmin.f32 %v336_v10, 1.0 }
  0xb6   :  { %1611 = vst [vmem:[#allocation5 + $0x1a0] sm:$0xff] %v1355_v12  ;;  %v2263_v20 = vsel %vm4282_vm5, %v2262_v13, %v844_v44  ;;  %v2275_v21 = vcvt.s32.f32 %v2274_v15  ;;  %v2277_v22 = vand.u32 2147483648, %v846_v5  ;;  %v337_v23 = vmax.f32 %v81_v11, 0.0  ;;  %v86_v12 = vld [vmem:[#allocation2 + $0x1f8] sm:$0xff] }
  0xb7   :  { %v1356_v29 = vmul.f32 0.06666667, %v2263_v20  ;;  %v2270_v28 = vor.u32 %v2269_v9, %v2268_v17  ;;  %v2280_v30 = vand.u32 2147483647, %v847_v18  ;;  %v2282_v31 = vcvt.f32.s32 %v847_v18 }
  0xb8   :  { %vm4294_vm7 = vcmp.lt.f32.partialorder %v2272_v14, 8388608.0  ;;  %v2276_v32 = vand.u32 2147483647, %v2275_v21  ;;  %v848_v33 = vmul.f32 15.0, %v592_v19  ;;  %v593_v34 = vmin.f32 %v337_v23, 1.0 }
  0xb9   :  { %1612 = vst [vmem:[#allocation5 + $0x1a8] sm:$0xff] %v1356_v29  ;;  %v2271_v26 = vsel %vm4288_vm6, %v2270_v28, %v845_v56  ;;  %v2283_v35 = vcvt.s32.f32 %v2282_v31  ;;  %v2285_v36 = vand.u32 2147483648, %v847_v18  ;;  %v338_v37 = vmax.f32 %v82_v24, 0.0  ;;  %v87_v29 = vld [vmem:[#allocation2 + $0x200] sm:$0xff] }
  0xba   :  { %v1357_v39 = vmul.f32 0.06666667, %v2271_v26  ;;  %v2278_v40 = vor.u32 %v2277_v22, %v2276_v32  ;;  %v2288_v41 = vand.u32 2147483647, %v848_v33  ;;  %v2290_v42 = vcvt.f32.s32 %v848_v33 }
  0xbb   :  { %vm4300_vm8 = vcmp.lt.f32.partialorder %v2280_v30, 8388608.0  ;;  %v2284_v44 = vand.u32 2147483647, %v2283_v35  ;;  %v849_v45 = vmul.f32 15.0, %v593_v34  ;;  %v594_v46 = vmin.f32 %v338_v37, 1.0 }
  0xbc   :  { %1613 = vst [vmem:[#allocation5 + $0x1b0] sm:$0xff] %v1357_v39  ;;  %v2279_v47 = vsel %vm4294_vm7, %v2278_v40, %v846_v5  ;;  %v2291_v48 = vcvt.s32.f32 %v2290_v42  ;;  %v2293_v50 = vand.u32 2147483648, %v848_v33  ;;  %v339_v51 = vmax.f32 %v83_v38, 0.0  ;;  %v88_v39 = vld [vmem:[#allocation2 + $0x208] sm:$0xff] }
  0xbd   :  { %v1358_v49 = vmul.f32 0.06666667, %v2279_v47  ;;  %v2286_v27 = vor.u32 %v2285_v36, %v2284_v44  ;;  %v2296_v53 = vand.u32 2147483647, %v849_v45  ;;  %v2298_v54 = vcvt.f32.s32 %v849_v45 }
  0xbe   :  { %vm4306_vm9 = vcmp.lt.f32.partialorder %v2288_v41, 8388608.0  ;;  %v2292_v56 = vand.u32 2147483647, %v2291_v48  ;;  %v850_v57 = vmul.f32 15.0, %v594_v46  ;;  %v595_v58 = vmin.f32 %v339_v51, 1.0 }
  0xbf   :  { %1614 = vst [vmem:[#allocation5 + $0x1b8] sm:$0xff] %v1358_v49  ;;  %v2287_v59 = vsel %vm4300_vm8, %v2286_v27, %v847_v18  ;;  %v2299_v60 = vcvt.s32.f32 %v2298_v54  ;;  %v2301_v61 = vand.u32 2147483648, %v849_v45  ;;  %v340_v62 = vmax.f32 %v84_v52, 0.0  ;;  %v89_v49 = vld [vmem:[#allocation2 + $0x210] sm:$0xff] }
  0xc0   :  { %v1359_v0 = vmul.f32 0.06666667, %v2287_v59  ;;  %v2294_v1 = vor.u32 %v2293_v50, %v2292_v56  ;;  %v2304_v2 = vand.u32 2147483647, %v850_v57  ;;  %v2306_v3 = vcvt.f32.s32 %v850_v57 }
  0xc1   :  { %vm4312_vm10 = vcmp.lt.f32.partialorder %v2296_v53, 8388608.0  ;;  %v2300_v5 = vand.u32 2147483647, %v2299_v60  ;;  %v851_v6 = vmul.f32 15.0, %v595_v58  ;;  %v596_v7 = vmin.f32 %v340_v62, 1.0 }
  0xc2   :  { %1615 = vst [vmem:[#allocation5 + $0x1c0] sm:$0xff] %v1359_v0  ;;  %v2295_v8 = vsel %vm4306_vm9, %v2294_v1, %v848_v33  ;;  %v2307_v9 = vcvt.s32.f32 %v2306_v3  ;;  %v2309_v10 = vand.u32 2147483648, %v850_v57  ;;  %v341_v11 = vmax.f32 %v85_v63, 0.0  ;;  %v90_v0 = vld [vmem:[#allocation2 + $0x218] sm:$0xff] }
  0xc3   :  { %v1360_v13 = vmul.f32 0.06666667, %v2295_v8  ;;  %v2302_v14 = vor.u32 %v2301_v61, %v2300_v5  ;;  %v2312_v15 = vand.u32 2147483647, %v851_v6  ;;  %v2314_v16 = vcvt.f32.s32 %v851_v6 }
  0xc4   :  { %vm4318_vm11 = vcmp.lt.f32.partialorder %v2304_v2, 8388608.0  ;;  %v2308_v18 = vand.u32 2147483647, %v2307_v9  ;;  %v852_v19 = vmul.f32 15.0, %v596_v7  ;;  %v597_v20 = vmin.f32 %v341_v11, 1.0 }
  0xc5   :  { %1616 = vst [vmem:[#allocation5 + $0x1c8] sm:$0xff] %v1360_v13  ;;  %v2303_v21 = vsel %vm4312_vm10, %v2302_v14, %v849_v45  ;;  %v2315_v22 = vcvt.s32.f32 %v2314_v16  ;;  %v2317_v23 = vand.u32 2147483648, %v851_v6  ;;  %v342_v24 = vmax.f32 %v86_v12, 0.0  ;;  %v91_v13 = vld [vmem:[#allocation2 + $0x220] sm:$0xff] }
  0xc6   :  { %v1361_v28 = vmul.f32 0.06666667, %v2303_v21  ;;  %v2310_v30 = vor.u32 %v2309_v10, %v2308_v18  ;;  %v2320_v31 = vand.u32 2147483647, %v852_v19  ;;  %v2322_v25 = vcvt.f32.s32 %v852_v19 }
  0xc7   :  { %vm4324_vm12 = vcmp.lt.f32.partialorder %v2312_v15, 8388608.0  ;;  %v2316_v33 = vand.u32 2147483647, %v2315_v22  ;;  %v853_v34 = vmul.f32 15.0, %v597_v20  ;;  %v598_v26 = vmin.f32 %v342_v24, 1.0 }
  0xc8   :  { %1617 = vst [vmem:[#allocation5 + $0x1d0] sm:$0xff] %v1361_v28  ;;  %v2311_v35 = vsel %vm4318_vm11, %v2310_v30, %v850_v57  ;;  %v2323_v36 = vcvt.s32.f32 %v2322_v25  ;;  %v2325_v37 = vand.u32 2147483648, %v852_v19  ;;  %v343_v38 = vmax.f32 %v87_v29, 0.0  ;;  %v92_v28 = vld [vmem:[#allocation2 + $0x228] sm:$0xff] }
  0xc9   :  { %v1362_v40 = vmul.f32 0.06666667, %v2311_v35  ;;  %v2318_v41 = vor.u32 %v2317_v23, %v2316_v33  ;;  %v2328_v42 = vand.u32 2147483647, %v853_v34  ;;  %v2330_v43 = vcvt.f32.s32 %v853_v34 }
  0xca   :  { %vm4330_vm13 = vcmp.lt.f32.partialorder %v2320_v31, 8388608.0  ;;  %v2324_v45 = vand.u32 2147483647, %v2323_v36  ;;  %v854_v46 = vmul.f32 15.0, %v598_v26  ;;  %v599_v47 = vmin.f32 %v343_v38, 1.0 }
  0xcb   :  { %1618 = vst [vmem:[#allocation5 + $0x1d8] sm:$0xff] %v1362_v40  ;;  %v2319_v48 = vsel %vm4324_vm12, %v2318_v41, %v851_v6  ;;  %v2331_v50 = vcvt.s32.f32 %v2330_v43  ;;  %v2333_v51 = vand.u32 2147483648, %v853_v34  ;;  %v344_v52 = vmax.f32 %v88_v39, 0.0  ;;  %v93_v40 = vld [vmem:[#allocation2 + $0x230] sm:$0xff] }
  0xcc   :  { %v1363_v27 = vmul.f32 0.06666667, %v2319_v48  ;;  %v2326_v53 = vor.u32 %v2325_v37, %v2324_v45  ;;  %v2336_v54 = vand.u32 2147483647, %v854_v46  ;;  %v2338_v55 = vcvt.f32.s32 %v854_v46 }
  0xcd   :  { %vm4336_vm14 = vcmp.lt.f32.partialorder %v2328_v42, 8388608.0  ;;  %v2332_v57 = vand.u32 2147483647, %v2331_v50  ;;  %v855_v58 = vmul.f32 15.0, %v599_v47  ;;  %v600_v59 = vmin.f32 %v344_v52, 1.0 }
  0xce   :  { %1619 = vst [vmem:[#allocation5 + $0x1e0] sm:$0xff] %v1363_v27  ;;  %v2327_v60 = vsel %vm4330_vm13, %v2326_v53, %v852_v19  ;;  %v2339_v61 = vcvt.s32.f32 %v2338_v55  ;;  %v2341_v62 = vand.u32 2147483648, %v854_v46  ;;  %v345_v63 = vmax.f32 %v89_v49, 0.0  ;;  %v94_v27 = vld [vmem:[#allocation2 + $0x238] sm:$0xff] }
  0xcf   :  { %v1364_v1 = vmul.f32 0.06666667, %v2327_v60  ;;  %v2334_v2 = vor.u32 %v2333_v51, %v2332_v57  ;;  %v2344_v3 = vand.u32 2147483647, %v855_v58  ;;  %v2346_v4 = vcvt.f32.s32 %v855_v58 }
  0xd0   :  { %vm4342_vm15 = vcmp.lt.f32.partialorder %v2336_v54, 8388608.0  ;;  %v2340_v6 = vand.u32 2147483647, %v2339_v61  ;;  %v856_v7 = vmul.f32 15.0, %v600_v59  ;;  %v601_v8 = vmin.f32 %v345_v63, 1.0 }
  0xd1   :  { %1620 = vst [vmem:[#allocation5 + $0x1e8] sm:$0xff] %v1364_v1  ;;  %v2335_v9 = vsel %vm4336_vm14, %v2334_v2, %v853_v34  ;;  %v2347_v10 = vcvt.s32.f32 %v2346_v4  ;;  %v2349_v11 = vand.u32 2147483648, %v855_v58  ;;  %v346_v12 = vmax.f32 %v90_v0, 0.0  ;;  %v95_v1 = vld [vmem:[#allocation2 + $0x240] sm:$0xff] }
  0xd2   :  { %v1365_v14 = vmul.f32 0.06666667, %v2335_v9  ;;  %v2342_v15 = vor.u32 %v2341_v62, %v2340_v6  ;;  %v2352_v16 = vand.u32 2147483647, %v856_v7  ;;  %v2354_v17 = vcvt.f32.s32 %v856_v7 }
  0xd3   :  { %vm4348_vm0 = vcmp.lt.f32.partialorder %v2344_v3, 8388608.0  ;;  %v2348_v19 = vand.u32 2147483647, %v2347_v10  ;;  %v857_v20 = vmul.f32 15.0, %v601_v8  ;;  %v602_v21 = vmin.f32 %v346_v12, 1.0 }
  0xd4   :  { %1621 = vst [vmem:[#allocation5 + $0x1f0] sm:$0xff] %v1365_v14  ;;  %v2343_v22 = vsel %vm4342_vm15, %v2342_v15, %v854_v46  ;;  %v2355_v23 = vcvt.s32.f32 %v2354_v17  ;;  %v2357_v24 = vand.u32 2147483648, %v856_v7  ;;  %v347_v29 = vmax.f32 %v91_v13, 0.0  ;;  %v96_v14 = vld [vmem:[#allocation2 + $0x248] sm:$0xff] }
  0xd5   :  { %v1366_v30 = vmul.f32 0.06666667, %v2343_v22  ;;  %v2350_v31 = vor.u32 %v2349_v11, %v2348_v19  ;;  %v2360_v25 = vand.u32 2147483647, %v857_v20  ;;  %v2362_v32 = vcvt.f32.s32 %v857_v20 }
  0xd6   :  { %vm4354_vm1 = vcmp.lt.f32.partialorder %v2352_v16, 8388608.0  ;;  %v2356_v34 = vand.u32 2147483647, %v2355_v23  ;;  %v858_v26 = vmul.f32 15.0, %v602_v21  ;;  %v603_v35 = vmin.f32 %v347_v29, 1.0 }
  0xd7   :  { %1622 = vst [vmem:[#allocation5 + $0x1f8] sm:$0xff] %v1366_v30  ;;  %v2351_v36 = vsel %vm4348_vm0, %v2350_v31, %v855_v58  ;;  %v2363_v37 = vcvt.s32.f32 %v2362_v32  ;;  %v2365_v38 = vand.u32 2147483648, %v857_v20  ;;  %v348_v39 = vmax.f32 %v92_v28, 0.0  ;;  %v97_v30 = vld [vmem:[#allocation2 + $0x250] sm:$0xff] }
  0xd8   :  { %v1367_v41 = vmul.f32 0.06666667, %v2351_v36  ;;  %v2358_v42 = vor.u32 %v2357_v24, %v2356_v34  ;;  %v2368_v43 = vand.u32 2147483647, %v858_v26  ;;  %v2370_v44 = vcvt.f32.s32 %v858_v26 }
  0xd9   :  { %vm4360_vm2 = vcmp.lt.f32.partialorder %v2360_v25, 8388608.0  ;;  %v2364_v46 = vand.u32 2147483647, %v2363_v37  ;;  %v859_v47 = vmul.f32 15.0, %v603_v35  ;;  %v604_v48 = vmin.f32 %v348_v39, 1.0 }
  0xda   :  { %1623 = vst [vmem:[#allocation5 + $0x200] sm:$0xff] %v1367_v41  ;;  %v2359_v50 = vsel %vm4354_vm1, %v2358_v42, %v856_v7  ;;  %v2371_v51 = vcvt.s32.f32 %v2370_v44  ;;  %v2373_v52 = vand.u32 2147483648, %v858_v26  ;;  %v349_v49 = vmax.f32 %v93_v40, 0.0  ;;  %v98_v41 = vld [vmem:[#allocation2 + $0x258] sm:$0xff] }
  0xdb   :  { %v1368_v53 = vmul.f32 0.06666667, %v2359_v50  ;;  %v2366_v54 = vor.u32 %v2365_v38, %v2364_v46  ;;  %v2376_v55 = vand.u32 2147483647, %v859_v47  ;;  %v2378_v56 = vcvt.f32.s32 %v859_v47 }
  0xdc   :  { %vm4366_vm3 = vcmp.lt.f32.partialorder %v2368_v43, 8388608.0  ;;  %v2372_v58 = vand.u32 2147483647, %v2371_v51  ;;  %v860_v59 = vmul.f32 15.0, %v604_v48  ;;  %v605_v60 = vmin.f32 %v349_v49, 1.0 }
  0xdd   :  { %1624 = vst [vmem:[#allocation5 + $0x208] sm:$0xff] %v1368_v53  ;;  %v2367_v61 = vsel %vm4360_vm2, %v2366_v54, %v857_v20  ;;  %v2379_v62 = vcvt.s32.f32 %v2378_v56  ;;  %v2381_v63 = vand.u32 2147483648, %v859_v47  ;;  %v350_v0 = vmax.f32 %v94_v27, 0.0  ;;  %v99_v53 = vld [vmem:[#allocation2 + $0x260] sm:$0xff] }
  0xde   :  { %v1369_v2 = vmul.f32 0.06666667, %v2367_v61  ;;  %v2374_v3 = vor.u32 %v2373_v52, %v2372_v58  ;;  %v2384_v4 = vand.u32 2147483647, %v860_v59  ;;  %v2386_v5 = vcvt.f32.s32 %v860_v59 }
  0xdf   :  { %vm4372_vm4 = vcmp.lt.f32.partialorder %v2376_v55, 8388608.0  ;;  %v2380_v7 = vand.u32 2147483647, %v2379_v62  ;;  %v861_v8 = vmul.f32 15.0, %v605_v60  ;;  %v606_v9 = vmin.f32 %v350_v0, 1.0 }
  0xe0   :  { %1625 = vst [vmem:[#allocation5 + $0x210] sm:$0xff] %v1369_v2  ;;  %v2375_v10 = vsel %vm4366_vm3, %v2374_v3, %v858_v26  ;;  %v2387_v11 = vcvt.s32.f32 %v2386_v5  ;;  %v2389_v12 = vand.u32 2147483648, %v860_v59  ;;  %v351_v13 = vmax.f32 %v95_v1, 0.0  ;;  %v100_v2 = vld [vmem:[#allocation2 + $0x268] sm:$0xff] }
  0xe1   :  { %v1370_v15 = vmul.f32 0.06666667, %v2375_v10  ;;  %v2382_v16 = vor.u32 %v2381_v63, %v2380_v7  ;;  %v2392_v17 = vand.u32 2147483647, %v861_v8  ;;  %v2394_v18 = vcvt.f32.s32 %v861_v8 }
  0xe2   :  { %vm4378_vm5 = vcmp.lt.f32.partialorder %v2384_v4, 8388608.0  ;;  %v2388_v20 = vand.u32 2147483647, %v2387_v11  ;;  %v862_v21 = vmul.f32 15.0, %v606_v9  ;;  %v607_v22 = vmin.f32 %v351_v13, 1.0 }
  0xe3   :  { %1626 = vst [vmem:[#allocation5 + $0x218] sm:$0xff] %v1370_v15  ;;  %v2383_v23 = vsel %vm4372_vm4, %v2382_v16, %v859_v47  ;;  %v2395_v24 = vcvt.s32.f32 %v2394_v18  ;;  %v2397_v29 = vand.u32 2147483648, %v861_v8  ;;  %v352_v28 = vmax.f32 %v96_v14, 0.0  ;;  %v101_v15 = vld [vmem:[#allocation2 + $0x270] sm:$0xff] }
  0xe4   :  { %v1371_v31 = vmul.f32 0.06666667, %v2383_v23  ;;  %v2390_v25 = vor.u32 %v2389_v12, %v2388_v20  ;;  %v2400_v32 = vand.u32 2147483647, %v862_v21  ;;  %v2402_v33 = vcvt.f32.s32 %v862_v21 }
  0xe5   :  { %vm4384_vm6 = vcmp.lt.f32.partialorder %v2392_v17, 8388608.0  ;;  %v2396_v26 = vand.u32 2147483647, %v2395_v24  ;;  %v863_v35 = vmul.f32 15.0, %v607_v22  ;;  %v608_v36 = vmin.f32 %v352_v28, 1.0 }
  0xe6   :  { %1627 = vst [vmem:[#allocation5 + $0x220] sm:$0xff] %v1371_v31  ;;  %v2391_v37 = vsel %vm4378_vm5, %v2390_v25, %v860_v59  ;;  %v2403_v38 = vcvt.s32.f32 %v2402_v33  ;;  %v2405_v39 = vand.u32 2147483648, %v862_v21  ;;  %v353_v40 = vmax.f32 %v97_v30, 0.0  ;;  %v102_v31 = vld [vmem:[#allocation2 + $0x278] sm:$0xff] }
  0xe7   :  { %v1372_v42 = vmul.f32 0.06666667, %v2391_v37  ;;  %v2398_v43 = vor.u32 %v2397_v29, %v2396_v26  ;;  %v2408_v44 = vand.u32 2147483647, %v863_v35  ;;  %v2410_v45 = vcvt.f32.s32 %v863_v35 }
  0xe8   :  { %vm4390_vm7 = vcmp.lt.f32.partialorder %v2400_v32, 8388608.0  ;;  %v2404_v47 = vand.u32 2147483647, %v2403_v38  ;;  %v864_v48 = vmul.f32 15.0, %v608_v36  ;;  %v609_v50 = vmin.f32 %v353_v40, 1.0 }
  0xe9   :  { %1628 = vst [vmem:[#allocation5 + $0x228] sm:$0xff] %v1372_v42  ;;  %v2399_v51 = vsel %vm4384_vm6, %v2398_v43, %v861_v8  ;;  %v2411_v52 = vcvt.s32.f32 %v2410_v45  ;;  %v2413_v49 = vand.u32 2147483648, %v863_v35  ;;  %v354_v27 = vmax.f32 %v98_v41, 0.0  ;;  %v103_v42 = vld [vmem:[#allocation2 + $0x280] sm:$0xff] }
  0xea   :  { %v1373_v54 = vmul.f32 0.06666667, %v2399_v51  ;;  %v2406_v55 = vor.u32 %v2405_v39, %v2404_v47  ;;  %v2416_v56 = vand.u32 2147483647, %v864_v48  ;;  %v2418_v57 = vcvt.f32.s32 %v864_v48 }
  0xeb   :  { %vm4396_vm8 = vcmp.lt.f32.partialorder %v2408_v44, 8388608.0  ;;  %v2412_v59 = vand.u32 2147483647, %v2411_v52  ;;  %v865_v60 = vmul.f32 15.0, %v609_v50  ;;  %v610_v61 = vmin.f32 %v354_v27, 1.0 }
  0xec   :  { %1629 = vst [vmem:[#allocation5 + $0x230] sm:$0xff] %v1373_v54  ;;  %v2407_v62 = vsel %vm4390_vm7, %v2406_v55, %v862_v21  ;;  %v2419_v63 = vcvt.s32.f32 %v2418_v57  ;;  %v2421_v0 = vand.u32 2147483648, %v864_v48  ;;  %v355_v1 = vmax.f32 %v99_v53, 0.0  ;;  %v104_v54 = vld [vmem:[#allocation2 + $0x288] sm:$0xff] }
  0xed   :  { %v1374_v3 = vmul.f32 0.06666667, %v2407_v62  ;;  %v2414_v4 = vor.u32 %v2413_v49, %v2412_v59  ;;  %v2424_v5 = vand.u32 2147483647, %v865_v60  ;;  %v2426_v6 = vcvt.f32.s32 %v865_v60 }
  0xee   :  { %vm4402_vm9 = vcmp.lt.f32.partialorder %v2416_v56, 8388608.0  ;;  %v2420_v8 = vand.u32 2147483647, %v2419_v63  ;;  %v866_v9 = vmul.f32 15.0, %v610_v61  ;;  %v611_v10 = vmin.f32 %v355_v1, 1.0 }
  0xef   :  { %1630 = vst [vmem:[#allocation5 + $0x238] sm:$0xff] %v1374_v3  ;;  %v2415_v11 = vsel %vm4396_vm8, %v2414_v4, %v863_v35  ;;  %v2427_v12 = vcvt.s32.f32 %v2426_v6  ;;  %v2429_v13 = vand.u32 2147483648, %v865_v60  ;;  %v356_v14 = vmax.f32 %v100_v2, 0.0  ;;  %v105_v3 = vld [vmem:[#allocation2 + $0x290] sm:$0xff] }
  0xf0   :  { %v1375_v16 = vmul.f32 0.06666667, %v2415_v11  ;;  %v2422_v17 = vor.u32 %v2421_v0, %v2420_v8  ;;  %v2432_v18 = vand.u32 2147483647, %v866_v9  ;;  %v2434_v19 = vcvt.f32.s32 %v866_v9 }
  0xf1   :  { %vm4408_vm10 = vcmp.lt.f32.partialorder %v2424_v5, 8388608.0  ;;  %v2428_v21 = vand.u32 2147483647, %v2427_v12  ;;  %v867_v22 = vmul.f32 15.0, %v611_v10  ;;  %v612_v23 = vmin.f32 %v356_v14, 1.0 }
  0xf2   :  { %1631 = vst [vmem:[#allocation5 + $0x240] sm:$0xff] %v1375_v16  ;;  %v2423_v24 = vsel %vm4402_vm9, %v2422_v17, %v864_v48  ;;  %v2435_v29 = vcvt.s32.f32 %v2434_v19  ;;  %v2437_v28 = vand.u32 2147483648, %v866_v9  ;;  %v357_v30 = vmax.f32 %v101_v15, 0.0  ;;  %v106_v16 = vld [vmem:[#allocation2 + $0x298] sm:$0xff] }
  0xf3   :  { %v1376_v25 = vmul.f32 0.06666667, %v2423_v24  ;;  %v2430_v32 = vor.u32 %v2429_v13, %v2428_v21  ;;  %v2440_v33 = vand.u32 2147483647, %v867_v22  ;;  %v2442_v34 = vcvt.f32.s32 %v867_v22 }
  0xf4   :  { %vm4414_vm11 = vcmp.lt.f32.partialorder %v2432_v18, 8388608.0  ;;  %v2436_v35 = vand.u32 2147483647, %v2435_v29  ;;  %v868_v36 = vmul.f32 15.0, %v612_v23  ;;  %v613_v37 = vmin.f32 %v357_v30, 1.0 }
  0xf5   :  { %1632 = vst [vmem:[#allocation5 + $0x248] sm:$0xff] %v1376_v25  ;;  %v2431_v38 = vsel %vm4408_vm10, %v2430_v32, %v865_v60  ;;  %v2443_v39 = vcvt.s32.f32 %v2442_v34  ;;  %v2445_v40 = vand.u32 2147483648, %v867_v22  ;;  %v358_v41 = vmax.f32 %v102_v31, 0.0  ;;  %v107_v25 = vld [vmem:[#allocation2 + $0x2a0] sm:$0xff] }
  0xf6   :  { %v1377_v43 = vmul.f32 0.06666667, %v2431_v38  ;;  %v2438_v44 = vor.u32 %v2437_v28, %v2436_v35  ;;  %v2448_v45 = vand.u32 2147483647, %v868_v36  ;;  %v2450_v46 = vcvt.f32.s32 %v868_v36 }
  0xf7   :  { %vm4420_vm12 = vcmp.lt.f32.partialorder %v2440_v33, 8388608.0  ;;  %v2444_v48 = vand.u32 2147483647, %v2443_v39  ;;  %v869_v50 = vmul.f32 15.0, %v613_v37  ;;  %v614_v51 = vmin.f32 %v358_v41, 1.0 }
  0xf8   :  { %1633 = vst [vmem:[#allocation5 + $0x250] sm:$0xff] %v1377_v43  ;;  %v2439_v52 = vsel %vm4414_vm11, %v2438_v44, %v866_v9  ;;  %v2451_v49 = vcvt.s32.f32 %v2450_v46  ;;  %v2453_v27 = vand.u32 2147483648, %v868_v36  ;;  %v359_v53 = vmax.f32 %v103_v42, 0.0  ;;  %v108_v43 = vld [vmem:[#allocation2 + $0x2a8] sm:$0xff] }
  0xf9   :  { %v1378_v55 = vmul.f32 0.06666667, %v2439_v52  ;;  %v2446_v56 = vor.u32 %v2445_v40, %v2444_v48  ;;  %v2456_v57 = vand.u32 2147483647, %v869_v50  ;;  %v2458_v58 = vcvt.f32.s32 %v869_v50 }
  0xfa   :  { %vm4426_vm13 = vcmp.lt.f32.partialorder %v2448_v45, 8388608.0  ;;  %v2452_v60 = vand.u32 2147483647, %v2451_v49  ;;  %v870_v61 = vmul.f32 15.0, %v614_v51  ;;  %v615_v62 = vmin.f32 %v359_v53, 1.0 }
  0xfb   :  { %1634 = vst [vmem:[#allocation5 + $0x258] sm:$0xff] %v1378_v55  ;;  %v2447_v63 = vsel %vm4420_vm12, %v2446_v56, %v867_v22  ;;  %v2459_v0 = vcvt.s32.f32 %v2458_v58  ;;  %v2461_v1 = vand.u32 2147483648, %v869_v50  ;;  %v360_v2 = vmax.f32 %v104_v54, 0.0  ;;  %v109_v55 = vld [vmem:[#allocation2 + $0x2b0] sm:$0xff] }
  0xfc   :  { %v1379_v4 = vmul.f32 0.06666667, %v2447_v63  ;;  %v2454_v5 = vor.u32 %v2453_v27, %v2452_v60  ;;  %v2464_v6 = vand.u32 2147483647, %v870_v61  ;;  %v2466_v7 = vcvt.f32.s32 %v870_v61 }
  0xfd   :  { %vm4432_vm14 = vcmp.lt.f32.partialorder %v2456_v57, 8388608.0  ;;  %v2460_v9 = vand.u32 2147483647, %v2459_v0  ;;  %v871_v10 = vmul.f32 15.0, %v615_v62  ;;  %v616_v11 = vmin.f32 %v360_v2, 1.0 }
  0xfe   :  { %1635 = vst [vmem:[#allocation5 + $0x260] sm:$0xff] %v1379_v4  ;;  %v2455_v12 = vsel %vm4426_vm13, %v2454_v5, %v868_v36  ;;  %v2467_v13 = vcvt.s32.f32 %v2466_v7  ;;  %v2469_v14 = vand.u32 2147483648, %v870_v61  ;;  %v361_v15 = vmax.f32 %v105_v3, 0.0  ;;  %v110_v4 = vld [vmem:[#allocation2 + $0x2b8] sm:$0xff] }
  0xff   :  { %v1380_v17 = vmul.f32 0.06666667, %v2455_v12  ;;  %v2462_v18 = vor.u32 %v2461_v1, %v2460_v9  ;;  %v2472_v19 = vand.u32 2147483647, %v871_v10  ;;  %v2474_v20 = vcvt.f32.s32 %v871_v10 }
 0x100   :  { %vm4438_vm15 = vcmp.lt.f32.partialorder %v2464_v6, 8388608.0  ;;  %v2468_v22 = vand.u32 2147483647, %v2467_v13  ;;  %v872_v23 = vmul.f32 15.0, %v616_v11  ;;  %v617_v24 = vmin.f32 %v361_v15, 1.0 }
 0x101   :  { %1636 = vst [vmem:[#allocation5 + $0x268] sm:$0xff] %v1380_v17  ;;  %v2463_v29 = vsel %vm4432_vm14, %v2462_v18, %v869_v50  ;;  %v2475_v28 = vcvt.s32.f32 %v2474_v20  ;;  %v2477_v30 = vand.u32 2147483648, %v871_v10  ;;  %v362_v31 = vmax.f32 %v106_v16, 0.0  ;;  %v111_v17 = vld [vmem:[#allocation2 + $0x2c0] sm:$0xff] }
 0x102   :  { %v1381_v32 = vmul.f32 0.06666667, %v2463_v29  ;;  %v2470_v33 = vor.u32 %v2469_v14, %v2468_v22  ;;  %v2480_v34 = vand.u32 2147483647, %v872_v23  ;;  %v2482_v26 = vcvt.f32.s32 %v872_v23 }
 0x103   :  { %vm4444_vm0 = vcmp.lt.f32.partialorder %v2472_v19, 8388608.0  ;;  %v2476_v36 = vand.u32 2147483647, %v2475_v28  ;;  %v873_v37 = vmul.f32 15.0, %v617_v24  ;;  %v618_v38 = vmin.f32 %v362_v31, 1.0 }
 0x104   :  { %1637 = vst [vmem:[#allocation5 + $0x270] sm:$0xff] %v1381_v32  ;;  %v2471_v39 = vsel %vm4438_vm15, %v2470_v33, %v870_v61  ;;  %v2483_v40 = vcvt.s32.f32 %v2482_v26  ;;  %v2485_v41 = vand.u32 2147483648, %v872_v23  ;;  %v363_v42 = vmax.f32 %v107_v25, 0.0  ;;  %v112_v32 = vld [vmem:[#allocation2 + $0x2c8] sm:$0xff] }
 0x105   :  { %v1382_v44 = vmul.f32 0.06666667, %v2471_v39  ;;  %v2478_v45 = vor.u32 %v2477_v30, %v2476_v36  ;;  %v2488_v46 = vand.u32 2147483647, %v873_v37  ;;  %v2490_v47 = vcvt.f32.s32 %v873_v37 }
 0x106   :  { %vm4450_vm1 = vcmp.lt.f32.partialorder %v2480_v34, 8388608.0  ;;  %v2484_v50 = vand.u32 2147483647, %v2483_v40  ;;  %v874_v51 = vmul.f32 15.0, %v618_v38  ;;  %v619_v52 = vmin.f32 %v363_v42, 1.0 }
 0x107   :  { %1638 = vst [vmem:[#allocation5 + $0x278] sm:$0xff] %v1382_v44  ;;  %v2479_v49 = vsel %vm4444_vm0, %v2478_v45, %v871_v10  ;;  %v2491_v27 = vcvt.s32.f32 %v2490_v47  ;;  %v2493_v53 = vand.u32 2147483648, %v873_v37  ;;  %v364_v54 = vmax.f32 %v108_v43, 0.0  ;;  %v113_v44 = vld [vmem:[#allocation2 + $0x2d0] sm:$0xff] }
 0x108   :  { %v1383_v56 = vmul.f32 0.06666667, %v2479_v49  ;;  %v2486_v57 = vor.u32 %v2485_v41, %v2484_v50  ;;  %v2496_v58 = vand.u32 2147483647, %v874_v51  ;;  %v2498_v59 = vcvt.f32.s32 %v874_v51 }
 0x109   :  { %vm4456_vm2 = vcmp.lt.f32.partialorder %v2488_v46, 8388608.0  ;;  %v2492_v61 = vand.u32 2147483647, %v2491_v27  ;;  %v875_v62 = vmul.f32 15.0, %v619_v52  ;;  %v620_v63 = vmin.f32 %v364_v54, 1.0 }
 0x10a   :  { %1639 = vst [vmem:[#allocation5 + $0x280] sm:$0xff] %v1383_v56  ;;  %v2487_v0 = vsel %vm4450_vm1, %v2486_v57, %v872_v23  ;;  %v2499_v1 = vcvt.s32.f32 %v2498_v59  ;;  %v2501_v2 = vand.u32 2147483648, %v874_v51  ;;  %v365_v3 = vmax.f32 %v109_v55, 0.0  ;;  %v114_v56 = vld [vmem:[#allocation2 + $0x2d8] sm:$0xff] }
 0x10b   :  { %v1384_v5 = vmul.f32 0.06666667, %v2487_v0  ;;  %v2494_v6 = vor.u32 %v2493_v53, %v2492_v61  ;;  %v2504_v7 = vand.u32 2147483647, %v875_v62  ;;  %v2506_v8 = vcvt.f32.s32 %v875_v62 }
 0x10c   :  { %vm4462_vm3 = vcmp.lt.f32.partialorder %v2496_v58, 8388608.0  ;;  %v2500_v10 = vand.u32 2147483647, %v2499_v1  ;;  %v876_v11 = vmul.f32 15.0, %v620_v63  ;;  %v621_v12 = vmin.f32 %v365_v3, 1.0 }
 0x10d   :  { %1640 = vst [vmem:[#allocation5 + $0x288] sm:$0xff] %v1384_v5  ;;  %v2495_v13 = vsel %vm4456_vm2, %v2494_v6, %v873_v37  ;;  %v2507_v14 = vcvt.s32.f32 %v2506_v8  ;;  %v2509_v15 = vand.u32 2147483648, %v875_v62  ;;  %v366_v16 = vmax.f32 %v110_v4, 0.0  ;;  %v115_v5 = vld [vmem:[#allocation2 + $0x2e0] sm:$0xff] }
 0x10e   :  { %v1385_v18 = vmul.f32 0.06666667, %v2495_v13  ;;  %v2502_v19 = vor.u32 %v2501_v2, %v2500_v10  ;;  %v2512_v20 = vand.u32 2147483647, %v876_v11  ;;  %v2514_v21 = vcvt.f32.s32 %v876_v11 }
 0x10f   :  { %vm4468_vm4 = vcmp.lt.f32.partialorder %v2504_v7, 8388608.0  ;;  %v2508_v23 = vand.u32 2147483647, %v2507_v14  ;;  %v877_v24 = vmul.f32 15.0, %v621_v12  ;;  %v622_v29 = vmin.f32 %v366_v16, 1.0 }
 0x110   :  { %1641 = vst [vmem:[#allocation5 + $0x290] sm:$0xff] %v1385_v18  ;;  %v2503_v28 = vsel %vm4462_vm3, %v2502_v19, %v874_v51  ;;  %v2515_v30 = vcvt.s32.f32 %v2514_v21  ;;  %v2517_v31 = vand.u32 2147483648, %v876_v11  ;;  %v367_v25 = vmax.f32 %v111_v17, 0.0  ;;  %v116_v18 = vld [vmem:[#allocation2 + $0x2e8] sm:$0xff] }
 0x111   :  { %v1386_v33 = vmul.f32 0.06666667, %v2503_v28  ;;  %v2510_v34 = vor.u32 %v2509_v15, %v2508_v23  ;;  %v2520_v26 = vand.u32 2147483647, %v877_v24  ;;  %v2522_v35 = vcvt.f32.s32 %v877_v24 }
 0x112   :  { %vm4474_vm5 = vcmp.lt.f32.partialorder %v2512_v20, 8388608.0  ;;  %v2516_v37 = vand.u32 2147483647, %v2515_v30  ;;  %v878_v38 = vmul.f32 15.0, %v622_v29  ;;  %v623_v39 = vmin.f32 %v367_v25, 1.0 }
 0x113   :  { %1642 = vst [vmem:[#allocation5 + $0x298] sm:$0xff] %v1386_v33  ;;  %v2511_v40 = vsel %vm4468_vm4, %v2510_v34, %v875_v62  ;;  %v2523_v41 = vcvt.s32.f32 %v2522_v35  ;;  %v2525_v42 = vand.u32 2147483648, %v877_v24  ;;  %v368_v43 = vmax.f32 %v112_v32, 0.0  ;;  %v117_v33 = vld [vmem:[#allocation2 + $0x2f0] sm:$0xff] }
 0x114   :  { %v1387_v45 = vmul.f32 0.06666667, %v2511_v40  ;;  %v2518_v46 = vor.u32 %v2517_v31, %v2516_v37  ;;  %v2528_v47 = vand.u32 2147483647, %v878_v38  ;;  %v2530_v48 = vcvt.f32.s32 %v878_v38 }
 0x115   :  { %vm4480_vm6 = vcmp.lt.f32.partialorder %v2520_v26, 8388608.0  ;;  %v2524_v51 = vand.u32 2147483647, %v2523_v41  ;;  %v879_v52 = vmul.f32 15.0, %v623_v39  ;;  %v624_v49 = vmin.f32 %v368_v43, 1.0 }
 0x116   :  { %1643 = vst [vmem:[#allocation5 + $0x2a0] sm:$0xff] %v1387_v45  ;;  %v2519_v27 = vsel %vm4474_vm5, %v2518_v46, %v876_v11  ;;  %v2531_v53 = vcvt.s32.f32 %v2530_v48  ;;  %v2533_v54 = vand.u32 2147483648, %v878_v38  ;;  %v369_v55 = vmax.f32 %v113_v44, 0.0  ;;  %v118_v45 = vld [vmem:[#allocation2 + $0x2f8] sm:$0xff] }
 0x117   :  { %v1388_v57 = vmul.f32 0.06666667, %v2519_v27  ;;  %v2526_v58 = vor.u32 %v2525_v42, %v2524_v51  ;;  %v2536_v59 = vand.u32 2147483647, %v879_v52  ;;  %v2538_v60 = vcvt.f32.s32 %v879_v52 }
 0x118   :  { %vm4486_vm7 = vcmp.lt.f32.partialorder %v2528_v47, 8388608.0  ;;  %v2532_v62 = vand.u32 2147483647, %v2531_v53  ;;  %v880_v63 = vmul.f32 15.0, %v624_v49  ;;  %v625_v0 = vmin.f32 %v369_v55, 1.0 }
 0x119   :  { %1644 = vst [vmem:[#allocation5 + $0x2a8] sm:$0xff] %v1388_v57  ;;  %v2527_v1 = vsel %vm4480_vm6, %v2526_v58, %v877_v24  ;;  %v2539_v2 = vcvt.s32.f32 %v2538_v60  ;;  %v2541_v3 = vand.u32 2147483648, %v879_v52  ;;  %v370_v4 = vmax.f32 %v114_v56, 0.0  ;;  %v119_v57 = vld [vmem:[#allocation2 + $0x300] sm:$0xff] }
 0x11a   :  { %v1389_v6 = vmul.f32 0.06666667, %v2527_v1  ;;  %v2534_v7 = vor.u32 %v2533_v54, %v2532_v62  ;;  %v2544_v8 = vand.u32 2147483647, %v880_v63  ;;  %v2546_v9 = vcvt.f32.s32 %v880_v63 }
 0x11b   :  { %vm4492_vm8 = vcmp.lt.f32.partialorder %v2536_v59, 8388608.0  ;;  %v2540_v11 = vand.u32 2147483647, %v2539_v2  ;;  %v881_v12 = vmul.f32 15.0, %v625_v0  ;;  %v626_v13 = vmin.f32 %v370_v4, 1.0 }
 0x11c   :  { %1645 = vst [vmem:[#allocation5 + $0x2b0] sm:$0xff] %v1389_v6  ;;  %v2535_v14 = vsel %vm4486_vm7, %v2534_v7, %v878_v38  ;;  %v2547_v15 = vcvt.s32.f32 %v2546_v9  ;;  %v2549_v16 = vand.u32 2147483648, %v880_v63  ;;  %v371_v17 = vmax.f32 %v115_v5, 0.0  ;;  %v120_v6 = vld [vmem:[#allocation2 + $0x308] sm:$0xff] }
 0x11d   :  { %v1390_v19 = vmul.f32 0.06666667, %v2535_v14  ;;  %v2542_v20 = vor.u32 %v2541_v3, %v2540_v11  ;;  %v2552_v21 = vand.u32 2147483647, %v881_v12  ;;  %v2554_v22 = vcvt.f32.s32 %v881_v12 }
 0x11e   :  { %vm4498_vm9 = vcmp.lt.f32.partialorder %v2544_v8, 8388608.0  ;;  %v2548_v24 = vand.u32 2147483647, %v2547_v15  ;;  %v882_v29 = vmul.f32 15.0, %v626_v13  ;;  %v627_v28 = vmin.f32 %v371_v17, 1.0 }
 0x11f   :  { %1646 = vst [vmem:[#allocation5 + $0x2b8] sm:$0xff] %v1390_v19  ;;  %v2543_v30 = vsel %vm4492_vm8, %v2542_v20, %v879_v52  ;;  %v2555_v31 = vcvt.s32.f32 %v2554_v22  ;;  %v2557_v25 = vand.u32 2147483648, %v881_v12  ;;  %v372_v32 = vmax.f32 %v116_v18, 0.0  ;;  %v121_v19 = vld [vmem:[#allocation2 + $0x310] sm:$0xff] }
 0x120   :  { %v1391_v34 = vmul.f32 0.06666667, %v2543_v30  ;;  %v2550_v26 = vor.u32 %v2549_v16, %v2548_v24  ;;  %v2560_v35 = vand.u32 2147483647, %v882_v29  ;;  %v2562_v36 = vcvt.f32.s32 %v882_v29 }
 0x121   :  { %vm4504_vm10 = vcmp.lt.f32.partialorder %v2552_v21, 8388608.0  ;;  %v2556_v38 = vand.u32 2147483647, %v2555_v31  ;;  %v883_v39 = vmul.f32 15.0, %v627_v28  ;;  %v628_v40 = vmin.f32 %v372_v32, 1.0 }
 0x122   :  { %1647 = vst [vmem:[#allocation5 + $0x2c0] sm:$0xff] %v1391_v34  ;;  %v2551_v41 = vsel %vm4498_vm9, %v2550_v26, %v880_v63  ;;  %v2563_v42 = vcvt.s32.f32 %v2562_v36  ;;  %v2565_v43 = vand.u32 2147483648, %v882_v29  ;;  %v373_v44 = vmax.f32 %v117_v33, 0.0  ;;  %v122_v34 = vld [vmem:[#allocation2 + $0x318] sm:$0xff] }
 0x123   :  { %v1392_v46 = vmul.f32 0.06666667, %v2551_v41  ;;  %v2558_v47 = vor.u32 %v2557_v25, %v2556_v38  ;;  %v2568_v48 = vand.u32 2147483647, %v883_v39  ;;  %v2570_v50 = vcvt.f32.s32 %v883_v39 }
 0x124   :  { %vm4510_vm11 = vcmp.lt.f32.partialorder %v2560_v35, 8388608.0  ;;  %v2564_v52 = vand.u32 2147483647, %v2563_v42  ;;  %v884_v49 = vmul.f32 15.0, %v628_v40  ;;  %v629_v27 = vmin.f32 %v373_v44, 1.0 }
 0x125   :  { %1648 = vst [vmem:[#allocation5 + $0x2c8] sm:$0xff] %v1392_v46  ;;  %v2559_v53 = vsel %vm4504_vm10, %v2558_v47, %v881_v12  ;;  %v2571_v54 = vcvt.s32.f32 %v2570_v50  ;;  %v2573_v55 = vand.u32 2147483648, %v883_v39  ;;  %v374_v56 = vmax.f32 %v118_v45, 0.0  ;;  %v123_v46 = vld [vmem:[#allocation2 + $0x320] sm:$0xff] }
 0x126   :  { %v1393_v58 = vmul.f32 0.06666667, %v2559_v53  ;;  %v2566_v59 = vor.u32 %v2565_v43, %v2564_v52  ;;  %v2576_v60 = vand.u32 2147483647, %v884_v49  ;;  %v2578_v61 = vcvt.f32.s32 %v884_v49 }
 0x127   :  { %vm4516_vm12 = vcmp.lt.f32.partialorder %v2568_v48, 8388608.0  ;;  %v2572_v63 = vand.u32 2147483647, %v2571_v54  ;;  %v885_v0 = vmul.f32 15.0, %v629_v27  ;;  %v630_v1 = vmin.f32 %v374_v56, 1.0 }
 0x128   :  { %1649 = vst [vmem:[#allocation5 + $0x2d0] sm:$0xff] %v1393_v58  ;;  %v2567_v2 = vsel %vm4510_vm11, %v2566_v59, %v882_v29  ;;  %v2579_v3 = vcvt.s32.f32 %v2578_v61  ;;  %v2581_v4 = vand.u32 2147483648, %v884_v49  ;;  %v375_v5 = vmax.f32 %v119_v57, 0.0  ;;  %v124_v58 = vld [vmem:[#allocation2 + $0x328] sm:$0xff] }
 0x129   :  { %v1394_v7 = vmul.f32 0.06666667, %v2567_v2  ;;  %v2574_v8 = vor.u32 %v2573_v55, %v2572_v63  ;;  %v2584_v9 = vand.u32 2147483647, %v885_v0  ;;  %v2586_v10 = vcvt.f32.s32 %v885_v0 }
 0x12a   :  { %vm4522_vm13 = vcmp.lt.f32.partialorder %v2576_v60, 8388608.0  ;;  %v2580_v12 = vand.u32 2147483647, %v2579_v3  ;;  %v886_v13 = vmul.f32 15.0, %v630_v1  ;;  %v631_v14 = vmin.f32 %v375_v5, 1.0 }
 0x12b   :  { %1650 = vst [vmem:[#allocation5 + $0x2d8] sm:$0xff] %v1394_v7  ;;  %v2575_v15 = vsel %vm4516_vm12, %v2574_v8, %v883_v39  ;;  %v2587_v16 = vcvt.s32.f32 %v2586_v10  ;;  %v2589_v17 = vand.u32 2147483648, %v885_v0  ;;  %v376_v18 = vmax.f32 %v120_v6, 0.0  ;;  %v125_v7 = vld [vmem:[#allocation2 + $0x330] sm:$0xff] }
 0x12c   :  { %v1395_v20 = vmul.f32 0.06666667, %v2575_v15  ;;  %v2582_v21 = vor.u32 %v2581_v4, %v2580_v12  ;;  %v2592_v22 = vand.u32 2147483647, %v886_v13  ;;  %v2594_v23 = vcvt.f32.s32 %v886_v13 }
 0x12d   :  { %vm4528_vm14 = vcmp.lt.f32.partialorder %v2584_v9, 8388608.0  ;;  %v2588_v29 = vand.u32 2147483647, %v2587_v16  ;;  %v887_v28 = vmul.f32 15.0, %v631_v14  ;;  %v632_v30 = vmin.f32 %v376_v18, 1.0 }
 0x12e   :  { %1651 = vst [vmem:[#allocation5 + $0x2e0] sm:$0xff] %v1395_v20  ;;  %v2583_v31 = vsel %vm4522_vm13, %v2582_v21, %v884_v49  ;;  %v2595_v25 = vcvt.s32.f32 %v2594_v23  ;;  %v2597_v32 = vand.u32 2147483648, %v886_v13  ;;  %v377_v33 = vmax.f32 %v121_v19, 0.0  ;;  %v126_v20 = vld [vmem:[#allocation2 + $0x338] sm:$0xff] }
 0x12f   :  { %v1396_v26 = vmul.f32 0.06666667, %v2583_v31  ;;  %v2590_v35 = vor.u32 %v2589_v17, %v2588_v29  ;;  %v2600_v36 = vand.u32 2147483647, %v887_v28  ;;  %v2602_v37 = vcvt.f32.s32 %v887_v28 }
 0x130   :  { %vm4534_vm15 = vcmp.lt.f32.partialorder %v2592_v22, 8388608.0  ;;  %v2596_v39 = vand.u32 2147483647, %v2595_v25  ;;  %v888_v40 = vmul.f32 15.0, %v632_v30  ;;  %v633_v41 = vmin.f32 %v377_v33, 1.0 }
 0x131   :  { %1652 = vst [vmem:[#allocation5 + $0x2e8] sm:$0xff] %v1396_v26  ;;  %v2591_v42 = vsel %vm4528_vm14, %v2590_v35, %v885_v0  ;;  %v2603_v43 = vcvt.s32.f32 %v2602_v37  ;;  %v2605_v44 = vand.u32 2147483648, %v887_v28  ;;  %v378_v45 = vmax.f32 %v122_v34, 0.0  ;;  %v127_v26 = vld [vmem:[#allocation2 + $0x340] sm:$0xff] }
 0x132   :  { %v1397_v47 = vmul.f32 0.06666667, %v2591_v42  ;;  %v2598_v48 = vor.u32 %v2597_v32, %v2596_v39  ;;  %v2608_v50 = vand.u32 2147483647, %v888_v40  ;;  %v2610_v51 = vcvt.f32.s32 %v888_v40 }
 0x133   :  { %vm4540_vm0 = vcmp.lt.f32.partialorder %v2600_v36, 8388608.0  ;;  %v2604_v49 = vand.u32 2147483647, %v2603_v43  ;;  %v889_v27 = vmul.f32 15.0, %v633_v41  ;;  %v634_v53 = vmin.f32 %v378_v45, 1.0 }
 0x134   :  { %1653 = vst [vmem:[#allocation5 + $0x2f0] sm:$0xff] %v1397_v47  ;;  %v2599_v54 = vsel %vm4534_vm15, %v2598_v48, %v886_v13  ;;  %v2611_v55 = vcvt.s32.f32 %v2610_v51  ;;  %v2613_v56 = vand.u32 2147483648, %v888_v40  ;;  %v379_v57 = vmax.f32 %v123_v46, 0.0  ;;  %v128_v47 = vld [vmem:[#allocation2 + $0x348] sm:$0xff] }
 0x135   :  { %v1398_v59 = vmul.f32 0.06666667, %v2599_v54  ;;  %v2606_v60 = vor.u32 %v2605_v44, %v2604_v49  ;;  %v2616_v61 = vand.u32 2147483647, %v889_v27  ;;  %v2618_v62 = vcvt.f32.s32 %v889_v27 }
 0x136   :  { %vm4546_vm1 = vcmp.lt.f32.partialorder %v2608_v50, 8388608.0  ;;  %v2612_v0 = vand.u32 2147483647, %v2611_v55  ;;  %v890_v1 = vmul.f32 15.0, %v634_v53  ;;  %v635_v2 = vmin.f32 %v379_v57, 1.0 }
 0x137   :  { %1654 = vst [vmem:[#allocation5 + $0x2f8] sm:$0xff] %v1398_v59  ;;  %v2607_v3 = vsel %vm4540_vm0, %v2606_v60, %v887_v28  ;;  %v2619_v4 = vcvt.s32.f32 %v2618_v62  ;;  %v2621_v5 = vand.u32 2147483648, %v889_v27  ;;  %v380_v6 = vmax.f32 %v124_v58, 0.0  ;;  %v129_v59 = vld [vmem:[#allocation2 + $0x350] sm:$0xff] }
 0x138   :  { %v1399_v8 = vmul.f32 0.06666667, %v2607_v3  ;;  %v2614_v9 = vor.u32 %v2613_v56, %v2612_v0  ;;  %v2624_v10 = vand.u32 2147483647, %v890_v1  ;;  %v2626_v11 = vcvt.f32.s32 %v890_v1 }
 0x139   :  { %vm4552_vm2 = vcmp.lt.f32.partialorder %v2616_v61, 8388608.0  ;;  %v2620_v13 = vand.u32 2147483647, %v2619_v4  ;;  %v891_v14 = vmul.f32 15.0, %v635_v2  ;;  %v636_v15 = vmin.f32 %v380_v6, 1.0 }
 0x13a   :  { %1655 = vst [vmem:[#allocation5 + $0x300] sm:$0xff] %v1399_v8  ;;  %v2615_v16 = vsel %vm4546_vm1, %v2614_v9, %v888_v40  ;;  %v2627_v17 = vcvt.s32.f32 %v2626_v11  ;;  %v2629_v18 = vand.u32 2147483648, %v890_v1  ;;  %v381_v19 = vmax.f32 %v125_v7, 0.0  ;;  %v130_v8 = vld [vmem:[#allocation2 + $0x358] sm:$0xff] }
 0x13b   :  { %v1400_v21 = vmul.f32 0.06666667, %v2615_v16  ;;  %v2622_v22 = vor.u32 %v2621_v5, %v2620_v13  ;;  %v2632_v23 = vand.u32 2147483647, %v891_v14  ;;  %v2634_v24 = vcvt.f32.s32 %v891_v14 }
 0x13c   :  { %vm4558_vm3 = vcmp.lt.f32.partialorder %v2624_v10, 8388608.0  ;;  %v2628_v28 = vand.u32 2147483647, %v2627_v17  ;;  %v892_v30 = vmul.f32 15.0, %v636_v15  ;;  %v637_v31 = vmin.f32 %v381_v19, 1.0 }
 0x13d   :  { %1656 = vst [vmem:[#allocation5 + $0x308] sm:$0xff] %v1400_v21  ;;  %v2623_v25 = vsel %vm4552_vm2, %v2622_v22, %v889_v27  ;;  %v2635_v32 = vcvt.s32.f32 %v2634_v24  ;;  %v2637_v33 = vand.u32 2147483648, %v891_v14  ;;  %v382_v34 = vmax.f32 %v126_v20, 0.0  ;;  %v131_v21 = vld [vmem:[#allocation2 + $0x360] sm:$0xff] }
 0x13e   :  { %v1401_v35 = vmul.f32 0.06666667, %v2623_v25  ;;  %v2630_v36 = vor.u32 %v2629_v18, %v2628_v28  ;;  %v2640_v37 = vand.u32 2147483647, %v892_v30  ;;  %v2642_v38 = vcvt.f32.s32 %v892_v30 }
 0x13f   :  { %vm4564_vm4 = vcmp.lt.f32.partialorder %v2632_v23, 8388608.0  ;;  %v2636_v40 = vand.u32 2147483647, %v2635_v32  ;;  %v893_v41 = vmul.f32 15.0, %v637_v31  ;;  %v638_v42 = vmin.f32 %v382_v34, 1.0 }
 0x140   :  { %1657 = vst [vmem:[#allocation5 + $0x310] sm:$0xff] %v1401_v35  ;;  %v2631_v43 = vsel %vm4558_vm3, %v2630_v36, %v890_v1  ;;  %v2643_v44 = vcvt.s32.f32 %v2642_v38  ;;  %v2645_v45 = vand.u32 2147483648, %v892_v30  ;;  %v383_v46 = vmax.f32 %v127_v26, 0.0  ;;  %v132_v35 = vld [vmem:[#allocation2 + $0x368] sm:$0xff] }
 0x141   :  { %v1402_v48 = vmul.f32 0.06666667, %v2631_v43  ;;  %v2638_v50 = vor.u32 %v2637_v33, %v2636_v40  ;;  %v2648_v51 = vand.u32 2147483647, %v893_v41  ;;  %v2650_v52 = vcvt.f32.s32 %v893_v41 }
 0x142   :  { %vm4570_vm5 = vcmp.lt.f32.partialorder %v2640_v37, 8388608.0  ;;  %v2644_v27 = vand.u32 2147483647, %v2643_v44  ;;  %v894_v53 = vmul.f32 15.0, %v638_v42  ;;  %v639_v54 = vmin.f32 %v383_v46, 1.0 }
 0x143   :  { %1658 = vst [vmem:[#allocation5 + $0x318] sm:$0xff] %v1402_v48  ;;  %v2639_v55 = vsel %vm4564_vm4, %v2638_v50, %v891_v14  ;;  %v2651_v56 = vcvt.s32.f32 %v2650_v52  ;;  %v2653_v57 = vand.u32 2147483648, %v893_v41  ;;  %v384_v58 = vmax.f32 %v128_v47, 0.0  ;;  %v133_v48 = vld [vmem:[#allocation2 + $0x370] sm:$0xff] }
 0x144   :  { %v1403_v60 = vmul.f32 0.06666667, %v2639_v55  ;;  %v2646_v61 = vor.u32 %v2645_v45, %v2644_v27  ;;  %v2656_v62 = vand.u32 2147483647, %v894_v53  ;;  %v2658_v63 = vcvt.f32.s32 %v894_v53 }
 0x145   :  { %vm4576_vm6 = vcmp.lt.f32.partialorder %v2648_v51, 8388608.0  ;;  %v2652_v1 = vand.u32 2147483647, %v2651_v56  ;;  %v895_v2 = vmul.f32 15.0, %v639_v54  ;;  %v640_v3 = vmin.f32 %v384_v58, 1.0 }
 0x146   :  { %1659 = vst [vmem:[#allocation5 + $0x320] sm:$0xff] %v1403_v60  ;;  %v2647_v4 = vsel %vm4570_vm5, %v2646_v61, %v892_v30  ;;  %v2659_v5 = vcvt.s32.f32 %v2658_v63  ;;  %v2661_v6 = vand.u32 2147483648, %v894_v53  ;;  %v385_v7 = vmax.f32 %v129_v59, 0.0  ;;  %v134_v60 = vld [vmem:[#allocation2 + $0x378] sm:$0xff] }
 0x147   :  { %v1404_v9 = vmul.f32 0.06666667, %v2647_v4  ;;  %v2654_v10 = vor.u32 %v2653_v57, %v2652_v1  ;;  %v2664_v11 = vand.u32 2147483647, %v895_v2  ;;  %v2666_v12 = vcvt.f32.s32 %v895_v2 }
 0x148   :  { %vm4582_vm7 = vcmp.lt.f32.partialorder %v2656_v62, 8388608.0  ;;  %v2660_v14 = vand.u32 2147483647, %v2659_v5  ;;  %v896_v15 = vmul.f32 15.0, %v640_v3  ;;  %v641_v16 = vmin.f32 %v385_v7, 1.0 }
 0x149   :  { %1660 = vst [vmem:[#allocation5 + $0x328] sm:$0xff] %v1404_v9  ;;  %v2655_v17 = vsel %vm4576_vm6, %v2654_v10, %v893_v41  ;;  %v2667_v18 = vcvt.s32.f32 %v2666_v12  ;;  %v2669_v19 = vand.u32 2147483648, %v895_v2  ;;  %v386_v20 = vmax.f32 %v130_v8, 0.0  ;;  %v135_v9 = vld [vmem:[#allocation2 + $0x380] sm:$0xff] }
 0x14a   :  { %v1405_v22 = vmul.f32 0.06666667, %v2655_v17  ;;  %v2662_v23 = vor.u32 %v2661_v6, %v2660_v14  ;;  %v2672_v24 = vand.u32 2147483647, %v896_v15  ;;  %v2674_v29 = vcvt.f32.s32 %v896_v15 }
 0x14b   :  { %vm4588_vm8 = vcmp.lt.f32.partialorder %v2664_v11, 8388608.0  ;;  %v2668_v30 = vand.u32 2147483647, %v2667_v18  ;;  %v897_v31 = vmul.f32 15.0, %v641_v16  ;;  %v642_v25 = vmin.f32 %v386_v20, 1.0 }
 0x14c   :  { %1661 = vst [vmem:[#allocation5 + $0x330] sm:$0xff] %v1405_v22  ;;  %v2663_v32 = vsel %vm4582_vm7, %v2662_v23, %v894_v53  ;;  %v2675_v33 = vcvt.s32.f32 %v2674_v29  ;;  %v2677_v34 = vand.u32 2147483648, %v896_v15  ;;  %v387_v26 = vmax.f32 %v131_v21, 0.0  ;;  %v136_v22 = vld [vmem:[#allocation2 + $0x388] sm:$0xff] }
 0x14d   :  { %v1406_v36 = vmul.f32 0.06666667, %v2663_v32  ;;  %v2670_v37 = vor.u32 %v2669_v19, %v2668_v30  ;;  %v2680_v38 = vand.u32 2147483647, %v897_v31  ;;  %v2682_v39 = vcvt.f32.s32 %v897_v31 }
 0x14e   :  { %vm4594_vm9 = vcmp.lt.f32.partialorder %v2672_v24, 8388608.0  ;;  %v2676_v41 = vand.u32 2147483647, %v2675_v33  ;;  %v898_v42 = vmul.f32 15.0, %v642_v25  ;;  %v643_v43 = vmin.f32 %v387_v26, 1.0 }
 0x14f   :  { %1662 = vst [vmem:[#allocation5 + $0x338] sm:$0xff] %v1406_v36  ;;  %v2671_v44 = vsel %vm4588_vm8, %v2670_v37, %v895_v2  ;;  %v2683_v45 = vcvt.s32.f32 %v2682_v39  ;;  %v2685_v46 = vand.u32 2147483648, %v897_v31  ;;  %v388_v47 = vmax.f32 %v132_v35, 0.0  ;;  %v137_v36 = vld [vmem:[#allocation2 + $0x390] sm:$0xff] }
 0x150   :  { %v1407_v50 = vmul.f32 0.06666667, %v2671_v44  ;;  %v2678_v51 = vor.u32 %v2677_v34, %v2676_v41  ;;  %v2688_v52 = vand.u32 2147483647, %v898_v42  ;;  %v2690_v49 = vcvt.f32.s32 %v898_v42 }
 0x151   :  { %vm4600_vm10 = vcmp.lt.f32.partialorder %v2680_v38, 8388608.0  ;;  %v2684_v53 = vand.u32 2147483647, %v2683_v45  ;;  %v899_v54 = vmul.f32 15.0, %v643_v43  ;;  %v644_v55 = vmin.f32 %v388_v47, 1.0 }
 0x152   :  { %1663 = vst [vmem:[#allocation5 + $0x340] sm:$0xff] %v1407_v50  ;;  %v2679_v56 = vsel %vm4594_vm9, %v2678_v51, %v896_v15  ;;  %v2691_v57 = vcvt.s32.f32 %v2690_v49  ;;  %v2693_v58 = vand.u32 2147483648, %v898_v42  ;;  %v389_v59 = vmax.f32 %v133_v48, 0.0  ;;  %v138_v50 = vld [vmem:[#allocation2 + $0x398] sm:$0xff] }
 0x153   :  { %v1408_v61 = vmul.f32 0.06666667, %v2679_v56  ;;  %v2686_v62 = vor.u32 %v2685_v46, %v2684_v53  ;;  %v2696_v63 = vand.u32 2147483647, %v899_v54  ;;  %v2698_v0 = vcvt.f32.s32 %v899_v54 }
 0x154   :  { %vm4606_vm11 = vcmp.lt.f32.partialorder %v2688_v52, 8388608.0  ;;  %v2692_v2 = vand.u32 2147483647, %v2691_v57  ;;  %v900_v3 = vmul.f32 15.0, %v644_v55  ;;  %v645_v4 = vmin.f32 %v389_v59, 1.0 }
 0x155   :  { %1664 = vst [vmem:[#allocation5 + $0x348] sm:$0xff] %v1408_v61  ;;  %v2687_v5 = vsel %vm4600_vm10, %v2686_v62, %v897_v31  ;;  %v2699_v6 = vcvt.s32.f32 %v2698_v0  ;;  %v2701_v7 = vand.u32 2147483648, %v899_v54  ;;  %v390_v8 = vmax.f32 %v134_v60, 0.0  ;;  %v139_v61 = vld [vmem:[#allocation2 + $0x3a0] sm:$0xff] }
 0x156   :  { %v1409_v10 = vmul.f32 0.06666667, %v2687_v5  ;;  %v2694_v11 = vor.u32 %v2693_v58, %v2692_v2  ;;  %v2704_v12 = vand.u32 2147483647, %v900_v3  ;;  %v2706_v13 = vcvt.f32.s32 %v900_v3 }
 0x157   :  { %vm4612_vm12 = vcmp.lt.f32.partialorder %v2696_v63, 8388608.0  ;;  %v2700_v15 = vand.u32 2147483647, %v2699_v6  ;;  %v901_v16 = vmul.f32 15.0, %v645_v4  ;;  %v646_v17 = vmin.f32 %v390_v8, 1.0 }
 0x158   :  { %1665 = vst [vmem:[#allocation5 + $0x350] sm:$0xff] %v1409_v10  ;;  %v2695_v18 = vsel %vm4606_vm11, %v2694_v11, %v898_v42  ;;  %v2707_v19 = vcvt.s32.f32 %v2706_v13  ;;  %v2709_v20 = vand.u32 2147483648, %v900_v3  ;;  %v391_v21 = vmax.f32 %v135_v9, 0.0  ;;  %v140_v10 = vld [vmem:[#allocation2 + $0x3a8] sm:$0xff] }
 0x159   :  { %v1410_v23 = vmul.f32 0.06666667, %v2695_v18  ;;  %v2702_v24 = vor.u32 %v2701_v7, %v2700_v15  ;;  %v2712_v29 = vand.u32 2147483647, %v901_v16  ;;  %v2714_v28 = vcvt.f32.s32 %v901_v16 }
 0x15a   :  { %vm4618_vm13 = vcmp.lt.f32.partialorder %v2704_v12, 8388608.0  ;;  %v2708_v31 = vand.u32 2147483647, %v2707_v19  ;;  %v902_v25 = vmul.f32 15.0, %v646_v17  ;;  %v647_v32 = vmin.f32 %v391_v21, 1.0 }
 0x15b   :  { %1666 = vst [vmem:[#allocation5 + $0x358] sm:$0xff] %v1410_v23  ;;  %v2703_v33 = vsel %vm4612_vm12, %v2702_v24, %v899_v54  ;;  %v2715_v34 = vcvt.s32.f32 %v2714_v28  ;;  %v2717_v26 = vand.u32 2147483648, %v901_v16  ;;  %v392_v35 = vmax.f32 %v136_v22, 0.0  ;;  %v141_v23 = vld [vmem:[#allocation2 + $0x3b0] sm:$0xff] }
 0x15c   :  { %v1411_v37 = vmul.f32 0.06666667, %v2703_v33  ;;  %v2710_v38 = vor.u32 %v2709_v20, %v2708_v31  ;;  %v2720_v39 = vand.u32 2147483647, %v902_v25  ;;  %v2722_v40 = vcvt.f32.s32 %v902_v25 }
 0x15d   :  { %vm4624_vm14 = vcmp.lt.f32.partialorder %v2712_v29, 8388608.0  ;;  %v2716_v42 = vand.u32 2147483647, %v2715_v34  ;;  %v903_v43 = vmul.f32 15.0, %v647_v32  ;;  %v648_v44 = vmin.f32 %v392_v35, 1.0 }
 0x15e   :  { %1667 = vst [vmem:[#allocation5 + $0x360] sm:$0xff] %v1411_v37  ;;  %v2711_v45 = vsel %vm4618_vm13, %v2710_v38, %v900_v3  ;;  %v2723_v46 = vcvt.s32.f32 %v2722_v40  ;;  %v2725_v47 = vand.u32 2147483648, %v902_v25  ;;  %v393_v48 = vmax.f32 %v137_v36, 0.0  ;;  %v142_v37 = vld [vmem:[#allocation2 + $0x3b8] sm:$0xff] }
 0x15f   :  { %v1412_v51 = vmul.f32 0.06666667, %v2711_v45  ;;  %v2718_v52 = vor.u32 %v2717_v26, %v2716_v42  ;;  %v2728_v49 = vand.u32 2147483647, %v903_v43  ;;  %v2730_v27 = vcvt.f32.s32 %v903_v43 }
 0x160   :  { %vm4630_vm15 = vcmp.lt.f32.partialorder %v2720_v39, 8388608.0  ;;  %v2724_v54 = vand.u32 2147483647, %v2723_v46  ;;  %v904_v55 = vmul.f32 15.0, %v648_v44  ;;  %v649_v56 = vmin.f32 %v393_v48, 1.0 }
 0x161   :  { %1668 = vst [vmem:[#allocation5 + $0x368] sm:$0xff] %v1412_v51  ;;  %v2719_v57 = vsel %vm4624_vm14, %v2718_v52, %v901_v16  ;;  %v2731_v58 = vcvt.s32.f32 %v2730_v27  ;;  %v2733_v59 = vand.u32 2147483648, %v903_v43  ;;  %v394_v60 = vmax.f32 %v138_v50, 0.0  ;;  %v143_v51 = vld [vmem:[#allocation2 + $0x3c0] sm:$0xff] }
 0x162   :  { %v1413_v62 = vmul.f32 0.06666667, %v2719_v57  ;;  %v2726_v63 = vor.u32 %v2725_v47, %v2724_v54  ;;  %v2736_v0 = vand.u32 2147483647, %v904_v55  ;;  %v2738_v1 = vcvt.f32.s32 %v904_v55 }
 0x163   :  { %vm4636_vm0 = vcmp.lt.f32.partialorder %v2728_v49, 8388608.0  ;;  %v2732_v3 = vand.u32 2147483647, %v2731_v58  ;;  %v905_v4 = vmul.f32 15.0, %v649_v56  ;;  %v650_v5 = vmin.f32 %v394_v60, 1.0 }
 0x164   :  { %1669 = vst [vmem:[#allocation5 + $0x370] sm:$0xff] %v1413_v62  ;;  %v2727_v6 = vsel %vm4630_vm15, %v2726_v63, %v902_v25  ;;  %v2739_v7 = vcvt.s32.f32 %v2738_v1  ;;  %v2741_v8 = vand.u32 2147483648, %v904_v55  ;;  %v395_v9 = vmax.f32 %v139_v61, 0.0  ;;  %v144_v62 = vld [vmem:[#allocation2 + $0x3c8] sm:$0xff] }
 0x165   :  { %v1414_v11 = vmul.f32 0.06666667, %v2727_v6  ;;  %v2734_v12 = vor.u32 %v2733_v59, %v2732_v3  ;;  %v2744_v13 = vand.u32 2147483647, %v905_v4  ;;  %v2746_v14 = vcvt.f32.s32 %v905_v4 }
 0x166   :  { %vm4642_vm1 = vcmp.lt.f32.partialorder %v2736_v0, 8388608.0  ;;  %v2740_v16 = vand.u32 2147483647, %v2739_v7  ;;  %v906_v17 = vmul.f32 15.0, %v650_v5  ;;  %v651_v18 = vmin.f32 %v395_v9, 1.0 }
 0x167   :  { %1670 = vst [vmem:[#allocation5 + $0x378] sm:$0xff] %v1414_v11  ;;  %v2735_v19 = vsel %vm4636_vm0, %v2734_v12, %v903_v43  ;;  %v2747_v20 = vcvt.s32.f32 %v2746_v14  ;;  %v2749_v21 = vand.u32 2147483648, %v905_v4  ;;  %v396_v22 = vmax.f32 %v140_v10, 0.0  ;;  %v145_v11 = vld [vmem:[#allocation2 + $0x3d0] sm:$0xff] }
 0x168   :  { %v1415_v24 = vmul.f32 0.06666667, %v2735_v19  ;;  %v2742_v29 = vor.u32 %v2741_v8, %v2740_v16  ;;  %v2752_v28 = vand.u32 2147483647, %v906_v17  ;;  %v2754_v30 = vcvt.f32.s32 %v906_v17 }
 0x169   :  { %vm4648_vm2 = vcmp.lt.f32.partialorder %v2744_v13, 8388608.0  ;;  %v2748_v25 = vand.u32 2147483647, %v2747_v20  ;;  %v907_v32 = vmul.f32 15.0, %v651_v18  ;;  %v652_v33 = vmin.f32 %v396_v22, 1.0 }
 0x16a   :  { %1671 = vst [vmem:[#allocation5 + $0x380] sm:$0xff] %v1415_v24  ;;  %v2743_v34 = vsel %vm4642_vm1, %v2742_v29, %v904_v55  ;;  %v2755_v26 = vcvt.s32.f32 %v2754_v30  ;;  %v2757_v35 = vand.u32 2147483648, %v906_v17  ;;  %v397_v36 = vmax.f32 %v141_v23, 0.0  ;;  %v146_v24 = vld [vmem:[#allocation2 + $0x3d8] sm:$0xff] }
 0x16b   :  { %v1416_v38 = vmul.f32 0.06666667, %v2743_v34  ;;  %v2750_v39 = vor.u32 %v2749_v21, %v2748_v25  ;;  %v2760_v40 = vand.u32 2147483647, %v907_v32  ;;  %v2762_v41 = vcvt.f32.s32 %v907_v32 }
 0x16c   :  { %vm4654_vm3 = vcmp.lt.f32.partialorder %v2752_v28, 8388608.0  ;;  %v2756_v43 = vand.u32 2147483647, %v2755_v26  ;;  %v908_v44 = vmul.f32 15.0, %v652_v33  ;;  %v653_v45 = vmin.f32 %v397_v36, 1.0 }
 0x16d   :  { %1672 = vst [vmem:[#allocation5 + $0x388] sm:$0xff] %v1416_v38  ;;  %v2751_v46 = vsel %vm4648_vm2, %v2750_v39, %v905_v4  ;;  %v2763_v47 = vcvt.s32.f32 %v2762_v41  ;;  %v2765_v48 = vand.u32 2147483648, %v907_v32  ;;  %v398_v50 = vmax.f32 %v142_v37, 0.0  ;;  %v147_v38 = vld [vmem:[#allocation2 + $0x3e0] sm:$0xff] }
 0x16e   :  { %v1417_v52 = vmul.f32 0.06666667, %v2751_v46  ;;  %v2758_v49 = vor.u32 %v2757_v35, %v2756_v43  ;;  %v2768_v27 = vand.u32 2147483647, %v908_v44  ;;  %v2770_v53 = vcvt.f32.s32 %v908_v44 }
 0x16f   :  { %vm4660_vm4 = vcmp.lt.f32.partialorder %v2760_v40, 8388608.0  ;;  %v2764_v55 = vand.u32 2147483647, %v2763_v47  ;;  %v909_v56 = vmul.f32 15.0, %v653_v45  ;;  %v654_v57 = vmin.f32 %v398_v50, 1.0 }
 0x170   :  { %1673 = vst [vmem:[#allocation5 + $0x390] sm:$0xff] %v1417_v52  ;;  %v2759_v58 = vsel %vm4654_vm3, %v2758_v49, %v906_v17  ;;  %v2771_v59 = vcvt.s32.f32 %v2770_v53  ;;  %v2773_v60 = vand.u32 2147483648, %v908_v44  ;;  %v399_v61 = vmax.f32 %v143_v51, 0.0  ;;  %v148_v52 = vld [vmem:[#allocation2 + $0x3e8] sm:$0xff] }
 0x171   :  { %v1418_v63 = vmul.f32 0.06666667, %v2759_v58  ;;  %v2766_v0 = vor.u32 %v2765_v48, %v2764_v55  ;;  %v2776_v1 = vand.u32 2147483647, %v909_v56  ;;  %v2778_v2 = vcvt.f32.s32 %v909_v56 }
 0x172   :  { %vm4666_vm5 = vcmp.lt.f32.partialorder %v2768_v27, 8388608.0  ;;  %v2772_v4 = vand.u32 2147483647, %v2771_v59  ;;  %v910_v5 = vmul.f32 15.0, %v654_v57  ;;  %v655_v6 = vmin.f32 %v399_v61, 1.0 }
 0x173   :  { %1674 = vst [vmem:[#allocation5 + $0x398] sm:$0xff] %v1418_v63  ;;  %v2767_v7 = vsel %vm4660_vm4, %v2766_v0, %v907_v32  ;;  %v2779_v8 = vcvt.s32.f32 %v2778_v2  ;;  %v2781_v9 = vand.u32 2147483648, %v909_v56  ;;  %v400_v10 = vmax.f32 %v144_v62, 0.0  ;;  %v149_v63 = vld [vmem:[#allocation2 + $0x3f0] sm:$0xff] }
 0x174   :  { %v1419_v12 = vmul.f32 0.06666667, %v2767_v7  ;;  %v2774_v13 = vor.u32 %v2773_v60, %v2772_v4  ;;  %v2784_v14 = vand.u32 2147483647, %v910_v5  ;;  %v2786_v15 = vcvt.f32.s32 %v910_v5 }
 0x175   :  { %vm4672_vm6 = vcmp.lt.f32.partialorder %v2776_v1, 8388608.0  ;;  %v2780_v17 = vand.u32 2147483647, %v2779_v8  ;;  %v911_v18 = vmul.f32 15.0, %v655_v6  ;;  %v656_v19 = vmin.f32 %v400_v10, 1.0 }
 0x176   :  { %1675 = vst [vmem:[#allocation5 + $0x3a0] sm:$0xff] %v1419_v12  ;;  %v2775_v20 = vsel %vm4666_vm5, %v2774_v13, %v908_v44  ;;  %v2787_v21 = vcvt.s32.f32 %v2786_v15  ;;  %v2789_v22 = vand.u32 2147483648, %v910_v5  ;;  %v401_v23 = vmax.f32 %v145_v11, 0.0  ;;  %v150_v12 = vld [vmem:[#allocation2 + $0x3f8] sm:$0xff] }
 0x177   :  { %v1420_v29 = vmul.f32 0.06666667, %v2775_v20  ;;  %v2782_v28 = vor.u32 %v2781_v9, %v2780_v17  ;;  %v2792_v30 = vand.u32 2147483647, %v911_v18  ;;  %v2794_v31 = vcvt.f32.s32 %v911_v18 }
 0x178   :  { %vm4678_vm7 = vcmp.lt.f32.partialorder %v2784_v14, 8388608.0  ;;  %v2788_v32 = vand.u32 2147483647, %v2787_v21  ;;  %v912_v33 = vmul.f32 15.0, %v656_v19  ;;  %v657_v34 = vmin.f32 %v401_v23, 1.0 }
 0x179   :  { %1676 = vst [vmem:[#allocation5 + $0x3a8] sm:$0xff] %v1420_v29  ;;  %v2783_v26 = vsel %vm4672_vm6, %v2782_v28, %v909_v56  ;;  %v2795_v35 = vcvt.s32.f32 %v2794_v31  ;;  %v2797_v36 = vand.u32 2147483648, %v911_v18  ;;  %v402_v37 = vmax.f32 %v146_v24, 0.0  ;;  %v151_v29 = vld [vmem:[#allocation2 + $0x400] sm:$0xff] }
 0x17a   :  { %v1421_v39 = vmul.f32 0.06666667, %v2783_v26  ;;  %v2790_v40 = vor.u32 %v2789_v22, %v2788_v32  ;;  %v2800_v41 = vand.u32 2147483647, %v912_v33  ;;  %v2802_v42 = vcvt.f32.s32 %v912_v33 }
 0x17b   :  { %vm4684_vm8 = vcmp.lt.f32.partialorder %v2792_v30, 8388608.0  ;;  %v2796_v44 = vand.u32 2147483647, %v2795_v35  ;;  %v913_v45 = vmul.f32 15.0, %v657_v34  ;;  %v658_v46 = vmin.f32 %v402_v37, 1.0 }
 0x17c   :  { %1677 = vst [vmem:[#allocation5 + $0x3b0] sm:$0xff] %v1421_v39  ;;  %v2791_v47 = vsel %vm4678_vm7, %v2790_v40, %v910_v5  ;;  %v2803_v48 = vcvt.s32.f32 %v2802_v42  ;;  %v2805_v50 = vand.u32 2147483648, %v912_v33  ;;  %v403_v51 = vmax.f32 %v147_v38, 0.0  ;;  %v152_v39 = vld [vmem:[#allocation2 + $0x408] sm:$0xff] }
 0x17d   :  { %v1422_v49 = vmul.f32 0.06666667, %v2791_v47  ;;  %v2798_v27 = vor.u32 %v2797_v36, %v2796_v44  ;;  %v2808_v53 = vand.u32 2147483647, %v913_v45  ;;  %v2810_v54 = vcvt.f32.s32 %v913_v45 }
 0x17e   :  { %vm4690_vm9 = vcmp.lt.f32.partialorder %v2800_v41, 8388608.0  ;;  %v2804_v56 = vand.u32 2147483647, %v2803_v48  ;;  %v914_v57 = vmul.f32 15.0, %v658_v46  ;;  %v659_v58 = vmin.f32 %v403_v51, 1.0 }
 0x17f   :  { %1678 = vst [vmem:[#allocation5 + $0x3b8] sm:$0xff] %v1422_v49  ;;  %v2799_v59 = vsel %vm4684_vm8, %v2798_v27, %v911_v18  ;;  %v2811_v60 = vcvt.s32.f32 %v2810_v54  ;;  %v2813_v61 = vand.u32 2147483648, %v913_v45  ;;  %v404_v62 = vmax.f32 %v148_v52, 0.0  ;;  %v153_v49 = vld [vmem:[#allocation2 + $0x410] sm:$0xff] }
 0x180   :  { %v1423_v0 = vmul.f32 0.06666667, %v2799_v59  ;;  %v2806_v1 = vor.u32 %v2805_v50, %v2804_v56  ;;  %v2816_v2 = vand.u32 2147483647, %v914_v57  ;;  %v2818_v3 = vcvt.f32.s32 %v914_v57 }
 0x181   :  { %vm4696_vm10 = vcmp.lt.f32.partialorder %v2808_v53, 8388608.0  ;;  %v2812_v5 = vand.u32 2147483647, %v2811_v60  ;;  %v915_v6 = vmul.f32 15.0, %v659_v58  ;;  %v660_v7 = vmin.f32 %v404_v62, 1.0 }
 0x182   :  { %1679 = vst [vmem:[#allocation5 + $0x3c0] sm:$0xff] %v1423_v0  ;;  %v2807_v8 = vsel %vm4690_vm9, %v2806_v1, %v912_v33  ;;  %v2819_v9 = vcvt.s32.f32 %v2818_v3  ;;  %v2821_v10 = vand.u32 2147483648, %v914_v57  ;;  %v405_v11 = vmax.f32 %v149_v63, 0.0  ;;  %v154_v0 = vld [vmem:[#allocation2 + $0x418] sm:$0xff] }
 0x183   :  { %v1424_v13 = vmul.f32 0.06666667, %v2807_v8  ;;  %v2814_v14 = vor.u32 %v2813_v61, %v2812_v5  ;;  %v2824_v15 = vand.u32 2147483647, %v915_v6  ;;  %v2826_v16 = vcvt.f32.s32 %v915_v6 }
 0x184   :  { %vm4702_vm11 = vcmp.lt.f32.partialorder %v2816_v2, 8388608.0  ;;  %v2820_v18 = vand.u32 2147483647, %v2819_v9  ;;  %v916_v19 = vmul.f32 15.0, %v660_v7  ;;  %v661_v20 = vmin.f32 %v405_v11, 1.0 }
 0x185   :  { %1680 = vst [vmem:[#allocation5 + $0x3c8] sm:$0xff] %v1424_v13  ;;  %v2815_v21 = vsel %vm4696_vm10, %v2814_v14, %v913_v45  ;;  %v2827_v22 = vcvt.s32.f32 %v2826_v16  ;;  %v2829_v23 = vand.u32 2147483648, %v915_v6  ;;  %v406_v24 = vmax.f32 %v150_v12, 0.0  ;;  %v155_v13 = vld [vmem:[#allocation2 + $0x420] sm:$0xff] }
 0x186   :  { %v1425_v28 = vmul.f32 0.06666667, %v2815_v21  ;;  %v2822_v30 = vor.u32 %v2821_v10, %v2820_v18  ;;  %v2832_v31 = vand.u32 2147483647, %v916_v19  ;;  %v2834_v25 = vcvt.f32.s32 %v916_v19 }
 0x187   :  { %vm4708_vm12 = vcmp.lt.f32.partialorder %v2824_v15, 8388608.0  ;;  %v2828_v33 = vand.u32 2147483647, %v2827_v22  ;;  %v917_v34 = vmul.f32 15.0, %v661_v20  ;;  %v662_v26 = vmin.f32 %v406_v24, 1.0 }
 0x188   :  { %1681 = vst [vmem:[#allocation5 + $0x3d0] sm:$0xff] %v1425_v28  ;;  %v2823_v35 = vsel %vm4702_vm11, %v2822_v30, %v914_v57  ;;  %v2835_v36 = vcvt.s32.f32 %v2834_v25  ;;  %v2837_v37 = vand.u32 2147483648, %v916_v19  ;;  %v407_v38 = vmax.f32 %v151_v29, 0.0  ;;  %v156_v28 = vld [vmem:[#allocation2 + $0x428] sm:$0xff] }
 0x189   :  { %v1426_v40 = vmul.f32 0.06666667, %v2823_v35  ;;  %v2830_v41 = vor.u32 %v2829_v23, %v2828_v33  ;;  %v2840_v42 = vand.u32 2147483647, %v917_v34  ;;  %v2842_v43 = vcvt.f32.s32 %v917_v34 }
 0x18a   :  { %vm4714_vm13 = vcmp.lt.f32.partialorder %v2832_v31, 8388608.0  ;;  %v2836_v45 = vand.u32 2147483647, %v2835_v36  ;;  %v918_v46 = vmul.f32 15.0, %v662_v26  ;;  %v663_v47 = vmin.f32 %v407_v38, 1.0 }
 0x18b   :  { %1682 = vst [vmem:[#allocation5 + $0x3d8] sm:$0xff] %v1426_v40  ;;  %v2831_v48 = vsel %vm4708_vm12, %v2830_v41, %v915_v6  ;;  %v2843_v50 = vcvt.s32.f32 %v2842_v43  ;;  %v2845_v51 = vand.u32 2147483648, %v917_v34  ;;  %v408_v52 = vmax.f32 %v152_v39, 0.0  ;;  %v157_v40 = vld [vmem:[#allocation2 + $0x430] sm:$0xff] }
 0x18c   :  { %v1427_v27 = vmul.f32 0.06666667, %v2831_v48  ;;  %v2838_v53 = vor.u32 %v2837_v37, %v2836_v45  ;;  %v2848_v54 = vand.u32 2147483647, %v918_v46  ;;  %v2850_v55 = vcvt.f32.s32 %v918_v46 }
 0x18d   :  { %vm4720_vm14 = vcmp.lt.f32.partialorder %v2840_v42, 8388608.0  ;;  %v2844_v57 = vand.u32 2147483647, %v2843_v50  ;;  %v919_v58 = vmul.f32 15.0, %v663_v47  ;;  %v664_v59 = vmin.f32 %v408_v52, 1.0 }
 0x18e   :  { %1683 = vst [vmem:[#allocation5 + $0x3e0] sm:$0xff] %v1427_v27  ;;  %v2839_v60 = vsel %vm4714_vm13, %v2838_v53, %v916_v19  ;;  %v2851_v61 = vcvt.s32.f32 %v2850_v55  ;;  %v2853_v62 = vand.u32 2147483648, %v918_v46  ;;  %v409_v63 = vmax.f32 %v153_v49, 0.0  ;;  %v158_v27 = vld [vmem:[#allocation2 + $0x438] sm:$0xff] }
 0x18f   :  { %v1428_v1 = vmul.f32 0.06666667, %v2839_v60  ;;  %v2846_v2 = vor.u32 %v2845_v51, %v2844_v57  ;;  %v2856_v3 = vand.u32 2147483647, %v919_v58  ;;  %v2858_v4 = vcvt.f32.s32 %v919_v58 }
 0x190   :  { %vm4726_vm15 = vcmp.lt.f32.partialorder %v2848_v54, 8388608.0  ;;  %v2852_v6 = vand.u32 2147483647, %v2851_v61  ;;  %v920_v7 = vmul.f32 15.0, %v664_v59  ;;  %v665_v8 = vmin.f32 %v409_v63, 1.0 }
 0x191   :  { %1684 = vst [vmem:[#allocation5 + $0x3e8] sm:$0xff] %v1428_v1  ;;  %v2847_v9 = vsel %vm4720_vm14, %v2846_v2, %v917_v34  ;;  %v2859_v10 = vcvt.s32.f32 %v2858_v4  ;;  %v2861_v11 = vand.u32 2147483648, %v919_v58  ;;  %v410_v12 = vmax.f32 %v154_v0, 0.0  ;;  %v159_v1 = vld [vmem:[#allocation2 + $0x440] sm:$0xff] }
 0x192   :  { %v1429_v14 = vmul.f32 0.06666667, %v2847_v9  ;;  %v2854_v15 = vor.u32 %v2853_v62, %v2852_v6  ;;  %v2864_v16 = vand.u32 2147483647, %v920_v7  ;;  %v2866_v17 = vcvt.f32.s32 %v920_v7 }
 0x193   :  { %vm4732_vm0 = vcmp.lt.f32.partialorder %v2856_v3, 8388608.0  ;;  %v2860_v19 = vand.u32 2147483647, %v2859_v10  ;;  %v921_v20 = vmul.f32 15.0, %v665_v8  ;;  %v666_v21 = vmin.f32 %v410_v12, 1.0 }
 0x194   :  { %1685 = vst [vmem:[#allocation5 + $0x3f0] sm:$0xff] %v1429_v14  ;;  %v2855_v22 = vsel %vm4726_vm15, %v2854_v15, %v918_v46  ;;  %v2867_v23 = vcvt.s32.f32 %v2866_v17  ;;  %v2869_v24 = vand.u32 2147483648, %v920_v7  ;;  %v411_v29 = vmax.f32 %v155_v13, 0.0  ;;  %v160_v14 = vld [vmem:[#allocation2 + $0x448] sm:$0xff] }
 0x195   :  { %v1430_v30 = vmul.f32 0.06666667, %v2855_v22  ;;  %v2862_v31 = vor.u32 %v2861_v11, %v2860_v19  ;;  %v2872_v25 = vand.u32 2147483647, %v921_v20  ;;  %v2874_v32 = vcvt.f32.s32 %v921_v20 }
 0x196   :  { %vm4738_vm1 = vcmp.lt.f32.partialorder %v2864_v16, 8388608.0  ;;  %v2868_v34 = vand.u32 2147483647, %v2867_v23  ;;  %v922_v26 = vmul.f32 15.0, %v666_v21  ;;  %v667_v35 = vmin.f32 %v411_v29, 1.0 }
 0x197   :  { %1686 = vst [vmem:[#allocation5 + $0x3f8] sm:$0xff] %v1430_v30  ;;  %v2863_v36 = vsel %vm4732_vm0, %v2862_v31, %v919_v58  ;;  %v2875_v37 = vcvt.s32.f32 %v2874_v32  ;;  %v2877_v38 = vand.u32 2147483648, %v921_v20  ;;  %v412_v39 = vmax.f32 %v156_v28, 0.0  ;;  %v161_v30 = vld [vmem:[#allocation2 + $0x450] sm:$0xff] }
 0x198   :  { %v1431_v41 = vmul.f32 0.06666667, %v2863_v36  ;;  %v2870_v42 = vor.u32 %v2869_v24, %v2868_v34  ;;  %v2880_v43 = vand.u32 2147483647, %v922_v26  ;;  %v2882_v44 = vcvt.f32.s32 %v922_v26 }
 0x199   :  { %vm4744_vm2 = vcmp.lt.f32.partialorder %v2872_v25, 8388608.0  ;;  %v2876_v46 = vand.u32 2147483647, %v2875_v37  ;;  %v923_v47 = vmul.f32 15.0, %v667_v35  ;;  %v668_v48 = vmin.f32 %v412_v39, 1.0 }
 0x19a   :  { %1687 = vst [vmem:[#allocation5 + $0x400] sm:$0xff] %v1431_v41  ;;  %v2871_v50 = vsel %vm4738_vm1, %v2870_v42, %v920_v7  ;;  %v2883_v51 = vcvt.s32.f32 %v2882_v44  ;;  %v2885_v52 = vand.u32 2147483648, %v922_v26  ;;  %v413_v49 = vmax.f32 %v157_v40, 0.0  ;;  %v162_v41 = vld [vmem:[#allocation2 + $0x458] sm:$0xff] }
 0x19b   :  { %v1432_v53 = vmul.f32 0.06666667, %v2871_v50  ;;  %v2878_v54 = vor.u32 %v2877_v38, %v2876_v46  ;;  %v2888_v55 = vand.u32 2147483647, %v923_v47  ;;  %v2890_v56 = vcvt.f32.s32 %v923_v47 }
 0x19c   :  { %vm4750_vm3 = vcmp.lt.f32.partialorder %v2880_v43, 8388608.0  ;;  %v2884_v58 = vand.u32 2147483647, %v2883_v51  ;;  %v924_v59 = vmul.f32 15.0, %v668_v48  ;;  %v669_v60 = vmin.f32 %v413_v49, 1.0 }
 0x19d   :  { %1688 = vst [vmem:[#allocation5 + $0x408] sm:$0xff] %v1432_v53  ;;  %v2879_v61 = vsel %vm4744_vm2, %v2878_v54, %v921_v20  ;;  %v2891_v62 = vcvt.s32.f32 %v2890_v56  ;;  %v2893_v63 = vand.u32 2147483648, %v923_v47  ;;  %v414_v0 = vmax.f32 %v158_v27, 0.0  ;;  %v163_v53 = vld [vmem:[#allocation2 + $0x460] sm:$0xff] }
 0x19e   :  { %v1433_v2 = vmul.f32 0.06666667, %v2879_v61  ;;  %v2886_v3 = vor.u32 %v2885_v52, %v2884_v58  ;;  %v2896_v4 = vand.u32 2147483647, %v924_v59  ;;  %v2898_v5 = vcvt.f32.s32 %v924_v59 }
 0x19f   :  { %vm4756_vm4 = vcmp.lt.f32.partialorder %v2888_v55, 8388608.0  ;;  %v2892_v7 = vand.u32 2147483647, %v2891_v62  ;;  %v925_v8 = vmul.f32 15.0, %v669_v60  ;;  %v670_v9 = vmin.f32 %v414_v0, 1.0 }
 0x1a0   :  { %1689 = vst [vmem:[#allocation5 + $0x410] sm:$0xff] %v1433_v2  ;;  %v2887_v10 = vsel %vm4750_vm3, %v2886_v3, %v922_v26  ;;  %v2899_v11 = vcvt.s32.f32 %v2898_v5  ;;  %v2901_v12 = vand.u32 2147483648, %v924_v59  ;;  %v415_v13 = vmax.f32 %v159_v1, 0.0  ;;  %v164_v2 = vld [vmem:[#allocation2 + $0x468] sm:$0xff] }
 0x1a1   :  { %v1434_v15 = vmul.f32 0.06666667, %v2887_v10  ;;  %v2894_v16 = vor.u32 %v2893_v63, %v2892_v7  ;;  %v2904_v17 = vand.u32 2147483647, %v925_v8  ;;  %v2906_v18 = vcvt.f32.s32 %v925_v8 }
 0x1a2   :  { %vm4762_vm5 = vcmp.lt.f32.partialorder %v2896_v4, 8388608.0  ;;  %v2900_v20 = vand.u32 2147483647, %v2899_v11  ;;  %v926_v21 = vmul.f32 15.0, %v670_v9  ;;  %v671_v22 = vmin.f32 %v415_v13, 1.0 }
 0x1a3   :  { %1690 = vst [vmem:[#allocation5 + $0x418] sm:$0xff] %v1434_v15  ;;  %v2895_v23 = vsel %vm4756_vm4, %v2894_v16, %v923_v47  ;;  %v2907_v24 = vcvt.s32.f32 %v2906_v18  ;;  %v2909_v29 = vand.u32 2147483648, %v925_v8  ;;  %v416_v28 = vmax.f32 %v160_v14, 0.0  ;;  %v165_v15 = vld [vmem:[#allocation2 + $0x470] sm:$0xff] }
 0x1a4   :  { %v1435_v31 = vmul.f32 0.06666667, %v2895_v23  ;;  %v2902_v25 = vor.u32 %v2901_v12, %v2900_v20  ;;  %v2912_v32 = vand.u32 2147483647, %v926_v21  ;;  %v2914_v33 = vcvt.f32.s32 %v926_v21 }
 0x1a5   :  { %vm4768_vm6 = vcmp.lt.f32.partialorder %v2904_v17, 8388608.0  ;;  %v2908_v26 = vand.u32 2147483647, %v2907_v24  ;;  %v927_v35 = vmul.f32 15.0, %v671_v22  ;;  %v672_v36 = vmin.f32 %v416_v28, 1.0 }
 0x1a6   :  { %1691 = vst [vmem:[#allocation5 + $0x420] sm:$0xff] %v1435_v31  ;;  %v2903_v37 = vsel %vm4762_vm5, %v2902_v25, %v924_v59  ;;  %v2915_v38 = vcvt.s32.f32 %v2914_v33  ;;  %v2917_v39 = vand.u32 2147483648, %v926_v21  ;;  %v417_v40 = vmax.f32 %v161_v30, 0.0  ;;  %v166_v31 = vld [vmem:[#allocation2 + $0x478] sm:$0xff] }
 0x1a7   :  { %v1436_v42 = vmul.f32 0.06666667, %v2903_v37  ;;  %v2910_v43 = vor.u32 %v2909_v29, %v2908_v26  ;;  %v2920_v44 = vand.u32 2147483647, %v927_v35  ;;  %v2922_v45 = vcvt.f32.s32 %v927_v35 }
 0x1a8   :  { %vm4774_vm7 = vcmp.lt.f32.partialorder %v2912_v32, 8388608.0  ;;  %v2916_v47 = vand.u32 2147483647, %v2915_v38  ;;  %v928_v48 = vmul.f32 15.0, %v672_v36  ;;  %v673_v50 = vmin.f32 %v417_v40, 1.0 }
 0x1a9   :  { %1692 = vst [vmem:[#allocation5 + $0x428] sm:$0xff] %v1436_v42  ;;  %v2911_v51 = vsel %vm4768_vm6, %v2910_v43, %v925_v8  ;;  %v2923_v52 = vcvt.s32.f32 %v2922_v45  ;;  %v2925_v49 = vand.u32 2147483648, %v927_v35  ;;  %v418_v27 = vmax.f32 %v162_v41, 0.0  ;;  %v167_v42 = vld [vmem:[#allocation2 + $0x480] sm:$0xff] }
 0x1aa   :  { %v1437_v54 = vmul.f32 0.06666667, %v2911_v51  ;;  %v2918_v55 = vor.u32 %v2917_v39, %v2916_v47  ;;  %v2928_v56 = vand.u32 2147483647, %v928_v48  ;;  %v2930_v57 = vcvt.f32.s32 %v928_v48 }
 0x1ab   :  { %vm4780_vm8 = vcmp.lt.f32.partialorder %v2920_v44, 8388608.0  ;;  %v2924_v59 = vand.u32 2147483647, %v2923_v52  ;;  %v929_v60 = vmul.f32 15.0, %v673_v50  ;;  %v674_v61 = vmin.f32 %v418_v27, 1.0 }
 0x1ac   :  { %1693 = vst [vmem:[#allocation5 + $0x430] sm:$0xff] %v1437_v54  ;;  %v2919_v62 = vsel %vm4774_vm7, %v2918_v55, %v926_v21  ;;  %v2931_v63 = vcvt.s32.f32 %v2930_v57  ;;  %v2933_v0 = vand.u32 2147483648, %v928_v48  ;;  %v419_v1 = vmax.f32 %v163_v53, 0.0  ;;  %v168_v54 = vld [vmem:[#allocation2 + $0x488] sm:$0xff] }
 0x1ad   :  { %v1438_v3 = vmul.f32 0.06666667, %v2919_v62  ;;  %v2926_v4 = vor.u32 %v2925_v49, %v2924_v59  ;;  %v2936_v5 = vand.u32 2147483647, %v929_v60  ;;  %v2938_v6 = vcvt.f32.s32 %v929_v60 }
 0x1ae   :  { %vm4786_vm9 = vcmp.lt.f32.partialorder %v2928_v56, 8388608.0  ;;  %v2932_v8 = vand.u32 2147483647, %v2931_v63  ;;  %v930_v9 = vmul.f32 15.0, %v674_v61  ;;  %v675_v10 = vmin.f32 %v419_v1, 1.0 }
 0x1af   :  { %1694 = vst [vmem:[#allocation5 + $0x438] sm:$0xff] %v1438_v3  ;;  %v2927_v11 = vsel %vm4780_vm8, %v2926_v4, %v927_v35  ;;  %v2939_v12 = vcvt.s32.f32 %v2938_v6  ;;  %v2941_v13 = vand.u32 2147483648, %v929_v60  ;;  %v420_v14 = vmax.f32 %v164_v2, 0.0  ;;  %v169_v3 = vld [vmem:[#allocation2 + $0x490] sm:$0xff] }
 0x1b0   :  { %v1439_v16 = vmul.f32 0.06666667, %v2927_v11  ;;  %v2934_v17 = vor.u32 %v2933_v0, %v2932_v8  ;;  %v2944_v18 = vand.u32 2147483647, %v930_v9  ;;  %v2946_v19 = vcvt.f32.s32 %v930_v9 }
 0x1b1   :  { %vm4792_vm10 = vcmp.lt.f32.partialorder %v2936_v5, 8388608.0  ;;  %v2940_v21 = vand.u32 2147483647, %v2939_v12  ;;  %v931_v22 = vmul.f32 15.0, %v675_v10  ;;  %v676_v23 = vmin.f32 %v420_v14, 1.0 }
 0x1b2   :  { %1695 = vst [vmem:[#allocation5 + $0x440] sm:$0xff] %v1439_v16  ;;  %v2935_v24 = vsel %vm4786_vm9, %v2934_v17, %v928_v48  ;;  %v2947_v29 = vcvt.s32.f32 %v2946_v19  ;;  %v2949_v28 = vand.u32 2147483648, %v930_v9  ;;  %v421_v30 = vmax.f32 %v165_v15, 0.0  ;;  %v170_v16 = vld [vmem:[#allocation2 + $0x498] sm:$0xff] }
 0x1b3   :  { %v1440_v25 = vmul.f32 0.06666667, %v2935_v24  ;;  %v2942_v32 = vor.u32 %v2941_v13, %v2940_v21  ;;  %v2952_v33 = vand.u32 2147483647, %v931_v22  ;;  %v2954_v34 = vcvt.f32.s32 %v931_v22 }
 0x1b4   :  { %vm4798_vm11 = vcmp.lt.f32.partialorder %v2944_v18, 8388608.0  ;;  %v2948_v35 = vand.u32 2147483647, %v2947_v29  ;;  %v932_v36 = vmul.f32 15.0, %v676_v23  ;;  %v677_v37 = vmin.f32 %v421_v30, 1.0 }
 0x1b5   :  { %1696 = vst [vmem:[#allocation5 + $0x448] sm:$0xff] %v1440_v25  ;;  %v2943_v38 = vsel %vm4792_vm10, %v2942_v32, %v929_v60  ;;  %v2955_v39 = vcvt.s32.f32 %v2954_v34  ;;  %v2957_v40 = vand.u32 2147483648, %v931_v22  ;;  %v422_v41 = vmax.f32 %v166_v31, 0.0  ;;  %v171_v25 = vld [vmem:[#allocation2 + $0x4a0] sm:$0xff] }
 0x1b6   :  { %v1441_v43 = vmul.f32 0.06666667, %v2943_v38  ;;  %v2950_v44 = vor.u32 %v2949_v28, %v2948_v35  ;;  %v2960_v45 = vand.u32 2147483647, %v932_v36  ;;  %v2962_v46 = vcvt.f32.s32 %v932_v36 }
 0x1b7   :  { %vm4804_vm12 = vcmp.lt.f32.partialorder %v2952_v33, 8388608.0  ;;  %v2956_v48 = vand.u32 2147483647, %v2955_v39  ;;  %v933_v50 = vmul.f32 15.0, %v677_v37  ;;  %v678_v51 = vmin.f32 %v422_v41, 1.0 }
 0x1b8   :  { %1697 = vst [vmem:[#allocation5 + $0x450] sm:$0xff] %v1441_v43  ;;  %v2951_v52 = vsel %vm4798_vm11, %v2950_v44, %v930_v9  ;;  %v2963_v49 = vcvt.s32.f32 %v2962_v46  ;;  %v2965_v27 = vand.u32 2147483648, %v932_v36  ;;  %v423_v53 = vmax.f32 %v167_v42, 0.0  ;;  %v172_v43 = vld [vmem:[#allocation2 + $0x4a8] sm:$0xff] }
 0x1b9   :  { %v1442_v55 = vmul.f32 0.06666667, %v2951_v52  ;;  %v2958_v56 = vor.u32 %v2957_v40, %v2956_v48  ;;  %v2968_v57 = vand.u32 2147483647, %v933_v50  ;;  %v2970_v58 = vcvt.f32.s32 %v933_v50 }
 0x1ba   :  { %vm4810_vm13 = vcmp.lt.f32.partialorder %v2960_v45, 8388608.0  ;;  %v2964_v60 = vand.u32 2147483647, %v2963_v49  ;;  %v934_v61 = vmul.f32 15.0, %v678_v51  ;;  %v679_v62 = vmin.f32 %v423_v53, 1.0 }
 0x1bb   :  { %1698 = vst [vmem:[#allocation5 + $0x458] sm:$0xff] %v1442_v55  ;;  %v2959_v63 = vsel %vm4804_vm12, %v2958_v56, %v931_v22  ;;  %v2971_v0 = vcvt.s32.f32 %v2970_v58  ;;  %v2973_v1 = vand.u32 2147483648, %v933_v50  ;;  %v424_v2 = vmax.f32 %v168_v54, 0.0  ;;  %v173_v55 = vld [vmem:[#allocation2 + $0x4b0] sm:$0xff] }
 0x1bc   :  { %v1443_v4 = vmul.f32 0.06666667, %v2959_v63  ;;  %v2966_v5 = vor.u32 %v2965_v27, %v2964_v60  ;;  %v2976_v6 = vand.u32 2147483647, %v934_v61  ;;  %v2978_v7 = vcvt.f32.s32 %v934_v61 }
 0x1bd   :  { %vm4816_vm14 = vcmp.lt.f32.partialorder %v2968_v57, 8388608.0  ;;  %v2972_v9 = vand.u32 2147483647, %v2971_v0  ;;  %v935_v10 = vmul.f32 15.0, %v679_v62  ;;  %v680_v11 = vmin.f32 %v424_v2, 1.0 }
 0x1be   :  { %1699 = vst [vmem:[#allocation5 + $0x460] sm:$0xff] %v1443_v4  ;;  %v2967_v12 = vsel %vm4810_vm13, %v2966_v5, %v932_v36  ;;  %v2979_v13 = vcvt.s32.f32 %v2978_v7  ;;  %v2981_v14 = vand.u32 2147483648, %v934_v61  ;;  %v425_v15 = vmax.f32 %v169_v3, 0.0  ;;  %v174_v4 = vld [vmem:[#allocation2 + $0x4b8] sm:$0xff] }
 0x1bf   :  { %v1444_v17 = vmul.f32 0.06666667, %v2967_v12  ;;  %v2974_v18 = vor.u32 %v2973_v1, %v2972_v9  ;;  %v2984_v19 = vand.u32 2147483647, %v935_v10  ;;  %v2986_v20 = vcvt.f32.s32 %v935_v10 }
 0x1c0   :  { %vm4822_vm15 = vcmp.lt.f32.partialorder %v2976_v6, 8388608.0  ;;  %v2980_v22 = vand.u32 2147483647, %v2979_v13  ;;  %v936_v23 = vmul.f32 15.0, %v680_v11  ;;  %v681_v24 = vmin.f32 %v425_v15, 1.0 }
 0x1c1   :  { %1700 = vst [vmem:[#allocation5 + $0x468] sm:$0xff] %v1444_v17  ;;  %v2975_v29 = vsel %vm4816_vm14, %v2974_v18, %v933_v50  ;;  %v2987_v28 = vcvt.s32.f32 %v2986_v20  ;;  %v2989_v30 = vand.u32 2147483648, %v935_v10  ;;  %v426_v31 = vmax.f32 %v170_v16, 0.0  ;;  %v175_v17 = vld [vmem:[#allocation2 + $0x4c0] sm:$0xff] }
 0x1c2   :  { %v1445_v32 = vmul.f32 0.06666667, %v2975_v29  ;;  %v2982_v33 = vor.u32 %v2981_v14, %v2980_v22  ;;  %v2992_v34 = vand.u32 2147483647, %v936_v23  ;;  %v2994_v26 = vcvt.f32.s32 %v936_v23 }
 0x1c3   :  { %vm4828_vm0 = vcmp.lt.f32.partialorder %v2984_v19, 8388608.0  ;;  %v2988_v36 = vand.u32 2147483647, %v2987_v28  ;;  %v937_v37 = vmul.f32 15.0, %v681_v24  ;;  %v682_v38 = vmin.f32 %v426_v31, 1.0 }
 0x1c4   :  { %1701 = vst [vmem:[#allocation5 + $0x470] sm:$0xff] %v1445_v32  ;;  %v2983_v39 = vsel %vm4822_vm15, %v2982_v33, %v934_v61  ;;  %v2995_v40 = vcvt.s32.f32 %v2994_v26  ;;  %v2997_v41 = vand.u32 2147483648, %v936_v23  ;;  %v427_v42 = vmax.f32 %v171_v25, 0.0  ;;  %v176_v32 = vld [vmem:[#allocation2 + $0x4c8] sm:$0xff] }
 0x1c5   :  { %v1446_v44 = vmul.f32 0.06666667, %v2983_v39  ;;  %v2990_v45 = vor.u32 %v2989_v30, %v2988_v36  ;;  %v3000_v46 = vand.u32 2147483647, %v937_v37  ;;  %v3002_v47 = vcvt.f32.s32 %v937_v37 }
 0x1c6   :  { %vm4834_vm1 = vcmp.lt.f32.partialorder %v2992_v34, 8388608.0  ;;  %v2996_v50 = vand.u32 2147483647, %v2995_v40  ;;  %v938_v51 = vmul.f32 15.0, %v682_v38  ;;  %v683_v52 = vmin.f32 %v427_v42, 1.0 }
 0x1c7   :  { %1702 = vst [vmem:[#allocation5 + $0x478] sm:$0xff] %v1446_v44  ;;  %v2991_v49 = vsel %vm4828_vm0, %v2990_v45, %v935_v10  ;;  %v3003_v27 = vcvt.s32.f32 %v3002_v47  ;;  %v3005_v53 = vand.u32 2147483648, %v937_v37  ;;  %v428_v54 = vmax.f32 %v172_v43, 0.0  ;;  %v177_v44 = vld [vmem:[#allocation2 + $0x4d0] sm:$0xff] }
 0x1c8   :  { %v1447_v56 = vmul.f32 0.06666667, %v2991_v49  ;;  %v2998_v57 = vor.u32 %v2997_v41, %v2996_v50  ;;  %v3008_v58 = vand.u32 2147483647, %v938_v51  ;;  %v3010_v59 = vcvt.f32.s32 %v938_v51 }
 0x1c9   :  { %vm4840_vm2 = vcmp.lt.f32.partialorder %v3000_v46, 8388608.0  ;;  %v3004_v61 = vand.u32 2147483647, %v3003_v27  ;;  %v939_v62 = vmul.f32 15.0, %v683_v52  ;;  %v684_v63 = vmin.f32 %v428_v54, 1.0 }
 0x1ca   :  { %1703 = vst [vmem:[#allocation5 + $0x480] sm:$0xff] %v1447_v56  ;;  %v2999_v0 = vsel %vm4834_vm1, %v2998_v57, %v936_v23  ;;  %v3011_v1 = vcvt.s32.f32 %v3010_v59  ;;  %v3013_v2 = vand.u32 2147483648, %v938_v51  ;;  %v429_v3 = vmax.f32 %v173_v55, 0.0  ;;  %v178_v56 = vld [vmem:[#allocation2 + $0x4d8] sm:$0xff] }
 0x1cb   :  { %v1448_v5 = vmul.f32 0.06666667, %v2999_v0  ;;  %v3006_v6 = vor.u32 %v3005_v53, %v3004_v61  ;;  %v3016_v7 = vand.u32 2147483647, %v939_v62  ;;  %v3018_v8 = vcvt.f32.s32 %v939_v62 }
 0x1cc   :  { %vm4846_vm3 = vcmp.lt.f32.partialorder %v3008_v58, 8388608.0  ;;  %v3012_v10 = vand.u32 2147483647, %v3011_v1  ;;  %v940_v11 = vmul.f32 15.0, %v684_v63  ;;  %v685_v12 = vmin.f32 %v429_v3, 1.0 }
 0x1cd   :  { %1704 = vst [vmem:[#allocation5 + $0x488] sm:$0xff] %v1448_v5  ;;  %v3007_v13 = vsel %vm4840_vm2, %v3006_v6, %v937_v37  ;;  %v3019_v14 = vcvt.s32.f32 %v3018_v8  ;;  %v3021_v15 = vand.u32 2147483648, %v939_v62  ;;  %v430_v16 = vmax.f32 %v174_v4, 0.0  ;;  %v179_v5 = vld [vmem:[#allocation2 + $0x4e0] sm:$0xff] }
 0x1ce   :  { %v1449_v18 = vmul.f32 0.06666667, %v3007_v13  ;;  %v3014_v19 = vor.u32 %v3013_v2, %v3012_v10  ;;  %v3024_v20 = vand.u32 2147483647, %v940_v11  ;;  %v3026_v21 = vcvt.f32.s32 %v940_v11 }
 0x1cf   :  { %vm4852_vm4 = vcmp.lt.f32.partialorder %v3016_v7, 8388608.0  ;;  %v3020_v23 = vand.u32 2147483647, %v3019_v14  ;;  %v941_v24 = vmul.f32 15.0, %v685_v12  ;;  %v686_v29 = vmin.f32 %v430_v16, 1.0 }
 0x1d0   :  { %1705 = vst [vmem:[#allocation5 + $0x490] sm:$0xff] %v1449_v18  ;;  %v3015_v28 = vsel %vm4846_vm3, %v3014_v19, %v938_v51  ;;  %v3027_v30 = vcvt.s32.f32 %v3026_v21  ;;  %v3029_v31 = vand.u32 2147483648, %v940_v11  ;;  %v431_v25 = vmax.f32 %v175_v17, 0.0  ;;  %v180_v18 = vld [vmem:[#allocation2 + $0x4e8] sm:$0xff] }
 0x1d1   :  { %v1450_v33 = vmul.f32 0.06666667, %v3015_v28  ;;  %v3022_v34 = vor.u32 %v3021_v15, %v3020_v23  ;;  %v3032_v26 = vand.u32 2147483647, %v941_v24  ;;  %v3034_v35 = vcvt.f32.s32 %v941_v24 }
 0x1d2   :  { %vm4858_vm5 = vcmp.lt.f32.partialorder %v3024_v20, 8388608.0  ;;  %v3028_v37 = vand.u32 2147483647, %v3027_v30  ;;  %v942_v38 = vmul.f32 15.0, %v686_v29  ;;  %v687_v39 = vmin.f32 %v431_v25, 1.0 }
 0x1d3   :  { %1706 = vst [vmem:[#allocation5 + $0x498] sm:$0xff] %v1450_v33  ;;  %v3023_v40 = vsel %vm4852_vm4, %v3022_v34, %v939_v62  ;;  %v3035_v41 = vcvt.s32.f32 %v3034_v35  ;;  %v3037_v42 = vand.u32 2147483648, %v941_v24  ;;  %v432_v43 = vmax.f32 %v176_v32, 0.0  ;;  %v181_v33 = vld [vmem:[#allocation2 + $0x4f0] sm:$0xff] }
 0x1d4   :  { %v1451_v45 = vmul.f32 0.06666667, %v3023_v40  ;;  %v3030_v46 = vor.u32 %v3029_v31, %v3028_v37  ;;  %v3040_v47 = vand.u32 2147483647, %v942_v38  ;;  %v3042_v48 = vcvt.f32.s32 %v942_v38 }
 0x1d5   :  { %vm4864_vm6 = vcmp.lt.f32.partialorder %v3032_v26, 8388608.0  ;;  %v3036_v51 = vand.u32 2147483647, %v3035_v41  ;;  %v943_v52 = vmul.f32 15.0, %v687_v39  ;;  %v688_v49 = vmin.f32 %v432_v43, 1.0 }
 0x1d6   :  { %1707 = vst [vmem:[#allocation5 + $0x4a0] sm:$0xff] %v1451_v45  ;;  %v3031_v27 = vsel %vm4858_vm5, %v3030_v46, %v940_v11  ;;  %v3043_v53 = vcvt.s32.f32 %v3042_v48  ;;  %v3045_v54 = vand.u32 2147483648, %v942_v38  ;;  %v433_v55 = vmax.f32 %v177_v44, 0.0  ;;  %v182_v45 = vld [vmem:[#allocation2 + $0x4f8] sm:$0xff] }
 0x1d7   :  { %v1452_v57 = vmul.f32 0.06666667, %v3031_v27  ;;  %v3038_v58 = vor.u32 %v3037_v42, %v3036_v51  ;;  %v3048_v59 = vand.u32 2147483647, %v943_v52  ;;  %v3050_v60 = vcvt.f32.s32 %v943_v52 }
 0x1d8   :  { %vm4870_vm7 = vcmp.lt.f32.partialorder %v3040_v47, 8388608.0  ;;  %v3044_v62 = vand.u32 2147483647, %v3043_v53  ;;  %v944_v63 = vmul.f32 15.0, %v688_v49  ;;  %v689_v0 = vmin.f32 %v433_v55, 1.0 }
 0x1d9   :  { %1708 = vst [vmem:[#allocation5 + $0x4a8] sm:$0xff] %v1452_v57  ;;  %v3039_v1 = vsel %vm4864_vm6, %v3038_v58, %v941_v24  ;;  %v3051_v2 = vcvt.s32.f32 %v3050_v60  ;;  %v3053_v3 = vand.u32 2147483648, %v943_v52  ;;  %v434_v4 = vmax.f32 %v178_v56, 0.0  ;;  %v183_v57 = vld [vmem:[#allocation2 + $0x500] sm:$0xff] }
 0x1da   :  { %v1453_v6 = vmul.f32 0.06666667, %v3039_v1  ;;  %v3046_v7 = vor.u32 %v3045_v54, %v3044_v62  ;;  %v3056_v8 = vand.u32 2147483647, %v944_v63  ;;  %v3058_v9 = vcvt.f32.s32 %v944_v63 }
 0x1db   :  { %vm4876_vm8 = vcmp.lt.f32.partialorder %v3048_v59, 8388608.0  ;;  %v3052_v11 = vand.u32 2147483647, %v3051_v2  ;;  %v945_v12 = vmul.f32 15.0, %v689_v0  ;;  %v690_v13 = vmin.f32 %v434_v4, 1.0 }
 0x1dc   :  { %1709 = vst [vmem:[#allocation5 + $0x4b0] sm:$0xff] %v1453_v6  ;;  %v3047_v14 = vsel %vm4870_vm7, %v3046_v7, %v942_v38  ;;  %v3059_v15 = vcvt.s32.f32 %v3058_v9  ;;  %v3061_v16 = vand.u32 2147483648, %v944_v63  ;;  %v435_v17 = vmax.f32 %v179_v5, 0.0  ;;  %v184_v6 = vld [vmem:[#allocation2 + $0x508] sm:$0xff] }
 0x1dd   :  { %v1454_v19 = vmul.f32 0.06666667, %v3047_v14  ;;  %v3054_v20 = vor.u32 %v3053_v3, %v3052_v11  ;;  %v3064_v21 = vand.u32 2147483647, %v945_v12  ;;  %v3066_v22 = vcvt.f32.s32 %v945_v12 }
 0x1de   :  { %vm4882_vm9 = vcmp.lt.f32.partialorder %v3056_v8, 8388608.0  ;;  %v3060_v24 = vand.u32 2147483647, %v3059_v15  ;;  %v946_v29 = vmul.f32 15.0, %v690_v13  ;;  %v691_v28 = vmin.f32 %v435_v17, 1.0 }
 0x1df   :  { %1710 = vst [vmem:[#allocation5 + $0x4b8] sm:$0xff] %v1454_v19  ;;  %v3055_v30 = vsel %vm4876_vm8, %v3054_v20, %v943_v52  ;;  %v3067_v31 = vcvt.s32.f32 %v3066_v22  ;;  %v3069_v25 = vand.u32 2147483648, %v945_v12  ;;  %v436_v32 = vmax.f32 %v180_v18, 0.0  ;;  %v185_v19 = vld [vmem:[#allocation2 + $0x510] sm:$0xff] }
 0x1e0   :  { %v1455_v34 = vmul.f32 0.06666667, %v3055_v30  ;;  %v3062_v26 = vor.u32 %v3061_v16, %v3060_v24  ;;  %v3072_v35 = vand.u32 2147483647, %v946_v29  ;;  %v3074_v36 = vcvt.f32.s32 %v946_v29 }
 0x1e1   :  { %vm4888_vm10 = vcmp.lt.f32.partialorder %v3064_v21, 8388608.0  ;;  %v3068_v38 = vand.u32 2147483647, %v3067_v31  ;;  %v947_v39 = vmul.f32 15.0, %v691_v28  ;;  %v692_v40 = vmin.f32 %v436_v32, 1.0 }
 0x1e2   :  { %1711 = vst [vmem:[#allocation5 + $0x4c0] sm:$0xff] %v1455_v34  ;;  %v3063_v41 = vsel %vm4882_vm9, %v3062_v26, %v944_v63  ;;  %v3075_v42 = vcvt.s32.f32 %v3074_v36  ;;  %v3077_v43 = vand.u32 2147483648, %v946_v29  ;;  %v437_v44 = vmax.f32 %v181_v33, 0.0  ;;  %v186_v34 = vld [vmem:[#allocation2 + $0x518] sm:$0xff] }
 0x1e3   :  { %v1456_v46 = vmul.f32 0.06666667, %v3063_v41  ;;  %v3070_v47 = vor.u32 %v3069_v25, %v3068_v38  ;;  %v3080_v48 = vand.u32 2147483647, %v947_v39  ;;  %v3082_v50 = vcvt.f32.s32 %v947_v39 }
 0x1e4   :  { %vm4894_vm11 = vcmp.lt.f32.partialorder %v3072_v35, 8388608.0  ;;  %v3076_v52 = vand.u32 2147483647, %v3075_v42  ;;  %v948_v49 = vmul.f32 15.0, %v692_v40  ;;  %v693_v27 = vmin.f32 %v437_v44, 1.0 }
 0x1e5   :  { %1712 = vst [vmem:[#allocation5 + $0x4c8] sm:$0xff] %v1456_v46  ;;  %v3071_v53 = vsel %vm4888_vm10, %v3070_v47, %v945_v12  ;;  %v3083_v54 = vcvt.s32.f32 %v3082_v50  ;;  %v3085_v55 = vand.u32 2147483648, %v947_v39  ;;  %v438_v56 = vmax.f32 %v182_v45, 0.0  ;;  %v187_v46 = vld [vmem:[#allocation2 + $0x520] sm:$0xff] }
 0x1e6   :  { %v1457_v58 = vmul.f32 0.06666667, %v3071_v53  ;;  %v3078_v59 = vor.u32 %v3077_v43, %v3076_v52  ;;  %v3088_v60 = vand.u32 2147483647, %v948_v49  ;;  %v3090_v61 = vcvt.f32.s32 %v948_v49 }
 0x1e7   :  { %vm4900_vm12 = vcmp.lt.f32.partialorder %v3080_v48, 8388608.0  ;;  %v3084_v63 = vand.u32 2147483647, %v3083_v54  ;;  %v949_v0 = vmul.f32 15.0, %v693_v27  ;;  %v694_v1 = vmin.f32 %v438_v56, 1.0 }
 0x1e8   :  { %1713 = vst [vmem:[#allocation5 + $0x4d0] sm:$0xff] %v1457_v58  ;;  %v3079_v2 = vsel %vm4894_vm11, %v3078_v59, %v946_v29  ;;  %v3091_v3 = vcvt.s32.f32 %v3090_v61  ;;  %v3093_v4 = vand.u32 2147483648, %v948_v49  ;;  %v439_v5 = vmax.f32 %v183_v57, 0.0  ;;  %v188_v58 = vld [vmem:[#allocation2 + $0x528] sm:$0xff] }
 0x1e9   :  { %v1458_v7 = vmul.f32 0.06666667, %v3079_v2  ;;  %v3086_v8 = vor.u32 %v3085_v55, %v3084_v63  ;;  %v3096_v9 = vand.u32 2147483647, %v949_v0  ;;  %v3098_v10 = vcvt.f32.s32 %v949_v0 }
 0x1ea   :  { %vm4906_vm13 = vcmp.lt.f32.partialorder %v3088_v60, 8388608.0  ;;  %v3092_v12 = vand.u32 2147483647, %v3091_v3  ;;  %v950_v13 = vmul.f32 15.0, %v694_v1  ;;  %v695_v14 = vmin.f32 %v439_v5, 1.0 }
 0x1eb   :  { %1714 = vst [vmem:[#allocation5 + $0x4d8] sm:$0xff] %v1458_v7  ;;  %v3087_v15 = vsel %vm4900_vm12, %v3086_v8, %v947_v39  ;;  %v3099_v16 = vcvt.s32.f32 %v3098_v10  ;;  %v3101_v17 = vand.u32 2147483648, %v949_v0  ;;  %v440_v18 = vmax.f32 %v184_v6, 0.0  ;;  %v189_v7 = vld [vmem:[#allocation2 + $0x530] sm:$0xff] }
 0x1ec   :  { %v1459_v20 = vmul.f32 0.06666667, %v3087_v15  ;;  %v3094_v21 = vor.u32 %v3093_v4, %v3092_v12  ;;  %v3104_v22 = vand.u32 2147483647, %v950_v13  ;;  %v3106_v23 = vcvt.f32.s32 %v950_v13 }
 0x1ed   :  { %vm4912_vm14 = vcmp.lt.f32.partialorder %v3096_v9, 8388608.0  ;;  %v3100_v29 = vand.u32 2147483647, %v3099_v16  ;;  %v951_v28 = vmul.f32 15.0, %v695_v14  ;;  %v696_v30 = vmin.f32 %v440_v18, 1.0 }
 0x1ee   :  { %1715 = vst [vmem:[#allocation5 + $0x4e0] sm:$0xff] %v1459_v20  ;;  %v3095_v31 = vsel %vm4906_vm13, %v3094_v21, %v948_v49  ;;  %v3107_v25 = vcvt.s32.f32 %v3106_v23  ;;  %v3109_v32 = vand.u32 2147483648, %v950_v13  ;;  %v441_v33 = vmax.f32 %v185_v19, 0.0  ;;  %v190_v20 = vld [vmem:[#allocation2 + $0x538] sm:$0xff] }
 0x1ef   :  { %v1460_v26 = vmul.f32 0.06666667, %v3095_v31  ;;  %v3102_v35 = vor.u32 %v3101_v17, %v3100_v29  ;;  %v3112_v36 = vand.u32 2147483647, %v951_v28  ;;  %v3114_v37 = vcvt.f32.s32 %v951_v28 }
 0x1f0   :  { %vm4918_vm15 = vcmp.lt.f32.partialorder %v3104_v22, 8388608.0  ;;  %v3108_v39 = vand.u32 2147483647, %v3107_v25  ;;  %v952_v40 = vmul.f32 15.0, %v696_v30  ;;  %v697_v41 = vmin.f32 %v441_v33, 1.0 }
 0x1f1   :  { %1716 = vst [vmem:[#allocation5 + $0x4e8] sm:$0xff] %v1460_v26  ;;  %v3103_v42 = vsel %vm4912_vm14, %v3102_v35, %v949_v0  ;;  %v3115_v43 = vcvt.s32.f32 %v3114_v37  ;;  %v3117_v44 = vand.u32 2147483648, %v951_v28  ;;  %v442_v45 = vmax.f32 %v186_v34, 0.0  ;;  %v191_v26 = vld [vmem:[#allocation2 + $0x540] sm:$0xff] }
 0x1f2   :  { %v1461_v47 = vmul.f32 0.06666667, %v3103_v42  ;;  %v3110_v48 = vor.u32 %v3109_v32, %v3108_v39  ;;  %v3120_v50 = vand.u32 2147483647, %v952_v40  ;;  %v3122_v51 = vcvt.f32.s32 %v952_v40 }
 0x1f3   :  { %vm4924_vm0 = vcmp.lt.f32.partialorder %v3112_v36, 8388608.0  ;;  %v3116_v49 = vand.u32 2147483647, %v3115_v43  ;;  %v953_v27 = vmul.f32 15.0, %v697_v41  ;;  %v698_v53 = vmin.f32 %v442_v45, 1.0 }
 0x1f4   :  { %1717 = vst [vmem:[#allocation5 + $0x4f0] sm:$0xff] %v1461_v47  ;;  %v3111_v54 = vsel %vm4918_vm15, %v3110_v48, %v950_v13  ;;  %v3123_v55 = vcvt.s32.f32 %v3122_v51  ;;  %v3125_v56 = vand.u32 2147483648, %v952_v40  ;;  %v443_v57 = vmax.f32 %v187_v46, 0.0  ;;  %v192_v47 = vld [vmem:[#allocation2 + $0x548] sm:$0xff] }
 0x1f5   :  { %v1462_v59 = vmul.f32 0.06666667, %v3111_v54  ;;  %v3118_v60 = vor.u32 %v3117_v44, %v3116_v49  ;;  %v3128_v61 = vand.u32 2147483647, %v953_v27  ;;  %v3130_v62 = vcvt.f32.s32 %v953_v27 }
 0x1f6   :  { %vm4930_vm1 = vcmp.lt.f32.partialorder %v3120_v50, 8388608.0  ;;  %v3124_v0 = vand.u32 2147483647, %v3123_v55  ;;  %v954_v1 = vmul.f32 15.0, %v698_v53  ;;  %v699_v2 = vmin.f32 %v443_v57, 1.0 }
 0x1f7   :  { %1718 = vst [vmem:[#allocation5 + $0x4f8] sm:$0xff] %v1462_v59  ;;  %v3119_v3 = vsel %vm4924_vm0, %v3118_v60, %v951_v28  ;;  %v3131_v4 = vcvt.s32.f32 %v3130_v62  ;;  %v3133_v5 = vand.u32 2147483648, %v953_v27  ;;  %v444_v6 = vmax.f32 %v188_v58, 0.0  ;;  %v193_v59 = vld [vmem:[#allocation2 + $0x550] sm:$0xff] }
 0x1f8   :  { %v1463_v8 = vmul.f32 0.06666667, %v3119_v3  ;;  %v3126_v9 = vor.u32 %v3125_v56, %v3124_v0  ;;  %v3136_v10 = vand.u32 2147483647, %v954_v1  ;;  %v3138_v11 = vcvt.f32.s32 %v954_v1 }
 0x1f9   :  { %vm4936_vm2 = vcmp.lt.f32.partialorder %v3128_v61, 8388608.0  ;;  %v3132_v13 = vand.u32 2147483647, %v3131_v4  ;;  %v955_v14 = vmul.f32 15.0, %v699_v2  ;;  %v700_v15 = vmin.f32 %v444_v6, 1.0 }
 0x1fa   :  { %1719 = vst [vmem:[#allocation5 + $0x500] sm:$0xff] %v1463_v8  ;;  %v3127_v16 = vsel %vm4930_vm1, %v3126_v9, %v952_v40  ;;  %v3139_v17 = vcvt.s32.f32 %v3138_v11  ;;  %v3141_v18 = vand.u32 2147483648, %v954_v1  ;;  %v445_v19 = vmax.f32 %v189_v7, 0.0  ;;  %v194_v8 = vld [vmem:[#allocation2 + $0x558] sm:$0xff] }
 0x1fb   :  { %v1464_v21 = vmul.f32 0.06666667, %v3127_v16  ;;  %v3134_v22 = vor.u32 %v3133_v5, %v3132_v13  ;;  %v3144_v23 = vand.u32 2147483647, %v955_v14  ;;  %v3146_v24 = vcvt.f32.s32 %v955_v14 }
 0x1fc   :  { %vm4942_vm3 = vcmp.lt.f32.partialorder %v3136_v10, 8388608.0  ;;  %v3140_v28 = vand.u32 2147483647, %v3139_v17  ;;  %v956_v30 = vmul.f32 15.0, %v700_v15  ;;  %v701_v31 = vmin.f32 %v445_v19, 1.0 }
 0x1fd   :  { %1720 = vst [vmem:[#allocation5 + $0x508] sm:$0xff] %v1464_v21  ;;  %v3135_v25 = vsel %vm4936_vm2, %v3134_v22, %v953_v27  ;;  %v3147_v32 = vcvt.s32.f32 %v3146_v24  ;;  %v3149_v33 = vand.u32 2147483648, %v955_v14  ;;  %v446_v34 = vmax.f32 %v190_v20, 0.0  ;;  %v195_v21 = vld [vmem:[#allocation2 + $0x560] sm:$0xff] }
 0x1fe   :  { %v1465_v35 = vmul.f32 0.06666667, %v3135_v25  ;;  %v3142_v36 = vor.u32 %v3141_v18, %v3140_v28  ;;  %v3152_v37 = vand.u32 2147483647, %v956_v30  ;;  %v3154_v38 = vcvt.f32.s32 %v956_v30 }
 0x1ff   :  { %vm4948_vm4 = vcmp.lt.f32.partialorder %v3144_v23, 8388608.0  ;;  %v3148_v40 = vand.u32 2147483647, %v3147_v32  ;;  %v957_v41 = vmul.f32 15.0, %v701_v31  ;;  %v702_v42 = vmin.f32 %v446_v34, 1.0 }
 0x200   :  { %1721 = vst [vmem:[#allocation5 + $0x510] sm:$0xff] %v1465_v35  ;;  %v3143_v43 = vsel %vm4942_vm3, %v3142_v36, %v954_v1  ;;  %v3155_v44 = vcvt.s32.f32 %v3154_v38  ;;  %v3157_v45 = vand.u32 2147483648, %v956_v30  ;;  %v447_v46 = vmax.f32 %v191_v26, 0.0  ;;  %v196_v35 = vld [vmem:[#allocation2 + $0x568] sm:$0xff] }
 0x201   :  { %v1466_v48 = vmul.f32 0.06666667, %v3143_v43  ;;  %v3150_v50 = vor.u32 %v3149_v33, %v3148_v40  ;;  %v3160_v51 = vand.u32 2147483647, %v957_v41  ;;  %v3162_v52 = vcvt.f32.s32 %v957_v41 }
 0x202   :  { %vm4954_vm5 = vcmp.lt.f32.partialorder %v3152_v37, 8388608.0  ;;  %v3156_v27 = vand.u32 2147483647, %v3155_v44  ;;  %v958_v53 = vmul.f32 15.0, %v702_v42  ;;  %v703_v54 = vmin.f32 %v447_v46, 1.0 }
 0x203   :  { %1722 = vst [vmem:[#allocation5 + $0x518] sm:$0xff] %v1466_v48  ;;  %v3151_v55 = vsel %vm4948_vm4, %v3150_v50, %v955_v14  ;;  %v3163_v56 = vcvt.s32.f32 %v3162_v52  ;;  %v3165_v57 = vand.u32 2147483648, %v957_v41  ;;  %v448_v58 = vmax.f32 %v192_v47, 0.0  ;;  %v197_v48 = vld [vmem:[#allocation2 + $0x570] sm:$0xff] }
 0x204   :  { %v1467_v60 = vmul.f32 0.06666667, %v3151_v55  ;;  %v3158_v61 = vor.u32 %v3157_v45, %v3156_v27  ;;  %v3168_v62 = vand.u32 2147483647, %v958_v53  ;;  %v3170_v63 = vcvt.f32.s32 %v958_v53 }
 0x205   :  { %vm4960_vm6 = vcmp.lt.f32.partialorder %v3160_v51, 8388608.0  ;;  %v3164_v1 = vand.u32 2147483647, %v3163_v56  ;;  %v959_v2 = vmul.f32 15.0, %v703_v54  ;;  %v704_v3 = vmin.f32 %v448_v58, 1.0 }
 0x206   :  { %1723 = vst [vmem:[#allocation5 + $0x520] sm:$0xff] %v1467_v60  ;;  %v3159_v4 = vsel %vm4954_vm5, %v3158_v61, %v956_v30  ;;  %v3171_v5 = vcvt.s32.f32 %v3170_v63  ;;  %v3173_v6 = vand.u32 2147483648, %v958_v53  ;;  %v449_v7 = vmax.f32 %v193_v59, 0.0  ;;  %v198_v60 = vld [vmem:[#allocation2 + $0x578] sm:$0xff] }
 0x207   :  { %v1468_v9 = vmul.f32 0.06666667, %v3159_v4  ;;  %v3166_v10 = vor.u32 %v3165_v57, %v3164_v1  ;;  %v3176_v11 = vand.u32 2147483647, %v959_v2  ;;  %v3178_v12 = vcvt.f32.s32 %v959_v2 }
 0x208   :  { %vm4966_vm7 = vcmp.lt.f32.partialorder %v3168_v62, 8388608.0  ;;  %v3172_v14 = vand.u32 2147483647, %v3171_v5  ;;  %v960_v15 = vmul.f32 15.0, %v704_v3  ;;  %v705_v16 = vmin.f32 %v449_v7, 1.0 }
 0x209   :  { %1724 = vst [vmem:[#allocation5 + $0x528] sm:$0xff] %v1468_v9  ;;  %v3167_v17 = vsel %vm4960_vm6, %v3166_v10, %v957_v41  ;;  %v3179_v18 = vcvt.s32.f32 %v3178_v12  ;;  %v3181_v19 = vand.u32 2147483648, %v959_v2  ;;  %v450_v20 = vmax.f32 %v194_v8, 0.0  ;;  %v199_v9 = vld [vmem:[#allocation2 + $0x580] sm:$0xff] }
 0x20a   :  { %v1469_v22 = vmul.f32 0.06666667, %v3167_v17  ;;  %v3174_v23 = vor.u32 %v3173_v6, %v3172_v14  ;;  %v3184_v24 = vand.u32 2147483647, %v960_v15  ;;  %v3186_v29 = vcvt.f32.s32 %v960_v15 }
 0x20b   :  { %vm4972_vm8 = vcmp.lt.f32.partialorder %v3176_v11, 8388608.0  ;;  %v3180_v30 = vand.u32 2147483647, %v3179_v18  ;;  %v961_v31 = vmul.f32 15.0, %v705_v16  ;;  %v706_v25 = vmin.f32 %v450_v20, 1.0 }
 0x20c   :  { %1725 = vst [vmem:[#allocation5 + $0x530] sm:$0xff] %v1469_v22  ;;  %v3175_v32 = vsel %vm4966_vm7, %v3174_v23, %v958_v53  ;;  %v3187_v33 = vcvt.s32.f32 %v3186_v29  ;;  %v3189_v34 = vand.u32 2147483648, %v960_v15  ;;  %v451_v26 = vmax.f32 %v195_v21, 0.0  ;;  %v200_v22 = vld [vmem:[#allocation2 + $0x588] sm:$0xff] }
 0x20d   :  { %v1470_v36 = vmul.f32 0.06666667, %v3175_v32  ;;  %v3182_v37 = vor.u32 %v3181_v19, %v3180_v30  ;;  %v3192_v38 = vand.u32 2147483647, %v961_v31  ;;  %v3194_v39 = vcvt.f32.s32 %v961_v31 }
 0x20e   :  { %vm4978_vm9 = vcmp.lt.f32.partialorder %v3184_v24, 8388608.0  ;;  %v3188_v41 = vand.u32 2147483647, %v3187_v33  ;;  %v962_v42 = vmul.f32 15.0, %v706_v25  ;;  %v707_v43 = vmin.f32 %v451_v26, 1.0 }
 0x20f   :  { %1726 = vst [vmem:[#allocation5 + $0x538] sm:$0xff] %v1470_v36  ;;  %v3183_v44 = vsel %vm4972_vm8, %v3182_v37, %v959_v2  ;;  %v3195_v45 = vcvt.s32.f32 %v3194_v39  ;;  %v3197_v46 = vand.u32 2147483648, %v961_v31  ;;  %v452_v47 = vmax.f32 %v196_v35, 0.0  ;;  %v201_v36 = vld [vmem:[#allocation2 + $0x590] sm:$0xff] }
 0x210   :  { %v1471_v50 = vmul.f32 0.06666667, %v3183_v44  ;;  %v3190_v51 = vor.u32 %v3189_v34, %v3188_v41  ;;  %v3200_v52 = vand.u32 2147483647, %v962_v42  ;;  %v3202_v49 = vcvt.f32.s32 %v962_v42 }
 0x211   :  { %vm4984_vm10 = vcmp.lt.f32.partialorder %v3192_v38, 8388608.0  ;;  %v3196_v53 = vand.u32 2147483647, %v3195_v45  ;;  %v963_v54 = vmul.f32 15.0, %v707_v43  ;;  %v708_v55 = vmin.f32 %v452_v47, 1.0 }
 0x212   :  { %1727 = vst [vmem:[#allocation5 + $0x540] sm:$0xff] %v1471_v50  ;;  %v3191_v56 = vsel %vm4978_vm9, %v3190_v51, %v960_v15  ;;  %v3203_v57 = vcvt.s32.f32 %v3202_v49  ;;  %v3205_v58 = vand.u32 2147483648, %v962_v42  ;;  %v453_v59 = vmax.f32 %v197_v48, 0.0  ;;  %v202_v50 = vld [vmem:[#allocation2 + $0x598] sm:$0xff] }
 0x213   :  { %v1472_v61 = vmul.f32 0.06666667, %v3191_v56  ;;  %v3198_v62 = vor.u32 %v3197_v46, %v3196_v53  ;;  %v3208_v63 = vand.u32 2147483647, %v963_v54  ;;  %v3210_v0 = vcvt.f32.s32 %v963_v54 }
 0x214   :  { %vm4990_vm11 = vcmp.lt.f32.partialorder %v3200_v52, 8388608.0  ;;  %v3204_v2 = vand.u32 2147483647, %v3203_v57  ;;  %v964_v3 = vmul.f32 15.0, %v708_v55  ;;  %v709_v4 = vmin.f32 %v453_v59, 1.0 }
 0x215   :  { %1728 = vst [vmem:[#allocation5 + $0x548] sm:$0xff] %v1472_v61  ;;  %v3199_v5 = vsel %vm4984_vm10, %v3198_v62, %v961_v31  ;;  %v3211_v6 = vcvt.s32.f32 %v3210_v0  ;;  %v3213_v7 = vand.u32 2147483648, %v963_v54  ;;  %v454_v8 = vmax.f32 %v198_v60, 0.0  ;;  %v203_v61 = vld [vmem:[#allocation2 + $0x5a0] sm:$0xff] }
 0x216   :  { %v1473_v10 = vmul.f32 0.06666667, %v3199_v5  ;;  %v3206_v11 = vor.u32 %v3205_v58, %v3204_v2  ;;  %v3216_v12 = vand.u32 2147483647, %v964_v3  ;;  %v3218_v13 = vcvt.f32.s32 %v964_v3 }
 0x217   :  { %vm4996_vm12 = vcmp.lt.f32.partialorder %v3208_v63, 8388608.0  ;;  %v3212_v15 = vand.u32 2147483647, %v3211_v6  ;;  %v965_v16 = vmul.f32 15.0, %v709_v4  ;;  %v710_v17 = vmin.f32 %v454_v8, 1.0 }
 0x218   :  { %1729 = vst [vmem:[#allocation5 + $0x550] sm:$0xff] %v1473_v10  ;;  %v3207_v18 = vsel %vm4990_vm11, %v3206_v11, %v962_v42  ;;  %v3219_v19 = vcvt.s32.f32 %v3218_v13  ;;  %v3221_v20 = vand.u32 2147483648, %v964_v3  ;;  %v455_v21 = vmax.f32 %v199_v9, 0.0  ;;  %v204_v10 = vld [vmem:[#allocation2 + $0x5a8] sm:$0xff] }
 0x219   :  { %v1474_v23 = vmul.f32 0.06666667, %v3207_v18  ;;  %v3214_v24 = vor.u32 %v3213_v7, %v3212_v15  ;;  %v3224_v29 = vand.u32 2147483647, %v965_v16  ;;  %v3226_v28 = vcvt.f32.s32 %v965_v16 }
 0x21a   :  { %vm5002_vm13 = vcmp.lt.f32.partialorder %v3216_v12, 8388608.0  ;;  %v3220_v31 = vand.u32 2147483647, %v3219_v19  ;;  %v966_v25 = vmul.f32 15.0, %v710_v17  ;;  %v711_v32 = vmin.f32 %v455_v21, 1.0 }
 0x21b   :  { %1730 = vst [vmem:[#allocation5 + $0x558] sm:$0xff] %v1474_v23  ;;  %v3215_v33 = vsel %vm4996_vm12, %v3214_v24, %v963_v54  ;;  %v3227_v34 = vcvt.s32.f32 %v3226_v28  ;;  %v3229_v26 = vand.u32 2147483648, %v965_v16  ;;  %v456_v35 = vmax.f32 %v200_v22, 0.0  ;;  %v205_v23 = vld [vmem:[#allocation2 + $0x5b0] sm:$0xff] }
 0x21c   :  { %v1475_v37 = vmul.f32 0.06666667, %v3215_v33  ;;  %v3222_v38 = vor.u32 %v3221_v20, %v3220_v31  ;;  %v3232_v39 = vand.u32 2147483647, %v966_v25  ;;  %v3234_v40 = vcvt.f32.s32 %v966_v25 }
 0x21d   :  { %vm5008_vm14 = vcmp.lt.f32.partialorder %v3224_v29, 8388608.0  ;;  %v3228_v42 = vand.u32 2147483647, %v3227_v34  ;;  %v967_v43 = vmul.f32 15.0, %v711_v32  ;;  %v712_v44 = vmin.f32 %v456_v35, 1.0 }
 0x21e   :  { %1731 = vst [vmem:[#allocation5 + $0x560] sm:$0xff] %v1475_v37  ;;  %v3223_v45 = vsel %vm5002_vm13, %v3222_v38, %v964_v3  ;;  %v3235_v46 = vcvt.s32.f32 %v3234_v40  ;;  %v3237_v47 = vand.u32 2147483648, %v966_v25  ;;  %v457_v48 = vmax.f32 %v201_v36, 0.0  ;;  %v206_v37 = vld [vmem:[#allocation2 + $0x5b8] sm:$0xff] }
 0x21f   :  { %v1476_v51 = vmul.f32 0.06666667, %v3223_v45  ;;  %v3230_v52 = vor.u32 %v3229_v26, %v3228_v42  ;;  %v3240_v49 = vand.u32 2147483647, %v967_v43  ;;  %v3242_v27 = vcvt.f32.s32 %v967_v43 }
 0x220   :  { %vm5014_vm15 = vcmp.lt.f32.partialorder %v3232_v39, 8388608.0  ;;  %v3236_v54 = vand.u32 2147483647, %v3235_v46  ;;  %v968_v55 = vmul.f32 15.0, %v712_v44  ;;  %v713_v56 = vmin.f32 %v457_v48, 1.0 }
 0x221   :  { %1732 = vst [vmem:[#allocation5 + $0x568] sm:$0xff] %v1476_v51  ;;  %v3231_v57 = vsel %vm5008_vm14, %v3230_v52, %v965_v16  ;;  %v3243_v58 = vcvt.s32.f32 %v3242_v27  ;;  %v3245_v59 = vand.u32 2147483648, %v967_v43  ;;  %v458_v60 = vmax.f32 %v202_v50, 0.0  ;;  %v207_v51 = vld [vmem:[#allocation2 + $0x5c0] sm:$0xff] }
 0x222   :  { %v1477_v62 = vmul.f32 0.06666667, %v3231_v57  ;;  %v3238_v63 = vor.u32 %v3237_v47, %v3236_v54  ;;  %v3248_v0 = vand.u32 2147483647, %v968_v55  ;;  %v3250_v1 = vcvt.f32.s32 %v968_v55 }
 0x223   :  { %vm5020_vm0 = vcmp.lt.f32.partialorder %v3240_v49, 8388608.0  ;;  %v3244_v3 = vand.u32 2147483647, %v3243_v58  ;;  %v969_v4 = vmul.f32 15.0, %v713_v56  ;;  %v714_v5 = vmin.f32 %v458_v60, 1.0 }
 0x224   :  { %1733 = vst [vmem:[#allocation5 + $0x570] sm:$0xff] %v1477_v62  ;;  %v3239_v6 = vsel %vm5014_vm15, %v3238_v63, %v966_v25  ;;  %v3251_v7 = vcvt.s32.f32 %v3250_v1  ;;  %v3253_v8 = vand.u32 2147483648, %v968_v55  ;;  %v459_v9 = vmax.f32 %v203_v61, 0.0  ;;  %v208_v62 = vld [vmem:[#allocation2 + $0x5c8] sm:$0xff] }
 0x225   :  { %v1478_v11 = vmul.f32 0.06666667, %v3239_v6  ;;  %v3246_v12 = vor.u32 %v3245_v59, %v3244_v3  ;;  %v3256_v13 = vand.u32 2147483647, %v969_v4  ;;  %v3258_v14 = vcvt.f32.s32 %v969_v4 }
 0x226   :  { %vm5026_vm1 = vcmp.lt.f32.partialorder %v3248_v0, 8388608.0  ;;  %v3252_v16 = vand.u32 2147483647, %v3251_v7  ;;  %v970_v17 = vmul.f32 15.0, %v714_v5  ;;  %v715_v18 = vmin.f32 %v459_v9, 1.0 }
 0x227   :  { %1734 = vst [vmem:[#allocation5 + $0x578] sm:$0xff] %v1478_v11  ;;  %v3247_v19 = vsel %vm5020_vm0, %v3246_v12, %v967_v43  ;;  %v3259_v20 = vcvt.s32.f32 %v3258_v14  ;;  %v3261_v21 = vand.u32 2147483648, %v969_v4  ;;  %v460_v22 = vmax.f32 %v204_v10, 0.0  ;;  %v209_v11 = vld [vmem:[#allocation2 + $0x5d0] sm:$0xff] }
 0x228   :  { %v1479_v24 = vmul.f32 0.06666667, %v3247_v19  ;;  %v3254_v29 = vor.u32 %v3253_v8, %v3252_v16  ;;  %v3264_v28 = vand.u32 2147483647, %v970_v17  ;;  %v3266_v30 = vcvt.f32.s32 %v970_v17 }
 0x229   :  { %vm5032_vm2 = vcmp.lt.f32.partialorder %v3256_v13, 8388608.0  ;;  %v3260_v25 = vand.u32 2147483647, %v3259_v20  ;;  %v971_v32 = vmul.f32 15.0, %v715_v18  ;;  %v716_v33 = vmin.f32 %v460_v22, 1.0 }
 0x22a   :  { %1735 = vst [vmem:[#allocation5 + $0x580] sm:$0xff] %v1479_v24  ;;  %v3255_v34 = vsel %vm5026_vm1, %v3254_v29, %v968_v55  ;;  %v3267_v26 = vcvt.s32.f32 %v3266_v30  ;;  %v3269_v35 = vand.u32 2147483648, %v970_v17  ;;  %v461_v36 = vmax.f32 %v205_v23, 0.0  ;;  %v210_v24 = vld [vmem:[#allocation2 + $0x5d8] sm:$0xff] }
 0x22b   :  { %v1480_v38 = vmul.f32 0.06666667, %v3255_v34  ;;  %v3262_v39 = vor.u32 %v3261_v21, %v3260_v25  ;;  %v3272_v40 = vand.u32 2147483647, %v971_v32  ;;  %v3274_v41 = vcvt.f32.s32 %v971_v32 }
 0x22c   :  { %vm5038_vm3 = vcmp.lt.f32.partialorder %v3264_v28, 8388608.0  ;;  %v3268_v43 = vand.u32 2147483647, %v3267_v26  ;;  %v972_v44 = vmul.f32 15.0, %v716_v33  ;;  %v717_v45 = vmin.f32 %v461_v36, 1.0 }
 0x22d   :  { %1736 = vst [vmem:[#allocation5 + $0x588] sm:$0xff] %v1480_v38  ;;  %v3263_v46 = vsel %vm5032_vm2, %v3262_v39, %v969_v4  ;;  %v3275_v47 = vcvt.s32.f32 %v3274_v41  ;;  %v3277_v48 = vand.u32 2147483648, %v971_v32  ;;  %v462_v50 = vmax.f32 %v206_v37, 0.0  ;;  %v211_v38 = vld [vmem:[#allocation2 + $0x5e0] sm:$0xff] }
 0x22e   :  { %v1481_v52 = vmul.f32 0.06666667, %v3263_v46  ;;  %v3270_v49 = vor.u32 %v3269_v35, %v3268_v43  ;;  %v3280_v27 = vand.u32 2147483647, %v972_v44  ;;  %v3282_v53 = vcvt.f32.s32 %v972_v44 }
 0x22f   :  { %vm5044_vm4 = vcmp.lt.f32.partialorder %v3272_v40, 8388608.0  ;;  %v3276_v55 = vand.u32 2147483647, %v3275_v47  ;;  %v973_v56 = vmul.f32 15.0, %v717_v45  ;;  %v718_v57 = vmin.f32 %v462_v50, 1.0 }
 0x230   :  { %1737 = vst [vmem:[#allocation5 + $0x590] sm:$0xff] %v1481_v52  ;;  %v3271_v58 = vsel %vm5038_vm3, %v3270_v49, %v970_v17  ;;  %v3283_v59 = vcvt.s32.f32 %v3282_v53  ;;  %v3285_v60 = vand.u32 2147483648, %v972_v44  ;;  %v463_v61 = vmax.f32 %v207_v51, 0.0  ;;  %v212_v52 = vld [vmem:[#allocation2 + $0x5e8] sm:$0xff] }
 0x231   :  { %v1482_v63 = vmul.f32 0.06666667, %v3271_v58  ;;  %v3278_v0 = vor.u32 %v3277_v48, %v3276_v55  ;;  %v3288_v1 = vand.u32 2147483647, %v973_v56  ;;  %v3290_v2 = vcvt.f32.s32 %v973_v56 }
 0x232   :  { %vm5050_vm5 = vcmp.lt.f32.partialorder %v3280_v27, 8388608.0  ;;  %v3284_v4 = vand.u32 2147483647, %v3283_v59  ;;  %v974_v5 = vmul.f32 15.0, %v718_v57  ;;  %v719_v6 = vmin.f32 %v463_v61, 1.0 }
 0x233   :  { %1738 = vst [vmem:[#allocation5 + $0x598] sm:$0xff] %v1482_v63  ;;  %v3279_v7 = vsel %vm5044_vm4, %v3278_v0, %v971_v32  ;;  %v3291_v8 = vcvt.s32.f32 %v3290_v2  ;;  %v3293_v9 = vand.u32 2147483648, %v973_v56  ;;  %v464_v10 = vmax.f32 %v208_v62, 0.0  ;;  %v213_v63 = vld [vmem:[#allocation2 + $0x5f0] sm:$0xff] }
 0x234   :  { %v1483_v12 = vmul.f32 0.06666667, %v3279_v7  ;;  %v3286_v13 = vor.u32 %v3285_v60, %v3284_v4  ;;  %v3296_v14 = vand.u32 2147483647, %v974_v5  ;;  %v3298_v15 = vcvt.f32.s32 %v974_v5 }
 0x235   :  { %vm5056_vm6 = vcmp.lt.f32.partialorder %v3288_v1, 8388608.0  ;;  %v3292_v17 = vand.u32 2147483647, %v3291_v8  ;;  %v975_v18 = vmul.f32 15.0, %v719_v6  ;;  %v720_v19 = vmin.f32 %v464_v10, 1.0 }
 0x236   :  { %1739 = vst [vmem:[#allocation5 + $0x5a0] sm:$0xff] %v1483_v12  ;;  %v3287_v20 = vsel %vm5050_vm5, %v3286_v13, %v972_v44  ;;  %v3299_v21 = vcvt.s32.f32 %v3298_v15  ;;  %v3301_v22 = vand.u32 2147483648, %v974_v5  ;;  %v465_v23 = vmax.f32 %v209_v11, 0.0  ;;  %v214_v12 = vld [vmem:[#allocation2 + $0x5f8] sm:$0xff] }
 0x237   :  { %v1484_v29 = vmul.f32 0.06666667, %v3287_v20  ;;  %v3294_v28 = vor.u32 %v3293_v9, %v3292_v17  ;;  %v3304_v30 = vand.u32 2147483647, %v975_v18  ;;  %v3306_v31 = vcvt.f32.s32 %v975_v18 }
 0x238   :  { %vm5062_vm7 = vcmp.lt.f32.partialorder %v3296_v14, 8388608.0  ;;  %v3300_v32 = vand.u32 2147483647, %v3299_v21  ;;  %v976_v33 = vmul.f32 15.0, %v720_v19  ;;  %v721_v34 = vmin.f32 %v465_v23, 1.0 }
 0x239   :  { %1740 = vst [vmem:[#allocation5 + $0x5a8] sm:$0xff] %v1484_v29  ;;  %v3295_v26 = vsel %vm5056_vm6, %v3294_v28, %v973_v56  ;;  %v3307_v35 = vcvt.s32.f32 %v3306_v31  ;;  %v3309_v36 = vand.u32 2147483648, %v975_v18  ;;  %v466_v37 = vmax.f32 %v210_v24, 0.0  ;;  %v215_v29 = vld [vmem:[#allocation2 + $0x600] sm:$0xff] }
 0x23a   :  { %v1485_v39 = vmul.f32 0.06666667, %v3295_v26  ;;  %v3302_v40 = vor.u32 %v3301_v22, %v3300_v32  ;;  %v3312_v41 = vand.u32 2147483647, %v976_v33  ;;  %v3314_v42 = vcvt.f32.s32 %v976_v33 }
 0x23b   :  { %vm5068_vm8 = vcmp.lt.f32.partialorder %v3304_v30, 8388608.0  ;;  %v3308_v44 = vand.u32 2147483647, %v3307_v35  ;;  %v977_v45 = vmul.f32 15.0, %v721_v34  ;;  %v722_v46 = vmin.f32 %v466_v37, 1.0 }
 0x23c   :  { %1741 = vst [vmem:[#allocation5 + $0x5b0] sm:$0xff] %v1485_v39  ;;  %v3303_v47 = vsel %vm5062_vm7, %v3302_v40, %v974_v5  ;;  %v3315_v48 = vcvt.s32.f32 %v3314_v42  ;;  %v3317_v50 = vand.u32 2147483648, %v976_v33  ;;  %v467_v51 = vmax.f32 %v211_v38, 0.0  ;;  %v216_v39 = vld [vmem:[#allocation2 + $0x608] sm:$0xff] }
 0x23d   :  { %v1486_v49 = vmul.f32 0.06666667, %v3303_v47  ;;  %v3310_v27 = vor.u32 %v3309_v36, %v3308_v44  ;;  %v3320_v53 = vand.u32 2147483647, %v977_v45  ;;  %v3322_v54 = vcvt.f32.s32 %v977_v45 }
 0x23e   :  { %vm5074_vm9 = vcmp.lt.f32.partialorder %v3312_v41, 8388608.0  ;;  %v3316_v56 = vand.u32 2147483647, %v3315_v48  ;;  %v978_v57 = vmul.f32 15.0, %v722_v46  ;;  %v723_v58 = vmin.f32 %v467_v51, 1.0 }
 0x23f   :  { %1742 = vst [vmem:[#allocation5 + $0x5b8] sm:$0xff] %v1486_v49  ;;  %v3311_v59 = vsel %vm5068_vm8, %v3310_v27, %v975_v18  ;;  %v3323_v60 = vcvt.s32.f32 %v3322_v54  ;;  %v3325_v61 = vand.u32 2147483648, %v977_v45  ;;  %v468_v62 = vmax.f32 %v212_v52, 0.0  ;;  %v217_v49 = vld [vmem:[#allocation2 + $0x610] sm:$0xff] }
 0x240   :  { %v1487_v0 = vmul.f32 0.06666667, %v3311_v59  ;;  %v3318_v1 = vor.u32 %v3317_v50, %v3316_v56  ;;  %v3328_v2 = vand.u32 2147483647, %v978_v57  ;;  %v3330_v3 = vcvt.f32.s32 %v978_v57 }
 0x241   :  { %vm5080_vm10 = vcmp.lt.f32.partialorder %v3320_v53, 8388608.0  ;;  %v3324_v5 = vand.u32 2147483647, %v3323_v60  ;;  %v979_v6 = vmul.f32 15.0, %v723_v58  ;;  %v724_v7 = vmin.f32 %v468_v62, 1.0 }
 0x242   :  { %1743 = vst [vmem:[#allocation5 + $0x5c0] sm:$0xff] %v1487_v0  ;;  %v3319_v8 = vsel %vm5074_vm9, %v3318_v1, %v976_v33  ;;  %v3331_v9 = vcvt.s32.f32 %v3330_v3  ;;  %v3333_v10 = vand.u32 2147483648, %v978_v57  ;;  %v469_v11 = vmax.f32 %v213_v63, 0.0  ;;  %v218_v0 = vld [vmem:[#allocation2 + $0x618] sm:$0xff] }
 0x243   :  { %v1488_v13 = vmul.f32 0.06666667, %v3319_v8  ;;  %v3326_v14 = vor.u32 %v3325_v61, %v3324_v5  ;;  %v3336_v15 = vand.u32 2147483647, %v979_v6  ;;  %v3338_v16 = vcvt.f32.s32 %v979_v6 }
 0x244   :  { %vm5086_vm11 = vcmp.lt.f32.partialorder %v3328_v2, 8388608.0  ;;  %v3332_v18 = vand.u32 2147483647, %v3331_v9  ;;  %v980_v19 = vmul.f32 15.0, %v724_v7  ;;  %v725_v20 = vmin.f32 %v469_v11, 1.0 }
 0x245   :  { %1744 = vst [vmem:[#allocation5 + $0x5c8] sm:$0xff] %v1488_v13  ;;  %v3327_v21 = vsel %vm5080_vm10, %v3326_v14, %v977_v45  ;;  %v3339_v22 = vcvt.s32.f32 %v3338_v16  ;;  %v3341_v23 = vand.u32 2147483648, %v979_v6  ;;  %v470_v24 = vmax.f32 %v214_v12, 0.0  ;;  %v219_v13 = vld [vmem:[#allocation2 + $0x620] sm:$0xff] }
 0x246   :  { %v1489_v28 = vmul.f32 0.06666667, %v3327_v21  ;;  %v3334_v30 = vor.u32 %v3333_v10, %v3332_v18  ;;  %v3344_v31 = vand.u32 2147483647, %v980_v19  ;;  %v3346_v25 = vcvt.f32.s32 %v980_v19 }
 0x247   :  { %vm5092_vm12 = vcmp.lt.f32.partialorder %v3336_v15, 8388608.0  ;;  %v3340_v33 = vand.u32 2147483647, %v3339_v22  ;;  %v981_v34 = vmul.f32 15.0, %v725_v20  ;;  %v726_v26 = vmin.f32 %v470_v24, 1.0 }
 0x248   :  { %1745 = vst [vmem:[#allocation5 + $0x5d0] sm:$0xff] %v1489_v28  ;;  %v3335_v35 = vsel %vm5086_vm11, %v3334_v30, %v978_v57  ;;  %v3347_v36 = vcvt.s32.f32 %v3346_v25  ;;  %v3349_v37 = vand.u32 2147483648, %v980_v19  ;;  %v471_v38 = vmax.f32 %v215_v29, 0.0  ;;  %v220_v28 = vld [vmem:[#allocation2 + $0x628] sm:$0xff] }
 0x249   :  { %v1490_v40 = vmul.f32 0.06666667, %v3335_v35  ;;  %v3342_v41 = vor.u32 %v3341_v23, %v3340_v33  ;;  %v3352_v42 = vand.u32 2147483647, %v981_v34  ;;  %v3354_v43 = vcvt.f32.s32 %v981_v34 }
 0x24a   :  { %vm5098_vm13 = vcmp.lt.f32.partialorder %v3344_v31, 8388608.0  ;;  %v3348_v45 = vand.u32 2147483647, %v3347_v36  ;;  %v982_v46 = vmul.f32 15.0, %v726_v26  ;;  %v727_v47 = vmin.f32 %v471_v38, 1.0 }
 0x24b   :  { %1746 = vst [vmem:[#allocation5 + $0x5d8] sm:$0xff] %v1490_v40  ;;  %v3343_v48 = vsel %vm5092_vm12, %v3342_v41, %v979_v6  ;;  %v3355_v50 = vcvt.s32.f32 %v3354_v43  ;;  %v3357_v51 = vand.u32 2147483648, %v981_v34  ;;  %v472_v52 = vmax.f32 %v216_v39, 0.0  ;;  %v221_v40 = vld [vmem:[#allocation2 + $0x630] sm:$0xff] }
 0x24c   :  { %v1491_v27 = vmul.f32 0.06666667, %v3343_v48  ;;  %v3350_v53 = vor.u32 %v3349_v37, %v3348_v45  ;;  %v3360_v54 = vand.u32 2147483647, %v982_v46  ;;  %v3362_v55 = vcvt.f32.s32 %v982_v46 }
 0x24d   :  { %vm5104_vm14 = vcmp.lt.f32.partialorder %v3352_v42, 8388608.0  ;;  %v3356_v57 = vand.u32 2147483647, %v3355_v50  ;;  %v983_v58 = vmul.f32 15.0, %v727_v47  ;;  %v728_v59 = vmin.f32 %v472_v52, 1.0 }
 0x24e   :  { %1747 = vst [vmem:[#allocation5 + $0x5e0] sm:$0xff] %v1491_v27  ;;  %v3351_v60 = vsel %vm5098_vm13, %v3350_v53, %v980_v19  ;;  %v3363_v61 = vcvt.s32.f32 %v3362_v55  ;;  %v3365_v62 = vand.u32 2147483648, %v982_v46  ;;  %v473_v63 = vmax.f32 %v217_v49, 0.0  ;;  %v222_v27 = vld [vmem:[#allocation2 + $0x638] sm:$0xff] }
 0x24f   :  { %v1492_v1 = vmul.f32 0.06666667, %v3351_v60  ;;  %v3358_v2 = vor.u32 %v3357_v51, %v3356_v57  ;;  %v3368_v3 = vand.u32 2147483647, %v983_v58  ;;  %v3370_v4 = vcvt.f32.s32 %v983_v58 }
 0x250   :  { %vm5110_vm15 = vcmp.lt.f32.partialorder %v3360_v54, 8388608.0  ;;  %v3364_v6 = vand.u32 2147483647, %v3363_v61  ;;  %v984_v7 = vmul.f32 15.0, %v728_v59  ;;  %v729_v8 = vmin.f32 %v473_v63, 1.0 }
 0x251   :  { %1748 = vst [vmem:[#allocation5 + $0x5e8] sm:$0xff] %v1492_v1  ;;  %v3359_v9 = vsel %vm5104_vm14, %v3358_v2, %v981_v34  ;;  %v3371_v10 = vcvt.s32.f32 %v3370_v4  ;;  %v3373_v11 = vand.u32 2147483648, %v983_v58  ;;  %v474_v12 = vmax.f32 %v218_v0, 0.0  ;;  %v223_v1 = vld [vmem:[#allocation2 + $0x640] sm:$0xff] }
 0x252   :  { %v1493_v14 = vmul.f32 0.06666667, %v3359_v9  ;;  %v3366_v15 = vor.u32 %v3365_v62, %v3364_v6  ;;  %v3376_v16 = vand.u32 2147483647, %v984_v7  ;;  %v3378_v17 = vcvt.f32.s32 %v984_v7 }
 0x253   :  { %vm5116_vm0 = vcmp.lt.f32.partialorder %v3368_v3, 8388608.0  ;;  %v3372_v19 = vand.u32 2147483647, %v3371_v10  ;;  %v985_v20 = vmul.f32 15.0, %v729_v8  ;;  %v730_v21 = vmin.f32 %v474_v12, 1.0 }
 0x254   :  { %1749 = vst [vmem:[#allocation5 + $0x5f0] sm:$0xff] %v1493_v14  ;;  %v3367_v22 = vsel %vm5110_vm15, %v3366_v15, %v982_v46  ;;  %v3379_v23 = vcvt.s32.f32 %v3378_v17  ;;  %v3381_v24 = vand.u32 2147483648, %v984_v7  ;;  %v475_v29 = vmax.f32 %v219_v13, 0.0  ;;  %v224_v14 = vld [vmem:[#allocation2 + $0x648] sm:$0xff] }
 0x255   :  { %v1494_v30 = vmul.f32 0.06666667, %v3367_v22  ;;  %v3374_v31 = vor.u32 %v3373_v11, %v3372_v19  ;;  %v3384_v25 = vand.u32 2147483647, %v985_v20  ;;  %v3386_v32 = vcvt.f32.s32 %v985_v20 }
 0x256   :  { %vm5122_vm1 = vcmp.lt.f32.partialorder %v3376_v16, 8388608.0  ;;  %v3380_v34 = vand.u32 2147483647, %v3379_v23  ;;  %v986_v26 = vmul.f32 15.0, %v730_v21  ;;  %v731_v35 = vmin.f32 %v475_v29, 1.0 }
 0x257   :  { %1750 = vst [vmem:[#allocation5 + $0x5f8] sm:$0xff] %v1494_v30  ;;  %v3375_v36 = vsel %vm5116_vm0, %v3374_v31, %v983_v58  ;;  %v3387_v37 = vcvt.s32.f32 %v3386_v32  ;;  %v3389_v38 = vand.u32 2147483648, %v985_v20  ;;  %v476_v39 = vmax.f32 %v220_v28, 0.0  ;;  %v225_v30 = vld [vmem:[#allocation2 + $0x650] sm:$0xff] }
 0x258   :  { %v1495_v41 = vmul.f32 0.06666667, %v3375_v36  ;;  %v3382_v42 = vor.u32 %v3381_v24, %v3380_v34  ;;  %v3392_v43 = vand.u32 2147483647, %v986_v26  ;;  %v3394_v44 = vcvt.f32.s32 %v986_v26 }
 0x259   :  { %vm5128_vm2 = vcmp.lt.f32.partialorder %v3384_v25, 8388608.0  ;;  %v3388_v46 = vand.u32 2147483647, %v3387_v37  ;;  %v987_v47 = vmul.f32 15.0, %v731_v35  ;;  %v732_v48 = vmin.f32 %v476_v39, 1.0 }
 0x25a   :  { %1751 = vst [vmem:[#allocation5 + $0x600] sm:$0xff] %v1495_v41  ;;  %v3383_v50 = vsel %vm5122_vm1, %v3382_v42, %v984_v7  ;;  %v3395_v51 = vcvt.s32.f32 %v3394_v44  ;;  %v3397_v52 = vand.u32 2147483648, %v986_v26  ;;  %v477_v49 = vmax.f32 %v221_v40, 0.0  ;;  %v226_v41 = vld [vmem:[#allocation2 + $0x658] sm:$0xff] }
 0x25b   :  { %v1496_v53 = vmul.f32 0.06666667, %v3383_v50  ;;  %v3390_v54 = vor.u32 %v3389_v38, %v3388_v46  ;;  %v3400_v55 = vand.u32 2147483647, %v987_v47  ;;  %v3402_v56 = vcvt.f32.s32 %v987_v47 }
 0x25c   :  { %vm5134_vm3 = vcmp.lt.f32.partialorder %v3392_v43, 8388608.0  ;;  %v3396_v58 = vand.u32 2147483647, %v3395_v51  ;;  %v988_v59 = vmul.f32 15.0, %v732_v48  ;;  %v733_v60 = vmin.f32 %v477_v49, 1.0 }
 0x25d   :  { %1752 = vst [vmem:[#allocation5 + $0x608] sm:$0xff] %v1496_v53  ;;  %v3391_v61 = vsel %vm5128_vm2, %v3390_v54, %v985_v20  ;;  %v3403_v62 = vcvt.s32.f32 %v3402_v56  ;;  %v3405_v63 = vand.u32 2147483648, %v987_v47  ;;  %v478_v0 = vmax.f32 %v222_v27, 0.0  ;;  %v227_v53 = vld [vmem:[#allocation2 + $0x660] sm:$0xff] }
 0x25e   :  { %v1497_v2 = vmul.f32 0.06666667, %v3391_v61  ;;  %v3398_v3 = vor.u32 %v3397_v52, %v3396_v58  ;;  %v3408_v4 = vand.u32 2147483647, %v988_v59  ;;  %v3410_v5 = vcvt.f32.s32 %v988_v59 }
 0x25f   :  { %vm5140_vm4 = vcmp.lt.f32.partialorder %v3400_v55, 8388608.0  ;;  %v3404_v7 = vand.u32 2147483647, %v3403_v62  ;;  %v989_v8 = vmul.f32 15.0, %v733_v60  ;;  %v734_v9 = vmin.f32 %v478_v0, 1.0 }
 0x260   :  { %1753 = vst [vmem:[#allocation5 + $0x610] sm:$0xff] %v1497_v2  ;;  %v3399_v10 = vsel %vm5134_vm3, %v3398_v3, %v986_v26  ;;  %v3411_v11 = vcvt.s32.f32 %v3410_v5  ;;  %v3413_v12 = vand.u32 2147483648, %v988_v59  ;;  %v479_v13 = vmax.f32 %v223_v1, 0.0  ;;  %v228_v2 = vld [vmem:[#allocation2 + $0x668] sm:$0xff] }
 0x261   :  { %v1498_v15 = vmul.f32 0.06666667, %v3399_v10  ;;  %v3406_v16 = vor.u32 %v3405_v63, %v3404_v7  ;;  %v3416_v17 = vand.u32 2147483647, %v989_v8  ;;  %v3418_v18 = vcvt.f32.s32 %v989_v8 }
 0x262   :  { %vm5146_vm5 = vcmp.lt.f32.partialorder %v3408_v4, 8388608.0  ;;  %v3412_v20 = vand.u32 2147483647, %v3411_v11  ;;  %v990_v21 = vmul.f32 15.0, %v734_v9  ;;  %v735_v22 = vmin.f32 %v479_v13, 1.0 }
 0x263   :  { %1754 = vst [vmem:[#allocation5 + $0x618] sm:$0xff] %v1498_v15  ;;  %v3407_v23 = vsel %vm5140_vm4, %v3406_v16, %v987_v47  ;;  %v3419_v24 = vcvt.s32.f32 %v3418_v18  ;;  %v3421_v29 = vand.u32 2147483648, %v989_v8  ;;  %v480_v28 = vmax.f32 %v224_v14, 0.0  ;;  %v229_v15 = vld [vmem:[#allocation2 + $0x670] sm:$0xff] }
 0x264   :  { %v1499_v31 = vmul.f32 0.06666667, %v3407_v23  ;;  %v3414_v25 = vor.u32 %v3413_v12, %v3412_v20  ;;  %v3424_v32 = vand.u32 2147483647, %v990_v21  ;;  %v3426_v33 = vcvt.f32.s32 %v990_v21 }
 0x265   :  { %vm5152_vm6 = vcmp.lt.f32.partialorder %v3416_v17, 8388608.0  ;;  %v3420_v26 = vand.u32 2147483647, %v3419_v24  ;;  %v991_v35 = vmul.f32 15.0, %v735_v22  ;;  %v736_v36 = vmin.f32 %v480_v28, 1.0 }
 0x266   :  { %1755 = vst [vmem:[#allocation5 + $0x620] sm:$0xff] %v1499_v31  ;;  %v3415_v37 = vsel %vm5146_vm5, %v3414_v25, %v988_v59  ;;  %v3427_v38 = vcvt.s32.f32 %v3426_v33  ;;  %v3429_v39 = vand.u32 2147483648, %v990_v21  ;;  %v481_v40 = vmax.f32 %v225_v30, 0.0  ;;  %v230_v31 = vld [vmem:[#allocation2 + $0x678] sm:$0xff] }
 0x267   :  { %v1500_v42 = vmul.f32 0.06666667, %v3415_v37  ;;  %v3422_v43 = vor.u32 %v3421_v29, %v3420_v26  ;;  %v3432_v44 = vand.u32 2147483647, %v991_v35  ;;  %v3434_v45 = vcvt.f32.s32 %v991_v35 }
 0x268   :  { %vm5158_vm7 = vcmp.lt.f32.partialorder %v3424_v32, 8388608.0  ;;  %v3428_v47 = vand.u32 2147483647, %v3427_v38  ;;  %v992_v48 = vmul.f32 15.0, %v736_v36  ;;  %v737_v50 = vmin.f32 %v481_v40, 1.0 }
 0x269   :  { %1756 = vst [vmem:[#allocation5 + $0x628] sm:$0xff] %v1500_v42  ;;  %v3423_v51 = vsel %vm5152_vm6, %v3422_v43, %v989_v8  ;;  %v3435_v52 = vcvt.s32.f32 %v3434_v45  ;;  %v3437_v49 = vand.u32 2147483648, %v991_v35  ;;  %v482_v27 = vmax.f32 %v226_v41, 0.0  ;;  %v231_v42 = vld [vmem:[#allocation2 + $0x680] sm:$0xff] }
 0x26a   :  { %v1501_v54 = vmul.f32 0.06666667, %v3423_v51  ;;  %v3430_v55 = vor.u32 %v3429_v39, %v3428_v47  ;;  %v3440_v56 = vand.u32 2147483647, %v992_v48  ;;  %v3442_v57 = vcvt.f32.s32 %v992_v48 }
 0x26b   :  { %vm5164_vm8 = vcmp.lt.f32.partialorder %v3432_v44, 8388608.0  ;;  %v3436_v59 = vand.u32 2147483647, %v3435_v52  ;;  %v993_v60 = vmul.f32 15.0, %v737_v50  ;;  %v738_v61 = vmin.f32 %v482_v27, 1.0 }
 0x26c   :  { %1757 = vst [vmem:[#allocation5 + $0x630] sm:$0xff] %v1501_v54  ;;  %v3431_v62 = vsel %vm5158_vm7, %v3430_v55, %v990_v21  ;;  %v3443_v63 = vcvt.s32.f32 %v3442_v57  ;;  %v3445_v0 = vand.u32 2147483648, %v992_v48  ;;  %v483_v1 = vmax.f32 %v227_v53, 0.0  ;;  %v232_v54 = vld [vmem:[#allocation2 + $0x688] sm:$0xff] }
 0x26d   :  { %v1502_v3 = vmul.f32 0.06666667, %v3431_v62  ;;  %v3438_v4 = vor.u32 %v3437_v49, %v3436_v59  ;;  %v3448_v5 = vand.u32 2147483647, %v993_v60  ;;  %v3450_v6 = vcvt.f32.s32 %v993_v60 }
 0x26e   :  { %vm5170_vm9 = vcmp.lt.f32.partialorder %v3440_v56, 8388608.0  ;;  %v3444_v8 = vand.u32 2147483647, %v3443_v63  ;;  %v994_v9 = vmul.f32 15.0, %v738_v61  ;;  %v739_v10 = vmin.f32 %v483_v1, 1.0 }
 0x26f   :  { %1758 = vst [vmem:[#allocation5 + $0x638] sm:$0xff] %v1502_v3  ;;  %v3439_v11 = vsel %vm5164_vm8, %v3438_v4, %v991_v35  ;;  %v3451_v12 = vcvt.s32.f32 %v3450_v6  ;;  %v3453_v13 = vand.u32 2147483648, %v993_v60  ;;  %v484_v14 = vmax.f32 %v228_v2, 0.0  ;;  %v233_v3 = vld [vmem:[#allocation2 + $0x690] sm:$0xff] }
 0x270   :  { %v1503_v16 = vmul.f32 0.06666667, %v3439_v11  ;;  %v3446_v17 = vor.u32 %v3445_v0, %v3444_v8  ;;  %v3456_v18 = vand.u32 2147483647, %v994_v9  ;;  %v3458_v19 = vcvt.f32.s32 %v994_v9 }
 0x271   :  { %vm5176_vm10 = vcmp.lt.f32.partialorder %v3448_v5, 8388608.0  ;;  %v3452_v21 = vand.u32 2147483647, %v3451_v12  ;;  %v995_v22 = vmul.f32 15.0, %v739_v10  ;;  %v740_v23 = vmin.f32 %v484_v14, 1.0 }
 0x272   :  { %1759 = vst [vmem:[#allocation5 + $0x640] sm:$0xff] %v1503_v16  ;;  %v3447_v24 = vsel %vm5170_vm9, %v3446_v17, %v992_v48  ;;  %v3459_v29 = vcvt.s32.f32 %v3458_v19  ;;  %v3461_v28 = vand.u32 2147483648, %v994_v9  ;;  %v485_v30 = vmax.f32 %v229_v15, 0.0  ;;  %v234_v16 = vld [vmem:[#allocation2 + $0x698] sm:$0xff] }
 0x273   :  { %v1504_v25 = vmul.f32 0.06666667, %v3447_v24  ;;  %v3454_v32 = vor.u32 %v3453_v13, %v3452_v21  ;;  %v3464_v33 = vand.u32 2147483647, %v995_v22  ;;  %v3466_v34 = vcvt.f32.s32 %v995_v22 }
 0x274   :  { %vm5182_vm11 = vcmp.lt.f32.partialorder %v3456_v18, 8388608.0  ;;  %v3460_v35 = vand.u32 2147483647, %v3459_v29  ;;  %v996_v36 = vmul.f32 15.0, %v740_v23  ;;  %v741_v37 = vmin.f32 %v485_v30, 1.0 }
 0x275   :  { %1760 = vst [vmem:[#allocation5 + $0x648] sm:$0xff] %v1504_v25  ;;  %v3455_v38 = vsel %vm5176_vm10, %v3454_v32, %v993_v60  ;;  %v3467_v39 = vcvt.s32.f32 %v3466_v34  ;;  %v3469_v40 = vand.u32 2147483648, %v995_v22  ;;  %v486_v41 = vmax.f32 %v230_v31, 0.0  ;;  %v235_v25 = vld [vmem:[#allocation2 + $0x6a0] sm:$0xff] }
 0x276   :  { %v1505_v43 = vmul.f32 0.06666667, %v3455_v38  ;;  %v3462_v44 = vor.u32 %v3461_v28, %v3460_v35  ;;  %v3472_v45 = vand.u32 2147483647, %v996_v36  ;;  %v3474_v46 = vcvt.f32.s32 %v996_v36 }
 0x277   :  { %vm5188_vm12 = vcmp.lt.f32.partialorder %v3464_v33, 8388608.0  ;;  %v3468_v48 = vand.u32 2147483647, %v3467_v39  ;;  %v997_v50 = vmul.f32 15.0, %v741_v37  ;;  %v742_v51 = vmin.f32 %v486_v41, 1.0 }
 0x278   :  { %1761 = vst [vmem:[#allocation5 + $0x650] sm:$0xff] %v1505_v43  ;;  %v3463_v52 = vsel %vm5182_vm11, %v3462_v44, %v994_v9  ;;  %v3475_v49 = vcvt.s32.f32 %v3474_v46  ;;  %v3477_v27 = vand.u32 2147483648, %v996_v36  ;;  %v487_v53 = vmax.f32 %v231_v42, 0.0  ;;  %v236_v43 = vld [vmem:[#allocation2 + $0x6a8] sm:$0xff] }
 0x279   :  { %v1506_v55 = vmul.f32 0.06666667, %v3463_v52  ;;  %v3470_v56 = vor.u32 %v3469_v40, %v3468_v48  ;;  %v3480_v57 = vand.u32 2147483647, %v997_v50  ;;  %v3482_v58 = vcvt.f32.s32 %v997_v50 }
 0x27a   :  { %vm5194_vm13 = vcmp.lt.f32.partialorder %v3472_v45, 8388608.0  ;;  %v3476_v60 = vand.u32 2147483647, %v3475_v49  ;;  %v998_v61 = vmul.f32 15.0, %v742_v51  ;;  %v743_v62 = vmin.f32 %v487_v53, 1.0 }
 0x27b   :  { %1762 = vst [vmem:[#allocation5 + $0x658] sm:$0xff] %v1506_v55  ;;  %v3471_v63 = vsel %vm5188_vm12, %v3470_v56, %v995_v22  ;;  %v3483_v0 = vcvt.s32.f32 %v3482_v58  ;;  %v3485_v1 = vand.u32 2147483648, %v997_v50  ;;  %v488_v2 = vmax.f32 %v232_v54, 0.0  ;;  %v237_v55 = vld [vmem:[#allocation2 + $0x6b0] sm:$0xff] }
 0x27c   :  { %v1507_v4 = vmul.f32 0.06666667, %v3471_v63  ;;  %v3478_v5 = vor.u32 %v3477_v27, %v3476_v60  ;;  %v3488_v6 = vand.u32 2147483647, %v998_v61  ;;  %v3490_v7 = vcvt.f32.s32 %v998_v61 }
 0x27d   :  { %vm5200_vm14 = vcmp.lt.f32.partialorder %v3480_v57, 8388608.0  ;;  %v3484_v9 = vand.u32 2147483647, %v3483_v0  ;;  %v999_v10 = vmul.f32 15.0, %v743_v62  ;;  %v744_v11 = vmin.f32 %v488_v2, 1.0 }
 0x27e   :  { %1763 = vst [vmem:[#allocation5 + $0x660] sm:$0xff] %v1507_v4  ;;  %v3479_v12 = vsel %vm5194_vm13, %v3478_v5, %v996_v36  ;;  %v3491_v13 = vcvt.s32.f32 %v3490_v7  ;;  %v3493_v14 = vand.u32 2147483648, %v998_v61  ;;  %v489_v15 = vmax.f32 %v233_v3, 0.0  ;;  %v238_v4 = vld [vmem:[#allocation2 + $0x6b8] sm:$0xff] }
 0x27f   :  { %v1508_v17 = vmul.f32 0.06666667, %v3479_v12  ;;  %v3486_v18 = vor.u32 %v3485_v1, %v3484_v9  ;;  %v3496_v19 = vand.u32 2147483647, %v999_v10  ;;  %v3498_v20 = vcvt.f32.s32 %v999_v10 }
 0x280   :  { %vm5206_vm15 = vcmp.lt.f32.partialorder %v3488_v6, 8388608.0  ;;  %v3492_v22 = vand.u32 2147483647, %v3491_v13  ;;  %v1000_v23 = vmul.f32 15.0, %v744_v11  ;;  %v745_v24 = vmin.f32 %v489_v15, 1.0 }
 0x281   :  { %1764 = vst [vmem:[#allocation5 + $0x668] sm:$0xff] %v1508_v17  ;;  %v3487_v29 = vsel %vm5200_vm14, %v3486_v18, %v997_v50  ;;  %v3499_v28 = vcvt.s32.f32 %v3498_v20  ;;  %v3501_v30 = vand.u32 2147483648, %v999_v10  ;;  %v490_v31 = vmax.f32 %v234_v16, 0.0  ;;  %v239_v17 = vld [vmem:[#allocation2 + $0x6c0] sm:$0xff] }
 0x282   :  { %v1509_v32 = vmul.f32 0.06666667, %v3487_v29  ;;  %v3494_v33 = vor.u32 %v3493_v14, %v3492_v22  ;;  %v3504_v34 = vand.u32 2147483647, %v1000_v23  ;;  %v3506_v26 = vcvt.f32.s32 %v1000_v23 }
 0x283   :  { %vm5212_vm0 = vcmp.lt.f32.partialorder %v3496_v19, 8388608.0  ;;  %v3500_v36 = vand.u32 2147483647, %v3499_v28  ;;  %v1001_v37 = vmul.f32 15.0, %v745_v24  ;;  %v746_v38 = vmin.f32 %v490_v31, 1.0 }
 0x284   :  { %1765 = vst [vmem:[#allocation5 + $0x670] sm:$0xff] %v1509_v32  ;;  %v3495_v39 = vsel %vm5206_vm15, %v3494_v33, %v998_v61  ;;  %v3507_v40 = vcvt.s32.f32 %v3506_v26  ;;  %v3509_v41 = vand.u32 2147483648, %v1000_v23  ;;  %v491_v42 = vmax.f32 %v235_v25, 0.0  ;;  %v240_v32 = vld [vmem:[#allocation2 + $0x6c8] sm:$0xff] }
 0x285   :  { %v1510_v44 = vmul.f32 0.06666667, %v3495_v39  ;;  %v3502_v45 = vor.u32 %v3501_v30, %v3500_v36  ;;  %v3512_v46 = vand.u32 2147483647, %v1001_v37  ;;  %v3514_v47 = vcvt.f32.s32 %v1001_v37 }
 0x286   :  { %vm5218_vm1 = vcmp.lt.f32.partialorder %v3504_v34, 8388608.0  ;;  %v3508_v50 = vand.u32 2147483647, %v3507_v40  ;;  %v1002_v51 = vmul.f32 15.0, %v746_v38  ;;  %v747_v52 = vmin.f32 %v491_v42, 1.0 }
 0x287   :  { %1766 = vst [vmem:[#allocation5 + $0x678] sm:$0xff] %v1510_v44  ;;  %v3503_v49 = vsel %vm5212_vm0, %v3502_v45, %v999_v10  ;;  %v3515_v27 = vcvt.s32.f32 %v3514_v47  ;;  %v3517_v53 = vand.u32 2147483648, %v1001_v37  ;;  %v492_v54 = vmax.f32 %v236_v43, 0.0  ;;  %v241_v44 = vld [vmem:[#allocation2 + $0x6d0] sm:$0xff] }
 0x288   :  { %v1511_v56 = vmul.f32 0.06666667, %v3503_v49  ;;  %v3510_v57 = vor.u32 %v3509_v41, %v3508_v50  ;;  %v3520_v58 = vand.u32 2147483647, %v1002_v51  ;;  %v3522_v59 = vcvt.f32.s32 %v1002_v51 }
 0x289   :  { %vm5224_vm2 = vcmp.lt.f32.partialorder %v3512_v46, 8388608.0  ;;  %v3516_v61 = vand.u32 2147483647, %v3515_v27  ;;  %v1003_v62 = vmul.f32 15.0, %v747_v52  ;;  %v748_v63 = vmin.f32 %v492_v54, 1.0 }
 0x28a   :  { %1767 = vst [vmem:[#allocation5 + $0x680] sm:$0xff] %v1511_v56  ;;  %v3511_v0 = vsel %vm5218_vm1, %v3510_v57, %v1000_v23  ;;  %v3523_v1 = vcvt.s32.f32 %v3522_v59  ;;  %v3525_v2 = vand.u32 2147483648, %v1002_v51  ;;  %v493_v3 = vmax.f32 %v237_v55, 0.0  ;;  %v242_v56 = vld [vmem:[#allocation2 + $0x6d8] sm:$0xff] }
 0x28b   :  { %v1512_v5 = vmul.f32 0.06666667, %v3511_v0  ;;  %v3518_v6 = vor.u32 %v3517_v53, %v3516_v61  ;;  %v3528_v7 = vand.u32 2147483647, %v1003_v62  ;;  %v3530_v8 = vcvt.f32.s32 %v1003_v62 }
 0x28c   :  { %vm5230_vm3 = vcmp.lt.f32.partialorder %v3520_v58, 8388608.0  ;;  %v3524_v10 = vand.u32 2147483647, %v3523_v1  ;;  %v1004_v11 = vmul.f32 15.0, %v748_v63  ;;  %v749_v12 = vmin.f32 %v493_v3, 1.0 }
 0x28d   :  { %1768 = vst [vmem:[#allocation5 + $0x688] sm:$0xff] %v1512_v5  ;;  %v3519_v13 = vsel %vm5224_vm2, %v3518_v6, %v1001_v37  ;;  %v3531_v14 = vcvt.s32.f32 %v3530_v8  ;;  %v3533_v15 = vand.u32 2147483648, %v1003_v62  ;;  %v494_v16 = vmax.f32 %v238_v4, 0.0  ;;  %v243_v5 = vld [vmem:[#allocation2 + $0x6e0] sm:$0xff] }
 0x28e   :  { %v1513_v18 = vmul.f32 0.06666667, %v3519_v13  ;;  %v3526_v19 = vor.u32 %v3525_v2, %v3524_v10  ;;  %v3536_v20 = vand.u32 2147483647, %v1004_v11  ;;  %v3538_v21 = vcvt.f32.s32 %v1004_v11 }
 0x28f   :  { %vm5236_vm4 = vcmp.lt.f32.partialorder %v3528_v7, 8388608.0  ;;  %v3532_v23 = vand.u32 2147483647, %v3531_v14  ;;  %v1005_v24 = vmul.f32 15.0, %v749_v12  ;;  %v750_v29 = vmin.f32 %v494_v16, 1.0 }
 0x290   :  { %1769 = vst [vmem:[#allocation5 + $0x690] sm:$0xff] %v1513_v18  ;;  %v3527_v28 = vsel %vm5230_vm3, %v3526_v19, %v1002_v51  ;;  %v3539_v30 = vcvt.s32.f32 %v3538_v21  ;;  %v3541_v31 = vand.u32 2147483648, %v1004_v11  ;;  %v495_v25 = vmax.f32 %v239_v17, 0.0  ;;  %v244_v18 = vld [vmem:[#allocation2 + $0x6e8] sm:$0xff] }
 0x291   :  { %v1514_v33 = vmul.f32 0.06666667, %v3527_v28  ;;  %v3534_v34 = vor.u32 %v3533_v15, %v3532_v23  ;;  %v3544_v26 = vand.u32 2147483647, %v1005_v24  ;;  %v3546_v35 = vcvt.f32.s32 %v1005_v24 }
 0x292   :  { %vm5242_vm5 = vcmp.lt.f32.partialorder %v3536_v20, 8388608.0  ;;  %v3540_v37 = vand.u32 2147483647, %v3539_v30  ;;  %v1006_v38 = vmul.f32 15.0, %v750_v29  ;;  %v751_v39 = vmin.f32 %v495_v25, 1.0 }
 0x293   :  { %1770 = vst [vmem:[#allocation5 + $0x698] sm:$0xff] %v1514_v33  ;;  %v3535_v40 = vsel %vm5236_vm4, %v3534_v34, %v1003_v62  ;;  %v3547_v41 = vcvt.s32.f32 %v3546_v35  ;;  %v3549_v42 = vand.u32 2147483648, %v1005_v24  ;;  %v496_v43 = vmax.f32 %v240_v32, 0.0  ;;  %v245_v33 = vld [vmem:[#allocation2 + $0x6f0] sm:$0xff] }
 0x294   :  { %v1515_v45 = vmul.f32 0.06666667, %v3535_v40  ;;  %v3542_v46 = vor.u32 %v3541_v31, %v3540_v37  ;;  %v3552_v47 = vand.u32 2147483647, %v1006_v38  ;;  %v3554_v48 = vcvt.f32.s32 %v1006_v38 }
 0x295   :  { %vm5248_vm6 = vcmp.lt.f32.partialorder %v3544_v26, 8388608.0  ;;  %v3548_v51 = vand.u32 2147483647, %v3547_v41  ;;  %v1007_v52 = vmul.f32 15.0, %v751_v39  ;;  %v752_v49 = vmin.f32 %v496_v43, 1.0 }
 0x296   :  { %1771 = vst [vmem:[#allocation5 + $0x6a0] sm:$0xff] %v1515_v45  ;;  %v3543_v27 = vsel %vm5242_vm5, %v3542_v46, %v1004_v11  ;;  %v3555_v53 = vcvt.s32.f32 %v3554_v48  ;;  %v3557_v54 = vand.u32 2147483648, %v1006_v38  ;;  %v497_v55 = vmax.f32 %v241_v44, 0.0  ;;  %v246_v45 = vld [vmem:[#allocation2 + $0x6f8] sm:$0xff] }
 0x297   :  { %v1516_v57 = vmul.f32 0.06666667, %v3543_v27  ;;  %v3550_v58 = vor.u32 %v3549_v42, %v3548_v51  ;;  %v3560_v59 = vand.u32 2147483647, %v1007_v52  ;;  %v3562_v60 = vcvt.f32.s32 %v1007_v52 }
 0x298   :  { %vm5254_vm7 = vcmp.lt.f32.partialorder %v3552_v47, 8388608.0  ;;  %v3556_v62 = vand.u32 2147483647, %v3555_v53  ;;  %v1008_v63 = vmul.f32 15.0, %v752_v49  ;;  %v753_v0 = vmin.f32 %v497_v55, 1.0 }
 0x299   :  { %1772 = vst [vmem:[#allocation5 + $0x6a8] sm:$0xff] %v1516_v57  ;;  %v3551_v1 = vsel %vm5248_vm6, %v3550_v58, %v1005_v24  ;;  %v3563_v2 = vcvt.s32.f32 %v3562_v60  ;;  %v3565_v3 = vand.u32 2147483648, %v1007_v52  ;;  %v498_v4 = vmax.f32 %v242_v56, 0.0  ;;  %v247_v57 = vld [vmem:[#allocation2 + $0x700] sm:$0xff] }
 0x29a   :  { %v1517_v6 = vmul.f32 0.06666667, %v3551_v1  ;;  %v3558_v7 = vor.u32 %v3557_v54, %v3556_v62  ;;  %v3568_v8 = vand.u32 2147483647, %v1008_v63  ;;  %v3570_v9 = vcvt.f32.s32 %v1008_v63 }
 0x29b   :  { %vm5260_vm8 = vcmp.lt.f32.partialorder %v3560_v59, 8388608.0  ;;  %v3564_v11 = vand.u32 2147483647, %v3563_v2  ;;  %v1009_v12 = vmul.f32 15.0, %v753_v0  ;;  %v754_v13 = vmin.f32 %v498_v4, 1.0 }
 0x29c   :  { %1773 = vst [vmem:[#allocation5 + $0x6b0] sm:$0xff] %v1517_v6  ;;  %v3559_v14 = vsel %vm5254_vm7, %v3558_v7, %v1006_v38  ;;  %v3571_v15 = vcvt.s32.f32 %v3570_v9  ;;  %v3573_v16 = vand.u32 2147483648, %v1008_v63  ;;  %v499_v17 = vmax.f32 %v243_v5, 0.0  ;;  %v248_v6 = vld [vmem:[#allocation2 + $0x708] sm:$0xff] }
 0x29d   :  { %v1518_v19 = vmul.f32 0.06666667, %v3559_v14  ;;  %v3566_v20 = vor.u32 %v3565_v3, %v3564_v11  ;;  %v3576_v21 = vand.u32 2147483647, %v1009_v12  ;;  %v3578_v22 = vcvt.f32.s32 %v1009_v12 }
 0x29e   :  { %vm5266_vm9 = vcmp.lt.f32.partialorder %v3568_v8, 8388608.0  ;;  %v3572_v24 = vand.u32 2147483647, %v3571_v15  ;;  %v1010_v29 = vmul.f32 15.0, %v754_v13  ;;  %v755_v28 = vmin.f32 %v499_v17, 1.0 }
 0x29f   :  { %1774 = vst [vmem:[#allocation5 + $0x6b8] sm:$0xff] %v1518_v19  ;;  %v3567_v30 = vsel %vm5260_vm8, %v3566_v20, %v1007_v52  ;;  %v3579_v31 = vcvt.s32.f32 %v3578_v22  ;;  %v3581_v25 = vand.u32 2147483648, %v1009_v12  ;;  %v500_v32 = vmax.f32 %v244_v18, 0.0  ;;  %v249_v19 = vld [vmem:[#allocation2 + $0x710] sm:$0xff] }
 0x2a0   :  { %v1519_v34 = vmul.f32 0.06666667, %v3567_v30  ;;  %v3574_v26 = vor.u32 %v3573_v16, %v3572_v24  ;;  %v3584_v35 = vand.u32 2147483647, %v1010_v29  ;;  %v3586_v36 = vcvt.f32.s32 %v1010_v29 }
 0x2a1   :  { %vm5272_vm10 = vcmp.lt.f32.partialorder %v3576_v21, 8388608.0  ;;  %v3580_v38 = vand.u32 2147483647, %v3579_v31  ;;  %v1011_v39 = vmul.f32 15.0, %v755_v28  ;;  %v756_v40 = vmin.f32 %v500_v32, 1.0 }
 0x2a2   :  { %1775 = vst [vmem:[#allocation5 + $0x6c0] sm:$0xff] %v1519_v34  ;;  %v3575_v41 = vsel %vm5266_vm9, %v3574_v26, %v1008_v63  ;;  %v3587_v42 = vcvt.s32.f32 %v3586_v36  ;;  %v3589_v43 = vand.u32 2147483648, %v1010_v29  ;;  %v501_v44 = vmax.f32 %v245_v33, 0.0  ;;  %v250_v34 = vld [vmem:[#allocation2 + $0x718] sm:$0xff] }
 0x2a3   :  { %v1520_v46 = vmul.f32 0.06666667, %v3575_v41  ;;  %v3582_v47 = vor.u32 %v3581_v25, %v3580_v38  ;;  %v3592_v48 = vand.u32 2147483647, %v1011_v39  ;;  %v3594_v50 = vcvt.f32.s32 %v1011_v39 }
 0x2a4   :  { %vm5278_vm11 = vcmp.lt.f32.partialorder %v3584_v35, 8388608.0  ;;  %v3588_v52 = vand.u32 2147483647, %v3587_v42  ;;  %v1012_v49 = vmul.f32 15.0, %v756_v40  ;;  %v757_v27 = vmin.f32 %v501_v44, 1.0 }
 0x2a5   :  { %1776 = vst [vmem:[#allocation5 + $0x6c8] sm:$0xff] %v1520_v46  ;;  %v3583_v53 = vsel %vm5272_vm10, %v3582_v47, %v1009_v12  ;;  %v3595_v54 = vcvt.s32.f32 %v3594_v50  ;;  %v3597_v55 = vand.u32 2147483648, %v1011_v39  ;;  %v502_v56 = vmax.f32 %v246_v45, 0.0  ;;  %v251_v46 = vld [vmem:[#allocation2 + $0x720] sm:$0xff] }
 0x2a6   :  { %v1521_v58 = vmul.f32 0.06666667, %v3583_v53  ;;  %v3590_v59 = vor.u32 %v3589_v43, %v3588_v52  ;;  %v3600_v60 = vand.u32 2147483647, %v1012_v49  ;;  %v3602_v61 = vcvt.f32.s32 %v1012_v49 }
 0x2a7   :  { %vm5284_vm12 = vcmp.lt.f32.partialorder %v3592_v48, 8388608.0  ;;  %v3596_v63 = vand.u32 2147483647, %v3595_v54  ;;  %v1013_v0 = vmul.f32 15.0, %v757_v27  ;;  %v758_v1 = vmin.f32 %v502_v56, 1.0 }
 0x2a8   :  { %1777 = vst [vmem:[#allocation5 + $0x6d0] sm:$0xff] %v1521_v58  ;;  %v3591_v2 = vsel %vm5278_vm11, %v3590_v59, %v1010_v29  ;;  %v3603_v3 = vcvt.s32.f32 %v3602_v61  ;;  %v3605_v4 = vand.u32 2147483648, %v1012_v49  ;;  %v503_v5 = vmax.f32 %v247_v57, 0.0  ;;  %v252_v58 = vld [vmem:[#allocation2 + $0x728] sm:$0xff] }
 0x2a9   :  { %v1522_v7 = vmul.f32 0.06666667, %v3591_v2  ;;  %v3598_v8 = vor.u32 %v3597_v55, %v3596_v63  ;;  %v3608_v9 = vand.u32 2147483647, %v1013_v0  ;;  %v3610_v10 = vcvt.f32.s32 %v1013_v0 }
 0x2aa   :  { %vm5290_vm13 = vcmp.lt.f32.partialorder %v3600_v60, 8388608.0  ;;  %v3604_v12 = vand.u32 2147483647, %v3603_v3  ;;  %v1014_v13 = vmul.f32 15.0, %v758_v1  ;;  %v759_v14 = vmin.f32 %v503_v5, 1.0 }
 0x2ab   :  { %1778 = vst [vmem:[#allocation5 + $0x6d8] sm:$0xff] %v1522_v7  ;;  %v3599_v15 = vsel %vm5284_vm12, %v3598_v8, %v1011_v39  ;;  %v3611_v16 = vcvt.s32.f32 %v3610_v10  ;;  %v3613_v17 = vand.u32 2147483648, %v1013_v0  ;;  %v504_v18 = vmax.f32 %v248_v6, 0.0  ;;  %v253_v7 = vld [vmem:[#allocation2 + $0x730] sm:$0xff] }
 0x2ac   :  { %v1523_v20 = vmul.f32 0.06666667, %v3599_v15  ;;  %v3606_v21 = vor.u32 %v3605_v4, %v3604_v12  ;;  %v3616_v22 = vand.u32 2147483647, %v1014_v13  ;;  %v3618_v23 = vcvt.f32.s32 %v1014_v13 }
 0x2ad   :  { %vm5296_vm14 = vcmp.lt.f32.partialorder %v3608_v9, 8388608.0  ;;  %v3612_v29 = vand.u32 2147483647, %v3611_v16  ;;  %v1015_v28 = vmul.f32 15.0, %v759_v14  ;;  %v760_v30 = vmin.f32 %v504_v18, 1.0 }
 0x2ae   :  { %1779 = vst [vmem:[#allocation5 + $0x6e0] sm:$0xff] %v1523_v20  ;;  %v3607_v31 = vsel %vm5290_vm13, %v3606_v21, %v1012_v49  ;;  %v3619_v25 = vcvt.s32.f32 %v3618_v23  ;;  %v3621_v32 = vand.u32 2147483648, %v1014_v13  ;;  %v505_v33 = vmax.f32 %v249_v19, 0.0  ;;  %v254_v20 = vld [vmem:[#allocation2 + $0x738] sm:$0xff] }
 0x2af   :  { %v1524_v26 = vmul.f32 0.06666667, %v3607_v31  ;;  %v3614_v35 = vor.u32 %v3613_v17, %v3612_v29  ;;  %v3624_v36 = vand.u32 2147483647, %v1015_v28  ;;  %v3626_v37 = vcvt.f32.s32 %v1015_v28 }
 0x2b0   :  { %vm5302_vm15 = vcmp.lt.f32.partialorder %v3616_v22, 8388608.0  ;;  %v3620_v39 = vand.u32 2147483647, %v3619_v25  ;;  %v1016_v40 = vmul.f32 15.0, %v760_v30  ;;  %v761_v41 = vmin.f32 %v505_v33, 1.0 }
 0x2b1   :  { %1780 = vst [vmem:[#allocation5 + $0x6e8] sm:$0xff] %v1524_v26  ;;  %v3615_v42 = vsel %vm5296_vm14, %v3614_v35, %v1013_v0  ;;  %v3627_v43 = vcvt.s32.f32 %v3626_v37  ;;  %v3629_v44 = vand.u32 2147483648, %v1015_v28  ;;  %v506_v45 = vmax.f32 %v250_v34, 0.0  ;;  %v255_v26 = vld [vmem:[#allocation2 + $0x740] sm:$0xff] }
 0x2b2   :  { %v1525_v47 = vmul.f32 0.06666667, %v3615_v42  ;;  %v3622_v48 = vor.u32 %v3621_v32, %v3620_v39  ;;  %v3632_v50 = vand.u32 2147483647, %v1016_v40  ;;  %v3634_v51 = vcvt.f32.s32 %v1016_v40 }
 0x2b3   :  { %vm5308_vm0 = vcmp.lt.f32.partialorder %v3624_v36, 8388608.0  ;;  %v3628_v49 = vand.u32 2147483647, %v3627_v43  ;;  %v1017_v27 = vmul.f32 15.0, %v761_v41  ;;  %v762_v53 = vmin.f32 %v506_v45, 1.0 }
 0x2b4   :  { %1781 = vst [vmem:[#allocation5 + $0x6f0] sm:$0xff] %v1525_v47  ;;  %v3623_v54 = vsel %vm5302_vm15, %v3622_v48, %v1014_v13  ;;  %v3635_v55 = vcvt.s32.f32 %v3634_v51  ;;  %v3637_v56 = vand.u32 2147483648, %v1016_v40  ;;  %v507_v57 = vmax.f32 %v251_v46, 0.0  ;;  %v256_v47 = vld [vmem:[#allocation2 + $0x748] sm:$0xff] }
 0x2b5   :  { %v1526_v59 = vmul.f32 0.06666667, %v3623_v54  ;;  %v3630_v60 = vor.u32 %v3629_v44, %v3628_v49  ;;  %v3640_v61 = vand.u32 2147483647, %v1017_v27  ;;  %v3642_v62 = vcvt.f32.s32 %v1017_v27 }
 0x2b6   :  { %vm5314_vm1 = vcmp.lt.f32.partialorder %v3632_v50, 8388608.0  ;;  %v3636_v0 = vand.u32 2147483647, %v3635_v55  ;;  %v1018_v1 = vmul.f32 15.0, %v762_v53  ;;  %v763_v2 = vmin.f32 %v507_v57, 1.0 }
 0x2b7   :  { %1782 = vst [vmem:[#allocation5 + $0x6f8] sm:$0xff] %v1526_v59  ;;  %v3631_v3 = vsel %vm5308_vm0, %v3630_v60, %v1015_v28  ;;  %v3643_v4 = vcvt.s32.f32 %v3642_v62  ;;  %v3645_v5 = vand.u32 2147483648, %v1017_v27  ;;  %v508_v6 = vmax.f32 %v252_v58, 0.0  ;;  %v257_v59 = vld [vmem:[#allocation2 + $0x750] sm:$0xff] }
 0x2b8   :  { %v1527_v8 = vmul.f32 0.06666667, %v3631_v3  ;;  %v3638_v9 = vor.u32 %v3637_v56, %v3636_v0  ;;  %v3648_v10 = vand.u32 2147483647, %v1018_v1  ;;  %v3650_v11 = vcvt.f32.s32 %v1018_v1 }
 0x2b9   :  { %vm5320_vm2 = vcmp.lt.f32.partialorder %v3640_v61, 8388608.0  ;;  %v3644_v13 = vand.u32 2147483647, %v3643_v4  ;;  %v1019_v14 = vmul.f32 15.0, %v763_v2  ;;  %v764_v15 = vmin.f32 %v508_v6, 1.0 }
 0x2ba   :  { %1783 = vst [vmem:[#allocation5 + $0x700] sm:$0xff] %v1527_v8  ;;  %v3639_v16 = vsel %vm5314_vm1, %v3638_v9, %v1016_v40  ;;  %v3651_v17 = vcvt.s32.f32 %v3650_v11  ;;  %v3653_v18 = vand.u32 2147483648, %v1018_v1  ;;  %v509_v19 = vmax.f32 %v253_v7, 0.0  ;;  %v258_v8 = vld [vmem:[#allocation2 + $0x758] sm:$0xff] }
 0x2bb   :  { %v1528_v21 = vmul.f32 0.06666667, %v3639_v16  ;;  %v3646_v22 = vor.u32 %v3645_v5, %v3644_v13  ;;  %v3656_v23 = vand.u32 2147483647, %v1019_v14  ;;  %v3658_v24 = vcvt.f32.s32 %v1019_v14 }
 0x2bc   :  { %vm5326_vm3 = vcmp.lt.f32.partialorder %v3648_v10, 8388608.0  ;;  %v3652_v28 = vand.u32 2147483647, %v3651_v17  ;;  %v1020_v30 = vmul.f32 15.0, %v764_v15  ;;  %v765_v31 = vmin.f32 %v509_v19, 1.0 }
 0x2bd   :  { %1784 = vst [vmem:[#allocation5 + $0x708] sm:$0xff] %v1528_v21  ;;  %v3647_v25 = vsel %vm5320_vm2, %v3646_v22, %v1017_v27  ;;  %v3659_v32 = vcvt.s32.f32 %v3658_v24  ;;  %v3661_v33 = vand.u32 2147483648, %v1019_v14  ;;  %v510_v34 = vmax.f32 %v254_v20, 0.0  ;;  %v259_v21 = vld [vmem:[#allocation2 + $0x760] sm:$0xff] }
 0x2be   :  { %v1529_v35 = vmul.f32 0.06666667, %v3647_v25  ;;  %v3654_v36 = vor.u32 %v3653_v18, %v3652_v28  ;;  %v3664_v37 = vand.u32 2147483647, %v1020_v30  ;;  %v3666_v38 = vcvt.f32.s32 %v1020_v30 }
 0x2bf   :  { %vm5332_vm4 = vcmp.lt.f32.partialorder %v3656_v23, 8388608.0  ;;  %v3660_v40 = vand.u32 2147483647, %v3659_v32  ;;  %v1021_v41 = vmul.f32 15.0, %v765_v31  ;;  %v766_v42 = vmin.f32 %v510_v34, 1.0 }
 0x2c0   :  { %1785 = vst [vmem:[#allocation5 + $0x710] sm:$0xff] %v1529_v35  ;;  %v3655_v43 = vsel %vm5326_vm3, %v3654_v36, %v1018_v1  ;;  %v3667_v44 = vcvt.s32.f32 %v3666_v38  ;;  %v3669_v45 = vand.u32 2147483648, %v1020_v30  ;;  %v511_v46 = vmax.f32 %v255_v26, 0.0  ;;  %v260_v35 = vld [vmem:[#allocation2 + $0x768] sm:$0xff] }
 0x2c1   :  { %v1530_v48 = vmul.f32 0.06666667, %v3655_v43  ;;  %v3662_v50 = vor.u32 %v3661_v33, %v3660_v40  ;;  %v3672_v51 = vand.u32 2147483647, %v1021_v41  ;;  %v3674_v52 = vcvt.f32.s32 %v1021_v41 }
 0x2c2   :  { %vm5338_vm5 = vcmp.lt.f32.partialorder %v3664_v37, 8388608.0  ;;  %v3668_v27 = vand.u32 2147483647, %v3667_v44  ;;  %v1022_v53 = vmul.f32 15.0, %v766_v42  ;;  %v767_v54 = vmin.f32 %v511_v46, 1.0 }
 0x2c3   :  { %1786 = vst [vmem:[#allocation5 + $0x718] sm:$0xff] %v1530_v48  ;;  %v3663_v55 = vsel %vm5332_vm4, %v3662_v50, %v1019_v14  ;;  %v3675_v56 = vcvt.s32.f32 %v3674_v52  ;;  %v3677_v57 = vand.u32 2147483648, %v1021_v41  ;;  %v512_v58 = vmax.f32 %v256_v47, 0.0  ;;  %v261_v48 = vld [vmem:[#allocation2 + $0x770] sm:$0xff] }
 0x2c4   :  { %v1531_v60 = vmul.f32 0.06666667, %v3663_v55  ;;  %v3670_v61 = vor.u32 %v3669_v45, %v3668_v27  ;;  %v3680_v62 = vand.u32 2147483647, %v1022_v53  ;;  %v3682_v63 = vcvt.f32.s32 %v1022_v53 }
 0x2c5   :  { %vm5344_vm6 = vcmp.lt.f32.partialorder %v3672_v51, 8388608.0  ;;  %v3676_v1 = vand.u32 2147483647, %v3675_v56  ;;  %v1023_v2 = vmul.f32 15.0, %v767_v54  ;;  %v768_v3 = vmin.f32 %v512_v58, 1.0 }
 0x2c6   :  { %1787 = vst [vmem:[#allocation5 + $0x720] sm:$0xff] %v1531_v60  ;;  %v3671_v4 = vsel %vm5338_vm5, %v3670_v61, %v1020_v30  ;;  %v3683_v5 = vcvt.s32.f32 %v3682_v63  ;;  %v3685_v6 = vand.u32 2147483648, %v1022_v53  ;;  %v513_v7 = vmax.f32 %v257_v59, 0.0  ;;  %v262_v60 = vld [vmem:[#allocation2 + $0x778] sm:$0xff] }
 0x2c7   :  { %v1532_v9 = vmul.f32 0.06666667, %v3671_v4  ;;  %v3678_v10 = vor.u32 %v3677_v57, %v3676_v1  ;;  %v3688_v11 = vand.u32 2147483647, %v1023_v2  ;;  %v3690_v12 = vcvt.f32.s32 %v1023_v2 }
 0x2c8   :  { %vm5350_vm7 = vcmp.lt.f32.partialorder %v3680_v62, 8388608.0  ;;  %v3684_v14 = vand.u32 2147483647, %v3683_v5  ;;  %v1024_v15 = vmul.f32 15.0, %v768_v3  ;;  %v769_v16 = vmin.f32 %v513_v7, 1.0 }
 0x2c9   :  { %1788 = vst [vmem:[#allocation5 + $0x728] sm:$0xff] %v1532_v9  ;;  %v3679_v17 = vsel %vm5344_vm6, %v3678_v10, %v1021_v41  ;;  %v3691_v18 = vcvt.s32.f32 %v3690_v12  ;;  %v3693_v19 = vand.u32 2147483648, %v1023_v2  ;;  %v514_v20 = vmax.f32 %v258_v8, 0.0  ;;  %v263_v9 = vld [vmem:[#allocation2 + $0x780] sm:$0xff] }
 0x2ca   :  { %v1533_v22 = vmul.f32 0.06666667, %v3679_v17  ;;  %v3686_v23 = vor.u32 %v3685_v6, %v3684_v14  ;;  %v3696_v24 = vand.u32 2147483647, %v1024_v15  ;;  %v3698_v29 = vcvt.f32.s32 %v1024_v15 }
 0x2cb   :  { %vm5356_vm8 = vcmp.lt.f32.partialorder %v3688_v11, 8388608.0  ;;  %v3692_v30 = vand.u32 2147483647, %v3691_v18  ;;  %v1025_v31 = vmul.f32 15.0, %v769_v16  ;;  %v770_v25 = vmin.f32 %v514_v20, 1.0 }
 0x2cc   :  { %1789 = vst [vmem:[#allocation5 + $0x730] sm:$0xff] %v1533_v22  ;;  %v3687_v32 = vsel %vm5350_vm7, %v3686_v23, %v1022_v53  ;;  %v3699_v33 = vcvt.s32.f32 %v3698_v29  ;;  %v3701_v34 = vand.u32 2147483648, %v1024_v15  ;;  %v515_v26 = vmax.f32 %v259_v21, 0.0  ;;  %v264_v22 = vld [vmem:[#allocation2 + $0x788] sm:$0xff] }
 0x2cd   :  { %v1534_v36 = vmul.f32 0.06666667, %v3687_v32  ;;  %v3694_v37 = vor.u32 %v3693_v19, %v3692_v30  ;;  %v3704_v38 = vand.u32 2147483647, %v1025_v31  ;;  %v3706_v39 = vcvt.f32.s32 %v1025_v31 }
 0x2ce   :  { %vm5362_vm9 = vcmp.lt.f32.partialorder %v3696_v24, 8388608.0  ;;  %v3700_v41 = vand.u32 2147483647, %v3699_v33  ;;  %v1026_v42 = vmul.f32 15.0, %v770_v25  ;;  %v771_v43 = vmin.f32 %v515_v26, 1.0 }
 0x2cf   :  { %1790 = vst [vmem:[#allocation5 + $0x738] sm:$0xff] %v1534_v36  ;;  %v3695_v44 = vsel %vm5356_vm8, %v3694_v37, %v1023_v2  ;;  %v3707_v45 = vcvt.s32.f32 %v3706_v39  ;;  %v3709_v46 = vand.u32 2147483648, %v1025_v31  ;;  %v516_v47 = vmax.f32 %v260_v35, 0.0  ;;  %v265_v36 = vld [vmem:[#allocation2 + $0x790] sm:$0xff] }
 0x2d0   :  { %v1535_v50 = vmul.f32 0.06666667, %v3695_v44  ;;  %v3702_v51 = vor.u32 %v3701_v34, %v3700_v41  ;;  %v3712_v52 = vand.u32 2147483647, %v1026_v42  ;;  %v3714_v49 = vcvt.f32.s32 %v1026_v42 }
 0x2d1   :  { %vm5368_vm10 = vcmp.lt.f32.partialorder %v3704_v38, 8388608.0  ;;  %v3708_v53 = vand.u32 2147483647, %v3707_v45  ;;  %v1027_v54 = vmul.f32 15.0, %v771_v43  ;;  %v772_v55 = vmin.f32 %v516_v47, 1.0 }
 0x2d2   :  { %1791 = vst [vmem:[#allocation5 + $0x740] sm:$0xff] %v1535_v50  ;;  %v3703_v56 = vsel %vm5362_vm9, %v3702_v51, %v1024_v15  ;;  %v3715_v57 = vcvt.s32.f32 %v3714_v49  ;;  %v3717_v58 = vand.u32 2147483648, %v1026_v42  ;;  %v517_v59 = vmax.f32 %v261_v48, 0.0  ;;  %v266_v50 = vld [vmem:[#allocation2 + $0x798] sm:$0xff] }
 0x2d3   :  { %v1536_v61 = vmul.f32 0.06666667, %v3703_v56  ;;  %v3710_v62 = vor.u32 %v3709_v46, %v3708_v53  ;;  %v3720_v63 = vand.u32 2147483647, %v1027_v54  ;;  %v3722_v0 = vcvt.f32.s32 %v1027_v54 }
 0x2d4   :  { %vm5374_vm11 = vcmp.lt.f32.partialorder %v3712_v52, 8388608.0  ;;  %v3716_v2 = vand.u32 2147483647, %v3715_v57  ;;  %v1028_v3 = vmul.f32 15.0, %v772_v55  ;;  %v773_v4 = vmin.f32 %v517_v59, 1.0 }
 0x2d5   :  { %1792 = vst [vmem:[#allocation5 + $0x748] sm:$0xff] %v1536_v61  ;;  %v3711_v5 = vsel %vm5368_vm10, %v3710_v62, %v1025_v31  ;;  %v3723_v6 = vcvt.s32.f32 %v3722_v0  ;;  %v3725_v7 = vand.u32 2147483648, %v1027_v54  ;;  %v518_v8 = vmax.f32 %v262_v60, 0.0  ;;  %v267_v61 = vld [vmem:[#allocation2 + $0x7a0] sm:$0xff] }
 0x2d6   :  { %v1537_v10 = vmul.f32 0.06666667, %v3711_v5  ;;  %v3718_v11 = vor.u32 %v3717_v58, %v3716_v2  ;;  %v3728_v12 = vand.u32 2147483647, %v1028_v3  ;;  %v3730_v13 = vcvt.f32.s32 %v1028_v3 }
 0x2d7   :  { %vm5380_vm12 = vcmp.lt.f32.partialorder %v3720_v63, 8388608.0  ;;  %v3724_v15 = vand.u32 2147483647, %v3723_v6  ;;  %v1029_v16 = vmul.f32 15.0, %v773_v4  ;;  %v774_v17 = vmin.f32 %v518_v8, 1.0 }
 0x2d8   :  { %1793 = vst [vmem:[#allocation5 + $0x750] sm:$0xff] %v1537_v10  ;;  %v3719_v18 = vsel %vm5374_vm11, %v3718_v11, %v1026_v42  ;;  %v3731_v19 = vcvt.s32.f32 %v3730_v13  ;;  %v3733_v20 = vand.u32 2147483648, %v1028_v3  ;;  %v519_v21 = vmax.f32 %v263_v9, 0.0  ;;  %v268_v10 = vld [vmem:[#allocation2 + $0x7a8] sm:$0xff] }
 0x2d9   :  { %v1538_v23 = vmul.f32 0.06666667, %v3719_v18  ;;  %v3726_v24 = vor.u32 %v3725_v7, %v3724_v15  ;;  %v3736_v29 = vand.u32 2147483647, %v1029_v16  ;;  %v3738_v28 = vcvt.f32.s32 %v1029_v16 }
 0x2da   :  { %vm5386_vm13 = vcmp.lt.f32.partialorder %v3728_v12, 8388608.0  ;;  %v3732_v31 = vand.u32 2147483647, %v3731_v19  ;;  %v1030_v25 = vmul.f32 15.0, %v774_v17  ;;  %v775_v32 = vmin.f32 %v519_v21, 1.0 }
 0x2db   :  { %1794 = vst [vmem:[#allocation5 + $0x758] sm:$0xff] %v1538_v23  ;;  %v3727_v33 = vsel %vm5380_vm12, %v3726_v24, %v1027_v54  ;;  %v3739_v34 = vcvt.s32.f32 %v3738_v28  ;;  %v3741_v26 = vand.u32 2147483648, %v1029_v16  ;;  %v520_v35 = vmax.f32 %v264_v22, 0.0  ;;  %v269_v23 = vld [vmem:[#allocation2 + $0x7b0] sm:$0xff] }
 0x2dc   :  { %v1539_v37 = vmul.f32 0.06666667, %v3727_v33  ;;  %v3734_v38 = vor.u32 %v3733_v20, %v3732_v31  ;;  %v3744_v39 = vand.u32 2147483647, %v1030_v25  ;;  %v3746_v40 = vcvt.f32.s32 %v1030_v25 }
 0x2dd   :  { %vm5392_vm14 = vcmp.lt.f32.partialorder %v3736_v29, 8388608.0  ;;  %v3740_v42 = vand.u32 2147483647, %v3739_v34  ;;  %v1031_v43 = vmul.f32 15.0, %v775_v32  ;;  %v776_v44 = vmin.f32 %v520_v35, 1.0 }
 0x2de   :  { %1795 = vst [vmem:[#allocation5 + $0x760] sm:$0xff] %v1539_v37  ;;  %v3735_v45 = vsel %vm5386_vm13, %v3734_v38, %v1028_v3  ;;  %v3747_v46 = vcvt.s32.f32 %v3746_v40  ;;  %v3749_v47 = vand.u32 2147483648, %v1030_v25  ;;  %v521_v48 = vmax.f32 %v265_v36, 0.0  ;;  %v270_v37 = vld [vmem:[#allocation2 + $0x7b8] sm:$0xff] }
 0x2df   :  { %v1540_v51 = vmul.f32 0.06666667, %v3735_v45  ;;  %v3742_v52 = vor.u32 %v3741_v26, %v3740_v42  ;;  %v3752_v49 = vand.u32 2147483647, %v1031_v43  ;;  %v3754_v27 = vcvt.f32.s32 %v1031_v43 }
 0x2e0   :  { %vm5398_vm15 = vcmp.lt.f32.partialorder %v3744_v39, 8388608.0  ;;  %v3748_v54 = vand.u32 2147483647, %v3747_v46  ;;  %v1032_v55 = vmul.f32 15.0, %v776_v44  ;;  %v777_v56 = vmin.f32 %v521_v48, 1.0 }
 0x2e1   :  { %1796 = vst [vmem:[#allocation5 + $0x768] sm:$0xff] %v1540_v51  ;;  %v3743_v57 = vsel %vm5392_vm14, %v3742_v52, %v1029_v16  ;;  %v3755_v58 = vcvt.s32.f32 %v3754_v27  ;;  %v3757_v59 = vand.u32 2147483648, %v1031_v43  ;;  %v522_v60 = vmax.f32 %v266_v50, 0.0  ;;  %v271_v51 = vld [vmem:[#allocation2 + $0x7c0] sm:$0xff] }
 0x2e2   :  { %v1541_v62 = vmul.f32 0.06666667, %v3743_v57  ;;  %v3750_v63 = vor.u32 %v3749_v47, %v3748_v54  ;;  %v3760_v0 = vand.u32 2147483647, %v1032_v55  ;;  %v3762_v1 = vcvt.f32.s32 %v1032_v55 }
 0x2e3   :  { %vm5404_vm0 = vcmp.lt.f32.partialorder %v3752_v49, 8388608.0  ;;  %v3756_v3 = vand.u32 2147483647, %v3755_v58  ;;  %v1033_v4 = vmul.f32 15.0, %v777_v56  ;;  %v778_v5 = vmin.f32 %v522_v60, 1.0 }
 0x2e4   :  { %1797 = vst [vmem:[#allocation5 + $0x770] sm:$0xff] %v1541_v62  ;;  %v3751_v6 = vsel %vm5398_vm15, %v3750_v63, %v1030_v25  ;;  %v3763_v7 = vcvt.s32.f32 %v3762_v1  ;;  %v3765_v8 = vand.u32 2147483648, %v1032_v55  ;;  %v523_v9 = vmax.f32 %v267_v61, 0.0  ;;  %v272_v62 = vld [vmem:[#allocation2 + $0x7c8] sm:$0xff] }
 0x2e5   :  { %v1542_v11 = vmul.f32 0.06666667, %v3751_v6  ;;  %v3758_v12 = vor.u32 %v3757_v59, %v3756_v3  ;;  %v3768_v13 = vand.u32 2147483647, %v1033_v4  ;;  %v3770_v14 = vcvt.f32.s32 %v1033_v4 }
 0x2e6   :  { %vm5410_vm1 = vcmp.lt.f32.partialorder %v3760_v0, 8388608.0  ;;  %v3764_v16 = vand.u32 2147483647, %v3763_v7  ;;  %v1034_v17 = vmul.f32 15.0, %v778_v5  ;;  %v779_v18 = vmin.f32 %v523_v9, 1.0 }
 0x2e7   :  { %1798 = vst [vmem:[#allocation5 + $0x778] sm:$0xff] %v1542_v11  ;;  %v3759_v19 = vsel %vm5404_vm0, %v3758_v12, %v1031_v43  ;;  %v3771_v20 = vcvt.s32.f32 %v3770_v14  ;;  %v3773_v21 = vand.u32 2147483648, %v1033_v4  ;;  %v524_v22 = vmax.f32 %v268_v10, 0.0  ;;  %v273_v11 = vld [vmem:[#allocation2 + $0x7d0] sm:$0xff] }
 0x2e8   :  { %v1543_v24 = vmul.f32 0.06666667, %v3759_v19  ;;  %v3766_v29 = vor.u32 %v3765_v8, %v3764_v16  ;;  %v3776_v28 = vand.u32 2147483647, %v1034_v17  ;;  %v3778_v30 = vcvt.f32.s32 %v1034_v17 }
 0x2e9   :  { %vm5416_vm2 = vcmp.lt.f32.partialorder %v3768_v13, 8388608.0  ;;  %v3772_v25 = vand.u32 2147483647, %v3771_v20  ;;  %v1035_v32 = vmul.f32 15.0, %v779_v18  ;;  %v780_v33 = vmin.f32 %v524_v22, 1.0 }
 0x2ea   :  { %1799 = vst [vmem:[#allocation5 + $0x780] sm:$0xff] %v1543_v24  ;;  %v3767_v34 = vsel %vm5410_vm1, %v3766_v29, %v1032_v55  ;;  %v3779_v26 = vcvt.s32.f32 %v3778_v30  ;;  %v3781_v35 = vand.u32 2147483648, %v1034_v17  ;;  %v525_v36 = vmax.f32 %v269_v23, 0.0  ;;  %v274_v24 = vld [vmem:[#allocation2 + $0x7d8] sm:$0xff] }
 0x2eb   :  { %v1544_v38 = vmul.f32 0.06666667, %v3767_v34  ;;  %v3774_v39 = vor.u32 %v3773_v21, %v3772_v25  ;;  %v3784_v40 = vand.u32 2147483647, %v1035_v32  ;;  %v3786_v41 = vcvt.f32.s32 %v1035_v32 }
 0x2ec   :  { %vm5422_vm3 = vcmp.lt.f32.partialorder %v3776_v28, 8388608.0  ;;  %v3780_v43 = vand.u32 2147483647, %v3779_v26  ;;  %v1036_v44 = vmul.f32 15.0, %v780_v33  ;;  %v781_v45 = vmin.f32 %v525_v36, 1.0 }
 0x2ed   :  { %1800 = vst [vmem:[#allocation5 + $0x788] sm:$0xff] %v1544_v38  ;;  %v3775_v46 = vsel %vm5416_vm2, %v3774_v39, %v1033_v4  ;;  %v3787_v47 = vcvt.s32.f32 %v3786_v41  ;;  %v3789_v48 = vand.u32 2147483648, %v1035_v32  ;;  %v526_v50 = vmax.f32 %v270_v37, 0.0  ;;  %v275_v38 = vld [vmem:[#allocation2 + $0x7e0] sm:$0xff] }
 0x2ee   :  { %v1545_v52 = vmul.f32 0.06666667, %v3775_v46  ;;  %v3782_v49 = vor.u32 %v3781_v35, %v3780_v43  ;;  %v3792_v27 = vand.u32 2147483647, %v1036_v44  ;;  %v3794_v53 = vcvt.f32.s32 %v1036_v44 }
 0x2ef   :  { %vm5428_vm4 = vcmp.lt.f32.partialorder %v3784_v40, 8388608.0  ;;  %v3788_v55 = vand.u32 2147483647, %v3787_v47  ;;  %v1037_v56 = vmul.f32 15.0, %v781_v45  ;;  %v782_v57 = vmin.f32 %v526_v50, 1.0 }
 0x2f0   :  { %1801 = vst [vmem:[#allocation5 + $0x790] sm:$0xff] %v1545_v52  ;;  %v3783_v58 = vsel %vm5422_vm3, %v3782_v49, %v1034_v17  ;;  %v3795_v59 = vcvt.s32.f32 %v3794_v53  ;;  %v3797_v60 = vand.u32 2147483648, %v1036_v44  ;;  %v527_v61 = vmax.f32 %v271_v51, 0.0  ;;  %v276_v52 = vld [vmem:[#allocation2 + $0x7e8] sm:$0xff] }
 0x2f1   :  { %v1546_v63 = vmul.f32 0.06666667, %v3783_v58  ;;  %v3790_v0 = vor.u32 %v3789_v48, %v3788_v55  ;;  %v3800_v1 = vand.u32 2147483647, %v1037_v56  ;;  %v3802_v2 = vcvt.f32.s32 %v1037_v56 }
 0x2f2   :  { %vm5434_vm5 = vcmp.lt.f32.partialorder %v3792_v27, 8388608.0  ;;  %v3796_v4 = vand.u32 2147483647, %v3795_v59  ;;  %v1038_v5 = vmul.f32 15.0, %v782_v57  ;;  %v783_v6 = vmin.f32 %v527_v61, 1.0 }
 0x2f3   :  { %1802 = vst [vmem:[#allocation5 + $0x798] sm:$0xff] %v1546_v63  ;;  %v3791_v7 = vsel %vm5428_vm4, %v3790_v0, %v1035_v32  ;;  %v3803_v8 = vcvt.s32.f32 %v3802_v2  ;;  %v3805_v9 = vand.u32 2147483648, %v1037_v56  ;;  %v528_v10 = vmax.f32 %v272_v62, 0.0  ;;  %v277_v63 = vld [vmem:[#allocation2 + $0x7f0] sm:$0xff] }
 0x2f4   :  { %v1547_v12 = vmul.f32 0.06666667, %v3791_v7  ;;  %v3798_v13 = vor.u32 %v3797_v60, %v3796_v4  ;;  %v3808_v14 = vand.u32 2147483647, %v1038_v5  ;;  %v3810_v15 = vcvt.f32.s32 %v1038_v5 }
 0x2f5   :  { %vm5440_vm6 = vcmp.lt.f32.partialorder %v3800_v1, 8388608.0  ;;  %v3804_v17 = vand.u32 2147483647, %v3803_v8  ;;  %v1039_v18 = vmul.f32 15.0, %v783_v6  ;;  %v784_v19 = vmin.f32 %v528_v10, 1.0 }
 0x2f6   :  { %1803 = vst [vmem:[#allocation5 + $0x7a0] sm:$0xff] %v1547_v12  ;;  %v3799_v20 = vsel %vm5434_vm5, %v3798_v13, %v1036_v44  ;;  %v3811_v21 = vcvt.s32.f32 %v3810_v15  ;;  %v3813_v22 = vand.u32 2147483648, %v1038_v5  ;;  %v529_v23 = vmax.f32 %v273_v11, 0.0  ;;  %v278_v12 = vld [vmem:[#allocation2 + $0x7f8] sm:$0xff] }
 0x2f7   :  { %v1548_v29 = vmul.f32 0.06666667, %v3799_v20  ;;  %v3806_v28 = vor.u32 %v3805_v9, %v3804_v17  ;;  %v3816_v30 = vand.u32 2147483647, %v1039_v18  ;;  %v3818_v31 = vcvt.f32.s32 %v1039_v18 }
 0x2f8   :  { %vm5446_vm7 = vcmp.lt.f32.partialorder %v3808_v14, 8388608.0  ;;  %v3812_v32 = vand.u32 2147483647, %v3811_v21  ;;  %v1040_v33 = vmul.f32 15.0, %v784_v19  ;;  %v785_v34 = vmin.f32 %v529_v23, 1.0 }
 0x2f9   :  { %1804 = vst [vmem:[#allocation5 + $0x7a8] sm:$0xff] %v1548_v29  ;;  %v3807_v26 = vsel %vm5440_vm6, %v3806_v28, %v1037_v56  ;;  %v3819_v35 = vcvt.s32.f32 %v3818_v31  ;;  %v3821_v36 = vand.u32 2147483648, %v1039_v18  ;;  %v530_v37 = vmax.f32 %v274_v24, 0.0 }
 0x2fa   :  { %v1549_v39 = vmul.f32 0.06666667, %v3807_v26  ;;  %v3814_v40 = vor.u32 %v3813_v22, %v3812_v32  ;;  %v3824_v41 = vand.u32 2147483647, %v1040_v33  ;;  %v3826_v42 = vcvt.f32.s32 %v1040_v33 }
 0x2fb   :  { %vm5452_vm8 = vcmp.lt.f32.partialorder %v3816_v30, 8388608.0  ;;  %v3820_v44 = vand.u32 2147483647, %v3819_v35  ;;  %v1041_v45 = vmul.f32 15.0, %v785_v34  ;;  %v786_v46 = vmin.f32 %v530_v37, 1.0 }
 0x2fc   :  { %1805 = vst [vmem:[#allocation5 + $0x7b0] sm:$0xff] %v1549_v39  ;;  %v3815_v47 = vsel %vm5446_vm7, %v3814_v40, %v1038_v5  ;;  %v3827_v48 = vcvt.s32.f32 %v3826_v42  ;;  %v3829_v50 = vand.u32 2147483648, %v1040_v33  ;;  %v531_v51 = vmax.f32 %v275_v38, 0.0 }
 0x2fd   :  { %v1550_v49 = vmul.f32 0.06666667, %v3815_v47  ;;  %v3822_v27 = vor.u32 %v3821_v36, %v3820_v44  ;;  %v3832_v53 = vand.u32 2147483647, %v1041_v45  ;;  %v3834_v54 = vcvt.f32.s32 %v1041_v45 }
 0x2fe   :  { %vm5458_vm9 = vcmp.lt.f32.partialorder %v3824_v41, 8388608.0  ;;  %v3828_v56 = vand.u32 2147483647, %v3827_v48  ;;  %v1042_v57 = vmul.f32 15.0, %v786_v46  ;;  %v787_v58 = vmin.f32 %v531_v51, 1.0 }
 0x2ff   :  { %1806 = vst [vmem:[#allocation5 + $0x7b8] sm:$0xff] %v1550_v49  ;;  %v3823_v59 = vsel %vm5452_vm8, %v3822_v27, %v1039_v18  ;;  %v3835_v60 = vcvt.s32.f32 %v3834_v54  ;;  %v3837_v61 = vand.u32 2147483648, %v1041_v45  ;;  %v532_v62 = vmax.f32 %v276_v52, 0.0 }
 0x300   :  { %v1551_v0 = vmul.f32 0.06666667, %v3823_v59  ;;  %v3830_v1 = vor.u32 %v3829_v50, %v3828_v56  ;;  %v3840_v2 = vand.u32 2147483647, %v1042_v57  ;;  %v3842_v3 = vcvt.f32.s32 %v1042_v57 }
 0x301   :  { %vm5464_vm10 = vcmp.lt.f32.partialorder %v3832_v53, 8388608.0  ;;  %v3836_v5 = vand.u32 2147483647, %v3835_v60  ;;  %v1043_v6 = vmul.f32 15.0, %v787_v58  ;;  %v788_v7 = vmin.f32 %v532_v62, 1.0 }
 0x302   :  { %1807 = vst [vmem:[#allocation5 + $0x7c0] sm:$0xff] %v1551_v0  ;;  %v3831_v8 = vsel %vm5458_vm9, %v3830_v1, %v1040_v33  ;;  %v3843_v9 = vcvt.s32.f32 %v3842_v3  ;;  %v3845_v10 = vand.u32 2147483648, %v1042_v57  ;;  %v533_v11 = vmax.f32 %v277_v63, 0.0 }
 0x303   :  { %v1552_v13 = vmul.f32 0.06666667, %v3831_v8  ;;  %v3838_v14 = vor.u32 %v3837_v61, %v3836_v5  ;;  %vm5470_vm11 = vcmp.lt.f32.partialorder %v3840_v2, 8388608.0  ;;  %v3850_v16 = vcvt.f32.s32 %v1043_v6 }
 0x304   :  { %v3844_v17 = vand.u32 2147483647, %v3843_v9  ;;  %v3848_v18 = vand.u32 2147483647, %v1043_v6  ;;  %v1044_v19 = vmul.f32 15.0, %v788_v7  ;;  %v789_v20 = vmin.f32 %v533_v11, 1.0 }
 0x305   :  { %1808 = vst [vmem:[#allocation5 + $0x7c8] sm:$0xff] %v1552_v13  ;;  %v3839_v21 = vsel %vm5464_vm10, %v3838_v14, %v1041_v45  ;;  %v3851_v22 = vcvt.s32.f32 %v3850_v16  ;;  %v3853_v23 = vand.u32 2147483648, %v1043_v6  ;;  %v534_v24 = vmax.f32 %v278_v12, 0.0 }
 0x306   :  { %v1553_v29 = vmul.f32 0.06666667, %v3839_v21  ;;  %v3846_v28 = vor.u32 %v3845_v10, %v3844_v17  ;;  %v3858_v30 = vcvt.f32.s32 %v1044_v19  ;;  %v3856_v25 = vand.u32 2147483647, %v1044_v19 }
 0x307   :  { %v3852_v31 = vand.u32 2147483647, %v3851_v22  ;;  %v1045_v32 = vmul.f32 15.0, %v789_v20  ;;  %v790_v33 = vmin.f32 %v534_v24, 1.0  ;;  %vm3849_vm12 = vcmp.lt.f32.partialorder %v3848_v18, 8388608.0 }
 0x308   :  { %1809 = vst [vmem:[#allocation5 + $0x7d0] sm:$0xff] %v1553_v29  ;;  %v3847_v34 = vsel %vm5470_vm11, %v3846_v28, %v1042_v57  ;;  %v3859_v26 = vcvt.s32.f32 %v3858_v30  ;;  %v3861_v35 = vand.u32 2147483648, %v1044_v19  ;;  %vm3857_vm13 = vcmp.lt.f32.partialorder %v3856_v25, 8388608.0 }
 0x309   :  { %v1554_v36 = vmul.f32 0.06666667, %v3847_v34  ;;  %v3854_v37 = vor.u32 %v3853_v23, %v3852_v31  ;;  %v3866_v38 = vcvt.f32.s32 %v1045_v32  ;;  %v3864_v40 = vand.u32 2147483647, %v1045_v32 }
 0x30a   :  { %v3860_v39 = vand.u32 2147483647, %v3859_v26  ;;  %v1046_v41 = vmul.f32 15.0, %v790_v33  ;;  %v3869_v44 = vand.u32 2147483648, %v1045_v32 }
 0x30b   :  { %1810 = vst [vmem:[#allocation5 + $0x7d8] sm:$0xff] %v1554_v36  ;;  %v3855_v42 = vsel %vm3849_vm12, %v3854_v37, %v1043_v6  ;;  %v3867_v43 = vcvt.s32.f32 %v3866_v38  ;;  %vm3865_vm14 = vcmp.lt.f32.partialorder %v3864_v40, 8388608.0 }
 0x30c   :  { %v1555_v45 = vmul.f32 0.06666667, %v3855_v42  ;;  %v3862_v46 = vor.u32 %v3861_v35, %v3860_v39  ;;  %v3874_v47 = vcvt.f32.s32 %v1046_v41  ;;  %v3872_v50 = vand.u32 2147483647, %v1046_v41 }
 0x30d   :  { %v3868_v48 = vand.u32 2147483647, %v3867_v43  ;;  %v3877_v49 = vand.u32 2147483648, %v1046_v41 }
 0x30e   :  { %1811 = vst [vmem:[#allocation5 + $0x7e0] sm:$0xff] %v1555_v45  ;;  %v3863_v51 = vsel %vm3857_vm13, %v3862_v46, %v1044_v19  ;;  %v3875_v52 = vcvt.s32.f32 %v3874_v47  ;;  %vm3873_vm15 = vcmp.lt.f32.partialorder %v3872_v50, 8388608.0 }
 0x30f   :  { %v1556_v27 = vmul.f32 0.06666667, %v3863_v51  ;;  %v3870_v53 = vor.u32 %v3869_v44, %v3868_v48 }
 0x310   :  { %v3876_v54 = vand.u32 2147483647, %v3875_v52 }
 0x311   :  { %1812 = vst [vmem:[#allocation5 + $0x7e8] sm:$0xff] %v1556_v27  ;;  %v3871_v55 = vsel %vm3865_vm14, %v3870_v53, %v1045_v32 }
 0x312   :  { %v1557_v56 = vmul.f32 0.06666667, %v3871_v55  ;;  %v3878_v57 = vor.u32 %v3877_v49, %v3876_v54 }
 0x314   :  { %1813 = vst [vmem:[#allocation5 + $0x7f0] sm:$0xff] %v1557_v56  ;;  %v3879_v58 = vsel %vm3873_vm15, %v3878_v57, %v1046_v41 }
 0x315   :  { %v1558_v59 = vmul.f32 0.06666667, %v3879_v58 }
 0x317   :  { %1814 = vst [vmem:[#allocation5 + $0x7f8] sm:$0xff] %v1558_v59 }
 0x318   :  { %3915 = shalt.err (!%p3912_p9)
}
 0x319   :  { %1826 = dma.vmem_to_hbm [thread:$0]  %s1821_s13, 32768, %s5485_s1, [#allocation4], %s3929_s9, %s3929_s9, %s3930_s10  }
 0x31a   :  { %3926 = dma.done.wait [#allocation4], 32768  }
 0x31b   :  { %3927 = vsyncadd [#allocation4], 4294934528 }
 0x31c   :  { %1830 = vsyncpa [#allocation3], 1 }
 0x31d   :  { %1831 = vsyncpa [#allocation4], 1 }

</bundles_post_ra>
